<compile_context>
chip_gen: v5e
topology: v5e:2x2
jax: 0.10.0
libtpu: 0.0.40
codegen_flags: <defaults>
</compile_context>

<pallas_src>
import functools
import numpy as np
import jax
import jax.numpy as jnp
from jax.experimental import pallas as pl
from jax.experimental.pallas import tpu as pltpu


def _round_up(x, m):
    return ((x + m - 1) // m) * m


# ----------------------------------------------------------------------------
# Pallas kernel: one (batch block, RK-step chunk) grid point of the RK4(3/8)
# integration of dz = f(z) dX.  y / z_final persist in VMEM scratch across chunks.
# ----------------------------------------------------------------------------
def ncde_kernel(z0_ref, dx_ref, bstep_ref, bw_ref,
                w_func_ref, b_func_ref, w_lin_ref, b_lin_ref,
                out_ref, y_scr, zf_scr,
                *, chunk_steps, C, H, tanh_bf16):
    k_idx = pl.program_id(1)

    @pl.when(k_idx == 0)
    def _():
        y_scr[...] = z0_ref[...]
        zf_scr[...] = z0_ref[...]

    bstep = bstep_ref[...]            # (B, 1) int32, -1 => never recorded (final_index->0)
    bw = bw_ref[...]                  # (B, 1) f32 linear-interp weight
    bias = b_func_ref[...]            # (1, CHp)
    dxrow = dx_ref[0]                 # (B, DXW) dt-scaled dX/dt, lane = (q*4+r)*C + c

    def stage(y, q, r):
        # K = dt * f(y, t_stage): hz = tanh(y @ Wf + bf) laid out densely as [c*H + h];
        # each channel's dX value is broadcast across the H lanes of its slice.
        pre = jnp.dot(y.astype(jnp.bfloat16), w_func_ref[...],
                      preferred_element_type=jnp.float32) + bias
        hz = jnp.tanh(pre.astype(jnp.bfloat16)) if tanh_bf16 else jnp.tanh(pre)
        base = (q * 4 + r) * C
        k = hz[:, 0:H] * dxrow[:, base:base + 1]
        for c in range(1, C):         # static lane slices; C-1 VPU adds
            k = k + hz[:, c * H:(c + 1) * H] * dxrow[:, base + c:base + c + 1]
        return k

    y = y_scr[...]
    z_fin = zf_scr[...]
    for q in range(chunk_steps):      # static unroll over the chunk
        s_glob = k_idx * chunk_steps + q
        # torchdiffeq rk4_alt_step_func (3/8 rule); dt is folded into dxrow
        k1 = stage(y, q, 0)
        k2 = stage(y + k1 * (1.0 / 3.0), q, 1)
        k3 = stage(y + (k2 - k1 * (1.0 / 3.0)), q, 2)
        k4 = stage(y + (k1 - k2 + k3), q, 3)
        y1 = y + (k1 + 3.0 * (k2 + k3) + k4) * 0.125
        # record (linear-interpolated) solution for batches whose final time lands here
        z_fin = jnp.where(bstep == s_glob, y + bw * (y1 - y), z_fin)
        y = y1
    y_scr[...] = y
    zf_scr[...] = z_fin

    @pl.when(k_idx == pl.num_programs(1) - 1)
    def _():
        out_ref[...] = jnp.dot(z_fin.astype(jnp.bfloat16), w_lin_ref[...],
                               preferred_element_type=jnp.float32) + b_lin_ref[...]


# ----------------------------------------------------------------------------
# Host-side glue (scalar / data-dependent bookkeeping only)
# ----------------------------------------------------------------------------
def _interpret_t(tt, times_np, n_pieces):
    maxlen = n_pieces - 1
    index = int((tt > times_np).sum()) - 1
    index = max(0, min(index, maxlen))
    frac = float(tt - times_np[index])
    return index, frac


def build_schedule(times_np, final_index_np):
    T = len(times_np)
    n_pieces = T - 1
    # non-stream output-time construction (matches the PyTorch branch)
    sorted_fi, inverse = np.unique(final_index_np, return_inverse=True)
    if 0 in sorted_fi:
        sorted_fi = sorted_fi[1:]
        fi = inverse.astype(np.int64)
    else:
        fi = inverse.astype(np.int64) + 1
    if (T - 1) in sorted_fi:
        sorted_fi = sorted_fi[:-1]
    t_out = np.concatenate(
        [times_np[0:1], times_np[sorted_fi.astype(np.int64)], times_np[-1:]]
    ).astype(np.float64)

    # rk4 fixed-step grid (torchdiffeq grid_constructor_from_step_size)
    step_size = float(np.min(times_np[1:] - times_np[:-1]))
    start, end = float(t_out[0]), float(t_out[-1])
    niters = int(np.ceil((end - start) / step_size + 1))
    grid = np.arange(niters, dtype=np.float64) * step_size + start
    grid[-1] = end
    n_steps = len(grid) - 1

    stage_idx = np.zeros((n_steps * 4,), np.int32)
    stage_frac = np.zeros((n_steps * 4,), np.float32)
    stage_dt = np.zeros((n_steps,), np.float32)
    rec_step = np.zeros((len(t_out),), np.int32)
    rec_w = np.zeros((len(t_out),), np.float32)

    j = 1
    for s in range(n_steps):
        t0, t1 = grid[s], grid[s + 1]
        dt = t1 - t0
        stage_dt[s] = dt
        stage_times = (t0, t0 + dt / 3.0, t0 + 2.0 * dt / 3.0, t1)
        for q, tt in enumerate(stage_times):
            idx, frac = _interpret_t(tt, times_np.astype(np.float64), n_pieces)
            stage_idx[s * 4 + q] = idx
            stage_frac[s * 4 + q] = frac
        while j < len(t_out) and t1 >= t_out[j]:
            rec_step[j] = s
            rec_w[j] = 0.0 if t1 == t0 else (t_out[j] - t0) / (t1 - t0)
            j += 1

    B = len(fi)
    batch_step = np.full((B, 1), -1, np.int32)
    batch_w = np.zeros((B, 1), np.float32)
    for b in range(B):
        k = int(fi[b])
        if k >= 1:
            batch_step[b, 0] = rec_step[k]
            batch_w[b, 0] = rec_w[k]
    return stage_idx, stage_frac, stage_dt, batch_step, batch_w


def neural_cde_forward(times, coeffs, final_index, params, chunk_steps=8):
    coeff_a, coeff_b, coeff_2c, coeff_3d = coeffs
    B, _, C = coeff_a.shape
    H = int(params["W_init"].shape[0])
    O = int(params["W_lin"].shape[0])

    CHp = _round_up(C * H, 128)        # densely packed func-output lanes
    O_pad = _round_up(O, 128)

    # bf16 EUP tanh on v6e/v7x and newer; keep f32 math on v5e and older.
    try:
        dk = jax.devices()[0].device_kind.lower()
        newer_tc = not any(s in dk for s in ("v2", "v3", "v4", "v5"))
    except Exception:
        newer_tc = False
    tanh_bf16 = newer_tc

    # batch blocking: >=2 blocks whenever possible (v7x has 2 TensorCores);
    # 256-row blocks at large B on v6e/v7x to fill the 256x256 MXU.
    if B >= 256 and newer_tc:
        B_block = 256
    elif B >= 128:
        B_block = 128
    elif B > 8:
        B_block = _round_up(B, 16) // 2
    else:
        B_block = 8
    B_pad = _round_up(max(B, 8), B_block)
    n_bblk = B_pad // B_block

    # ---- scalar / data-dependent time bookkeeping ----
    times_np = np.asarray(times, np.float64)
    fi_np = np.asarray(final_index, np.int64)
    stage_idx, stage_frac, stage_dt, batch_step, batch_w = build_schedule(times_np, fi_np)
    n_steps = int(stage_dt.shape[0])
    S4 = 4 * n_steps

    n_chunks = max(1, -(-n_steps // chunk_steps))
    S4p = n_chunks * chunk_steps * 4
    DXW = _round_up(chunk_steps * 4 * C, 128)

    # ---- vectorized prologue: dt-scaled spline derivative at every RK stage ----
    bc = jnp.transpose(jnp.asarray(coeff_b, jnp.float32), (1, 0, 2))   # (T-1, B, C)
    tc = jnp.transpose(jnp.asarray(coeff_2c, jnp.float32), (1, 0, 2))
    td = jnp.transpose(jnp.asarray(coeff_3d, jnp.float32), (1, 0, 2))
    idx = jnp.asarray(stage_idx)
    frac = jnp.asarray(stage_frac)[:, None, None]
    dt4 = jnp.asarray(np.repeat(stage_dt, 4).astype(np.float32))[:, None, None]
    dX = (bc[idx] + (tc[idx] + td[idx] * frac) * frac) * dt4           # (S4, B, C)

    # pack compactly & lane-densely: one row of chunk_steps*4*C values per (chunk, batch)
    dX_p = jnp.zeros((S4p, B_pad, C), jnp.float32).at[:S4, :B, :].set(dX)
    dxp = jnp.transpose(dX_p.reshape(n_chunks, chunk_steps * 4, B_pad, C),
                        (0, 2, 1, 3)).reshape(n_chunks, B_pad, chunk_steps * 4 * C)
    if DXW != chunk_steps * 4 * C:
        dxp = jnp.zeros((n_chunks, B_pad, DXW), jnp.float32).at[
            :, :, :chunk_steps * 4 * C].set(dxp)

    # ---- z0 = initial_network(spline.evaluate(times[0])), hoisted to host (exact f32) ----
    W_init = np.asarray(params["W_init"], np.float32)
    b_init = np.asarray(params["b_init"], np.float32)
    x0 = np.asarray(coeff_a)[:, 0, :].astype(np.float32)
    z0 = x0 @ W_init.T + b_init                                         # (B, H)
    z0_pad = np.zeros((B_pad, H), np.float32)
    z0_pad[:B] = z0

    bstep = np.full((B_pad, 1), -1, np.int32); bstep[:B] = batch_step
    bw = np.zeros((B_pad, 1), np.float32); bw[:B] = batch_w

    # ---- densely packed weights (func-output lane c*H + h) ----
    Wf = np.zeros((H, CHp), np.float32)
    Wf[:, :C * H] = np.asarray(params["W_func"], np.float32).T          # (H, C*H)
    bf_ = np.zeros((1, CHp), np.float32)
    bf_[0, :C * H] = np.asarray(params["b_func"], np.float32)
    Wl = np.zeros((H, O_pad), np.float32)
    Wl[:, :O] = np.asarray(params["W_lin"], np.float32).T
    bl = np.zeros((1, O_pad), np.float32)
    bl[0, :O] = np.asarray(params["b_lin"], np.float32)

    w_func = jnp.asarray(Wf, jnp.bfloat16)        # bf16 MXU operand (in-loop matmul)
    b_func = jnp.asarray(bf_)
    w_lin = jnp.asarray(Wl, jnp.bfloat16)         # bf16 MXU operand (final linear)
    b_lin = jnp.asarray(bl)

    # explicit scoped-VMEM budget from the actual per-block buffers (+headroom)
    lane = lambda n: _round_up(max(int(n), 1), 128)
    sub = lambda n: _round_up(max(int(n), 1), 8)
    per_block = (
        2 * sub(B_block) * lane(DXW) * 4                 # dX chunk (double-buffered)
        + sub(B_block) * (lane(H) + 2 * lane(1)) * 4     # z0, bstep, bw
        + sub(H) * (lane(CHp) + lane(O_pad)) * 2         # bf16 weights
        + sub(1) * (lane(CHp) + lane(O_pad)) * 4         # biases
        + 2 * sub(B_block) * lane(O_pad) * 4             # output
        + 2 * sub(B_block) * lane(H) * 4                 # y / z_final scratch
    )
    vmem_limit = int(min(max(3 * per_block + (2 << 20), 8 << 20), 64 << 20))

    kern = functools.partial(ncde_kernel, chunk_steps=chunk_steps, C=C, H=H,
                             tanh_bf16=tanh_bf16)

    out = pl.pallas_call(
        kern,
        out_shape=jax.ShapeDtypeStruct((B_pad, O_pad), jnp.float32),
        grid=(n_bblk, n_chunks),
        in_specs=[
            pl.BlockSpec((B_block, H), lambda i, k: (i, 0)),            # z0
            pl.BlockSpec((1, B_block, DXW), lambda i, k: (k, i, 0)),    # packed dX chunk
            pl.BlockSpec((B_block, 1), lambda i, k: (i, 0)),            # batch_step
            pl.BlockSpec((B_block, 1), lambda i, k: (i, 0)),            # batch_w
            pl.BlockSpec((H, CHp), lambda i, k: (0, 0)),                # W_func (bf16)
            pl.BlockSpec((1, CHp), lambda i, k: (0, 0)),                # b_func
            pl.BlockSpec((H, O_pad), lambda i, k: (0, 0)),              # W_lin (bf16)
            pl.BlockSpec((1, O_pad), lambda i, k: (0, 0)),              # b_lin
        ],
        out_specs=pl.BlockSpec((B_block, O_pad), lambda i, k: (i, 0)),
        scratch_shapes=[pltpu.VMEM((B_block, H), jnp.float32),          # running RK state y
                        pltpu.VMEM((B_block, H), jnp.float32)],         # recorded z(final)
        compiler_params=pltpu.CompilerParams(
            dimension_semantics=("parallel", "arbitrary"),
            vmem_limit_bytes=vmem_limit),
    )(jnp.asarray(z0_pad), dxp, jnp.asarray(bstep), jnp.asarray(bw),
      w_func, b_func, w_lin, b_lin)

    pred = out[:B, :O]
    return pred, (np.asarray(dX), batch_step, batch_w, tanh_bf16)


# ----------------------------------------------------------------------------
# Plain numpy reference (same math; mirrors the bf16 MXU-operand / bf16-tanh rounding)
# ----------------------------------------------------------------------------
def reference_forward(dX, batch_step, batch_w, x0, params, tanh_bf16):
    def r(a):  # round-to-nearest-even bf16, as the kernel's bf16 casts
        return np.asarray(jnp.asarray(np.asarray(a, np.float32), jnp.bfloat16).astype(jnp.float32))

    W_init = np.asarray(params["W_init"], np.float32)
    b_init = np.asarray(params["b_init"], np.float32)
    W_funcT = r(np.asarray(params["W_func"], np.float32).T)       # (H, C*H)
    b_func = np.asarray(params["b_func"], np.float32)
    W_linT = r(np.asarray(params["W_lin"], np.float32).T)
    b_lin = np.asarray(params["b_lin"], np.float32)

    B, C = x0.shape
    H = W_init.shape[0]

    def K(y, dx):  # dx already scaled by dt: (B, C)
        pre = r(y) @ W_funcT + b_func
        hz = r(np.tanh(r(pre))) if tanh_bf16 else np.tanh(pre)
        acc = np.zeros((B, H), np.float32)
        for c in range(C):
            acc += hz[:, c * H:(c + 1) * H] * dx[:, c:c + 1]
        return acc

    y = (x0 @ W_init.T + b_init).astype(np.float32)
    z_fin = y.copy()                                # final_index->0 batches keep z0
    n_steps = dX.shape[0] // 4
    for s in range(n_steps):
        k1 = K(y, dX[4 * s + 0])
        k2 = K(y + k1 * (1.0 / 3.0), dX[4 * s + 1])
        k3 = K(y + (k2 - k1 * (1.0 / 3.0)), dX[4 * s + 2])
        k4 = K(y + (k1 - k2 + k3), dX[4 * s + 3])
        y1 = y + (k1 + 3.0 * (k2 + k3) + k4) * 0.125
        for b in range(B):
            if batch_step[b, 0] == s:
                z_fin[b] = y[b] + batch_w[b, 0] * (y1[b] - y[b])
        y = y1
    return r(z_fin) @ W_linT + b_lin


# ----------------------------------------------------------------------------
def init_params(key, C, H, O):
    ks = jax.random.split(key, 6)
    lim_c = 1.0 / np.sqrt(C)
    lim_h = 1.0 / np.sqrt(H)
    return {
        "W_init": jax.random.uniform(ks[0], (H, C), jnp.float32, -lim_c, lim_c),
        "b_init": jax.random.uniform(ks[1], (H,), jnp.float32, -lim_c, lim_c),
        "W_func": jax.random.uniform(ks[2], (C * H, H), jnp.float32, -lim_h, lim_h),
        "b_func": jax.random.uniform(ks[3], (C * H,), jnp.float32, -lim_h, lim_h),
        "W_lin": jax.random.uniform(ks[4], (O, H), jnp.float32, -lim_h, lim_h),
        "b_lin": jax.random.uniform(ks[5], (O,), jnp.float32, -lim_h, lim_h),
    }


if __name__ == "__main__":
    B, C, H, O, T = 2, 4, 32, 4, 8

    key = jax.random.PRNGKey(0)
    k_coef, k_par = jax.random.split(key)
    kc = jax.random.split(k_coef, 4)

    # evenly spaced times (power-of-two spacing keeps the torchdiffeq grid exact)
    times = jnp.arange(T, dtype=jnp.float32) * 0.125
    coeffs = tuple(0.5 * jax.random.normal(kc[i], (B, T - 1, C), jnp.float32)
                   for i in range(4))
    final_index = jnp.array([5, 7], dtype=jnp.int32)

    params = init_params(k_par, C, H, O)

    pred, (dX, bstep, bw, tanh_bf16) = neural_cde_forward(times, coeffs, final_index, params)
    pred = jax.block_until_ready(pred)

    # reference check (same precomputed schedule, plain numpy, mirrored bf16 rounding)
    x0 = np.asarray(coeffs[0])[:, 0, :].astype(np.float32)
    ref = reference_forward(dX, bstep, bw, x0, params, tanh_bf16)
    err = float(np.max(np.abs(np.asarray(pred) - ref)))
    # tolerance deliberately loose: bf16 MXU operands + (on v6e/v7x) bf16 EUP tanh; the
    # reference mirrors the bf16 roundings but not the EUP's internal approximation.
    assert err < 5e-2, f"kernel/reference mismatch: {err}"

    print("KERNEL_OK")
</pallas_src>

<mosaic_0001>
module attributes {stable_mosaic.version = 11 : i64} {
  func.func @ncde_kernel(%arg0: i32, %arg1: i32, %arg2: memref<8x32xf32, #tpu.memory_space<vmem>>, %arg3: memref<1x8x128xf32, #tpu.memory_space<vmem>>, %arg4: memref<8x1xi32, #tpu.memory_space<vmem>>, %arg5: memref<8x1xf32, #tpu.memory_space<vmem>>, %arg6: memref<32x128xbf16, #tpu.memory_space<vmem>>, %arg7: memref<1x128xf32, #tpu.memory_space<vmem>>, %arg8: memref<32x128xbf16, #tpu.memory_space<vmem>>, %arg9: memref<1x128xf32, #tpu.memory_space<vmem>>, %arg10: memref<8x128xf32, #tpu.memory_space<vmem>>, %arg11: memref<8x32xf32, #tpu.memory_space<vmem>>, %arg12: memref<8x32xf32, #tpu.memory_space<vmem>>) attributes {dimension_semantics = [#tpu.dimension_semantics<parallel>, #tpu.dimension_semantics<arbitrary>], iteration_bounds = array<i64: 1, 1>, scalar_prefetch = 0 : i64, scratch_operands = 2 : i64, tpu.core_type = #tpu.core_type<tc>, window_params = [{transform_indices = @transform_0, window_bounds = array<i64: 8, 32>}, {transform_indices = @transform_1, window_bounds = array<i64: 1, 8, 128>}, {transform_indices = @transform_2, window_bounds = array<i64: 8, 1>}, {transform_indices = @transform_3, window_bounds = array<i64: 8, 1>}, {pipeline_mode = #tpu.pipeline_mode<synchronous>, transform_indices = @transform_4, window_bounds = array<i64: 32, 128>}, {pipeline_mode = #tpu.pipeline_mode<synchronous>, transform_indices = @transform_5, window_bounds = array<i64: 1, 128>}, {pipeline_mode = #tpu.pipeline_mode<synchronous>, transform_indices = @transform_6, window_bounds = array<i64: 32, 128>}, {pipeline_mode = #tpu.pipeline_mode<synchronous>, transform_indices = @transform_7, window_bounds = array<i64: 1, 128>}, {transform_indices = @transform_8, window_bounds = array<i64: 8, 128>}]} {
    %c0_i32 = arith.constant 0 : i32
    %0 = arith.cmpi eq, %arg1, %c0_i32 : i32
    %1 = arith.extui %0 : i1 to i32
    %c0_i32_0 = arith.constant 0 : i32
    %2 = arith.cmpi ne, %1, %c0_i32_0 : i32
    scf.if %2 {
      %c0_154 = arith.constant 0 : index
      %c0_155 = arith.constant 0 : index
      %1207 = vector.load %arg2[%c0_154, %c0_155] : memref<8x32xf32, #tpu.memory_space<vmem>>, vector<8x32xf32>
      %c0_156 = arith.constant 0 : index
      %c0_157 = arith.constant 0 : index
      %1208 = vector.load %arg11[%c0_156, %c0_157] : memref<8x32xf32, #tpu.memory_space<vmem>>, vector<8x32xf32>
      tpu.vector_store %arg11[%c0_156, %c0_157], %1207 {strides = array<i32>} : memref<8x32xf32, #tpu.memory_space<vmem>>, vector<8x32xf32>,
      %c0_158 = arith.constant 0 : index
      %c0_159 = arith.constant 0 : index
      %1209 = vector.load %arg2[%c0_158, %c0_159] : memref<8x32xf32, #tpu.memory_space<vmem>>, vector<8x32xf32>
      %c0_160 = arith.constant 0 : index
      %c0_161 = arith.constant 0 : index
      %1210 = vector.load %arg12[%c0_160, %c0_161] : memref<8x32xf32, #tpu.memory_space<vmem>>, vector<8x32xf32>
      tpu.vector_store %arg12[%c0_160, %c0_161], %1209 {strides = array<i32>} : memref<8x32xf32, #tpu.memory_space<vmem>>, vector<8x32xf32>,
    } else {
    }
    %c0 = arith.constant 0 : index
    %c0_1 = arith.constant 0 : index
    %3 = vector.load %arg4[%c0, %c0_1] : memref<8x1xi32, #tpu.memory_space<vmem>>, vector<8x1xi32>
    %c0_2 = arith.constant 0 : index
    %c0_3 = arith.constant 0 : index
    %4 = vector.load %arg5[%c0_2, %c0_3] : memref<8x1xf32, #tpu.memory_space<vmem>>, vector<8x1xf32>
    %c0_4 = arith.constant 0 : index
    %c0_5 = arith.constant 0 : index
    %5 = vector.load %arg7[%c0_4, %c0_5] : memref<1x128xf32, #tpu.memory_space<vmem>>, vector<1x128xf32>
    %c0_6 = arith.constant 0 : index
    %c0_7 = arith.constant 0 : index
    %c0_8 = arith.constant 0 : index
    %6 = vector.load %arg3[%c0_6, %c0_7, %c0_8] : memref<1x8x128xf32, #tpu.memory_space<vmem>>, vector<1x8x128xf32>
    %7 = vector.shape_cast %6 : vector<1x8x128xf32> to vector<8x128xf32>
    %c0_9 = arith.constant 0 : index
    %c0_10 = arith.constant 0 : index
    %8 = vector.load %arg11[%c0_9, %c0_10] : memref<8x32xf32, #tpu.memory_space<vmem>>, vector<8x32xf32>
    %c0_11 = arith.constant 0 : index
    %c0_12 = arith.constant 0 : index
    %9 = vector.load %arg12[%c0_11, %c0_12] : memref<8x32xf32, #tpu.memory_space<vmem>>, vector<8x32xf32>
    %c8_i32 = arith.constant 8 : i32
    %10 = arith.muli %arg1, %c8_i32 : i32
    %c0_i32_13 = arith.constant 0 : i32
    %11 = arith.addi %10, %c0_i32_13 : i32
    %12 = arith.truncf %8 : vector<8x32xf32> to vector<8x32xbf16>
    %c0_14 = arith.constant 0 : index
    %c0_15 = arith.constant 0 : index
    %13 = vector.load %arg6[%c0_14, %c0_15] : memref<32x128xbf16, #tpu.memory_space<vmem>>, vector<32x128xbf16>
    %cst = arith.constant dense<0.000000e+00> : vector<8x128xf32>
    %14 = tpu.matmul %12, %13, %cst {dimension_numbers = #tpu.dot_dimension_numbers<[1], [0], [0], [1], [0, 0, 1, 1], [], []>} : vector<8x32xbf16>, vector<32x128xbf16>, vector<8x128xf32> -> vector<8x128xf32>
    %15 = vector.broadcast %5 : vector<1x128xf32> to vector<8x128xf32>
    %16 = arith.addf %14, %15 : vector<8x128xf32>
    %17 = arith.truncf %16 : vector<8x128xf32> to vector<8x128xbf16>
    %18 = math.tanh %17 : vector<8x128xbf16>
    %19 = vector.extract_strided_slice %18 {offsets = [0, 0], sizes = [8, 32], strides = [1, 1]} : vector<8x128xbf16> to vector<8x32xbf16>
    %20 = vector.extract_strided_slice %7 {offsets = [0, 0], sizes = [8, 1], strides = [1, 1]} : vector<8x128xf32> to vector<8x1xf32>
    %21 = arith.extf %19 : vector<8x32xbf16> to vector<8x32xf32>
    %22 = vector.broadcast %20 : vector<8x1xf32> to vector<8x32xf32>
    %23 = arith.mulf %21, %22 : vector<8x32xf32>
    %24 = vector.extract_strided_slice %18 {offsets = [0, 32], sizes = [8, 32], strides = [1, 1]} : vector<8x128xbf16> to vector<8x32xbf16>
    %25 = vector.extract_strided_slice %7 {offsets = [0, 1], sizes = [8, 1], strides = [1, 1]} : vector<8x128xf32> to vector<8x1xf32>
    %26 = arith.extf %24 : vector<8x32xbf16> to vector<8x32xf32>
    %27 = vector.broadcast %25 : vector<8x1xf32> to vector<8x32xf32>
    %28 = arith.mulf %26, %27 : vector<8x32xf32>
    %29 = arith.addf %23, %28 : vector<8x32xf32>
    %30 = vector.extract_strided_slice %18 {offsets = [0, 64], sizes = [8, 32], strides = [1, 1]} : vector<8x128xbf16> to vector<8x32xbf16>
    %31 = vector.extract_strided_slice %7 {offsets = [0, 2], sizes = [8, 1], strides = [1, 1]} : vector<8x128xf32> to vector<8x1xf32>
    %32 = arith.extf %30 : vector<8x32xbf16> to vector<8x32xf32>
    %33 = vector.broadcast %31 : vector<8x1xf32> to vector<8x32xf32>
    %34 = arith.mulf %32, %33 : vector<8x32xf32>
    %35 = arith.addf %29, %34 : vector<8x32xf32>
    %36 = vector.extract_strided_slice %18 {offsets = [0, 96], sizes = [8, 32], strides = [1, 1]} : vector<8x128xbf16> to vector<8x32xbf16>
    %37 = vector.extract_strided_slice %7 {offsets = [0, 3], sizes = [8, 1], strides = [1, 1]} : vector<8x128xf32> to vector<8x1xf32>
    %38 = arith.extf %36 : vector<8x32xbf16> to vector<8x32xf32>
    %39 = vector.broadcast %37 : vector<8x1xf32> to vector<8x32xf32>
    %40 = arith.mulf %38, %39 : vector<8x32xf32>
    %41 = arith.addf %35, %40 : vector<8x32xf32>
    %cst_16 = arith.constant 0.333333343 : f32
    %42 = vector.broadcast %cst_16 : f32 to vector<8x32xf32>
    %43 = arith.mulf %41, %42 : vector<8x32xf32>
    %44 = arith.addf %8, %43 : vector<8x32xf32>
    %45 = arith.truncf %44 : vector<8x32xf32> to vector<8x32xbf16>
    %c0_17 = arith.constant 0 : index
    %c0_18 = arith.constant 0 : index
    %46 = vector.load %arg6[%c0_17, %c0_18] : memref<32x128xbf16, #tpu.memory_space<vmem>>, vector<32x128xbf16>
    %cst_19 = arith.constant dense<0.000000e+00> : vector<8x128xf32>
    %47 = tpu.matmul %45, %46, %cst_19 {dimension_numbers = #tpu.dot_dimension_numbers<[1], [0], [0], [1], [0, 0, 1, 1], [], []>} : vector<8x32xbf16>, vector<32x128xbf16>, vector<8x128xf32> -> vector<8x128xf32>
    %48 = vector.broadcast %5 : vector<1x128xf32> to vector<8x128xf32>
    %49 = arith.addf %47, %48 : vector<8x128xf32>
    %50 = arith.truncf %49 : vector<8x128xf32> to vector<8x128xbf16>
    %51 = math.tanh %50 : vector<8x128xbf16>
    %52 = vector.extract_strided_slice %51 {offsets = [0, 0], sizes = [8, 32], strides = [1, 1]} : vector<8x128xbf16> to vector<8x32xbf16>
    %53 = vector.extract_strided_slice %7 {offsets = [0, 4], sizes = [8, 1], strides = [1, 1]} : vector<8x128xf32> to vector<8x1xf32>
    %54 = arith.extf %52 : vector<8x32xbf16> to vector<8x32xf32>
    %55 = vector.broadcast %53 : vector<8x1xf32> to vector<8x32xf32>
    %56 = arith.mulf %54, %55 : vector<8x32xf32>
    %57 = vector.extract_strided_slice %51 {offsets = [0, 32], sizes = [8, 32], strides = [1, 1]} : vector<8x128xbf16> to vector<8x32xbf16>
    %58 = vector.extract_strided_slice %7 {offsets = [0, 5], sizes = [8, 1], strides = [1, 1]} : vector<8x128xf32> to vector<8x1xf32>
    %59 = arith.extf %57 : vector<8x32xbf16> to vector<8x32xf32>
    %60 = vector.broadcast %58 : vector<8x1xf32> to vector<8x32xf32>
    %61 = arith.mulf %59, %60 : vector<8x32xf32>
    %62 = arith.addf %56, %61 : vector<8x32xf32>
    %63 = vector.extract_strided_slice %51 {offsets = [0, 64], sizes = [8, 32], strides = [1, 1]} : vector<8x128xbf16> to vector<8x32xbf16>
    %64 = vector.extract_strided_slice %7 {offsets = [0, 6], sizes = [8, 1], strides = [1, 1]} : vector<8x128xf32> to vector<8x1xf32>
    %65 = arith.extf %63 : vector<8x32xbf16> to vector<8x32xf32>
    %66 = vector.broadcast %64 : vector<8x1xf32> to vector<8x32xf32>
    %67 = arith.mulf %65, %66 : vector<8x32xf32>
    %68 = arith.addf %62, %67 : vector<8x32xf32>
    %69 = vector.extract_strided_slice %51 {offsets = [0, 96], sizes = [8, 32], strides = [1, 1]} : vector<8x128xbf16> to vector<8x32xbf16>
    %70 = vector.extract_strided_slice %7 {offsets = [0, 7], sizes = [8, 1], strides = [1, 1]} : vector<8x128xf32> to vector<8x1xf32>
    %71 = arith.extf %69 : vector<8x32xbf16> to vector<8x32xf32>
    %72 = vector.broadcast %70 : vector<8x1xf32> to vector<8x32xf32>
    %73 = arith.mulf %71, %72 : vector<8x32xf32>
    %74 = arith.addf %68, %73 : vector<8x32xf32>
    %cst_20 = arith.constant 0.333333343 : f32
    %75 = vector.broadcast %cst_20 : f32 to vector<8x32xf32>
    %76 = arith.mulf %41, %75 : vector<8x32xf32>
    %77 = arith.subf %74, %76 : vector<8x32xf32>
    %78 = arith.addf %8, %77 : vector<8x32xf32>
    %79 = arith.truncf %78 : vector<8x32xf32> to vector<8x32xbf16>
    %c0_21 = arith.constant 0 : index
    %c0_22 = arith.constant 0 : index
    %80 = vector.load %arg6[%c0_21, %c0_22] : memref<32x128xbf16, #tpu.memory_space<vmem>>, vector<32x128xbf16>
    %cst_23 = arith.constant dense<0.000000e+00> : vector<8x128xf32>
    %81 = tpu.matmul %79, %80, %cst_23 {dimension_numbers = #tpu.dot_dimension_numbers<[1], [0], [0], [1], [0, 0, 1, 1], [], []>} : vector<8x32xbf16>, vector<32x128xbf16>, vector<8x128xf32> -> vector<8x128xf32>
    %82 = vector.broadcast %5 : vector<1x128xf32> to vector<8x128xf32>
    %83 = arith.addf %81, %82 : vector<8x128xf32>
    %84 = arith.truncf %83 : vector<8x128xf32> to vector<8x128xbf16>
    %85 = math.tanh %84 : vector<8x128xbf16>
    %86 = vector.extract_strided_slice %85 {offsets = [0, 0], sizes = [8, 32], strides = [1, 1]} : vector<8x128xbf16> to vector<8x32xbf16>
    %87 = vector.extract_strided_slice %7 {offsets = [0, 8], sizes = [8, 1], strides = [1, 1]} : vector<8x128xf32> to vector<8x1xf32>
    %88 = arith.extf %86 : vector<8x32xbf16> to vector<8x32xf32>
    %89 = vector.broadcast %87 : vector<8x1xf32> to vector<8x32xf32>
    %90 = arith.mulf %88, %89 : vector<8x32xf32>
    %91 = vector.extract_strided_slice %85 {offsets = [0, 32], sizes = [8, 32], strides = [1, 1]} : vector<8x128xbf16> to vector<8x32xbf16>
    %92 = vector.extract_strided_slice %7 {offsets = [0, 9], sizes = [8, 1], strides = [1, 1]} : vector<8x128xf32> to vector<8x1xf32>
    %93 = arith.extf %91 : vector<8x32xbf16> to vector<8x32xf32>
    %94 = vector.broadcast %92 : vector<8x1xf32> to vector<8x32xf32>
    %95 = arith.mulf %93, %94 : vector<8x32xf32>
    %96 = arith.addf %90, %95 : vector<8x32xf32>
    %97 = vector.extract_strided_slice %85 {offsets = [0, 64], sizes = [8, 32], strides = [1, 1]} : vector<8x128xbf16> to vector<8x32xbf16>
    %98 = vector.extract_strided_slice %7 {offsets = [0, 10], sizes = [8, 1], strides = [1, 1]} : vector<8x128xf32> to vector<8x1xf32>
    %99 = arith.extf %97 : vector<8x32xbf16> to vector<8x32xf32>
    %100 = vector.broadcast %98 : vector<8x1xf32> to vector<8x32xf32>
    %101 = arith.mulf %99, %100 : vector<8x32xf32>
    %102 = arith.addf %96, %101 : vector<8x32xf32>
    %103 = vector.extract_strided_slice %85 {offsets = [0, 96], sizes = [8, 32], strides = [1, 1]} : vector<8x128xbf16> to vector<8x32xbf16>
    %104 = vector.extract_strided_slice %7 {offsets = [0, 11], sizes = [8, 1], strides = [1, 1]} : vector<8x128xf32> to vector<8x1xf32>
    %105 = arith.extf %103 : vector<8x32xbf16> to vector<8x32xf32>
    %106 = vector.broadcast %104 : vector<8x1xf32> to vector<8x32xf32>
    %107 = arith.mulf %105, %106 : vector<8x32xf32>
    %108 = arith.addf %102, %107 : vector<8x32xf32>
    %109 = arith.subf %41, %74 : vector<8x32xf32>
    %110 = arith.addf %109, %108 : vector<8x32xf32>
    %111 = arith.addf %8, %110 : vector<8x32xf32>
    %112 = arith.truncf %111 : vector<8x32xf32> to vector<8x32xbf16>
    %c0_24 = arith.constant 0 : index
    %c0_25 = arith.constant 0 : index
    %113 = vector.load %arg6[%c0_24, %c0_25] : memref<32x128xbf16, #tpu.memory_space<vmem>>, vector<32x128xbf16>
    %cst_26 = arith.constant dense<0.000000e+00> : vector<8x128xf32>
    %114 = tpu.matmul %112, %113, %cst_26 {dimension_numbers = #tpu.dot_dimension_numbers<[1], [0], [0], [1], [0, 0, 1, 1], [], []>} : vector<8x32xbf16>, vector<32x128xbf16>, vector<8x128xf32> -> vector<8x128xf32>
    %115 = vector.broadcast %5 : vector<1x128xf32> to vector<8x128xf32>
    %116 = arith.addf %114, %115 : vector<8x128xf32>
    %117 = arith.truncf %116 : vector<8x128xf32> to vector<8x128xbf16>
    %118 = math.tanh %117 : vector<8x128xbf16>
    %119 = vector.extract_strided_slice %118 {offsets = [0, 0], sizes = [8, 32], strides = [1, 1]} : vector<8x128xbf16> to vector<8x32xbf16>
    %120 = vector.extract_strided_slice %7 {offsets = [0, 12], sizes = [8, 1], strides = [1, 1]} : vector<8x128xf32> to vector<8x1xf32>
    %121 = arith.extf %119 : vector<8x32xbf16> to vector<8x32xf32>
    %122 = vector.broadcast %120 : vector<8x1xf32> to vector<8x32xf32>
    %123 = arith.mulf %121, %122 : vector<8x32xf32>
    %124 = vector.extract_strided_slice %118 {offsets = [0, 32], sizes = [8, 32], strides = [1, 1]} : vector<8x128xbf16> to vector<8x32xbf16>
    %125 = vector.extract_strided_slice %7 {offsets = [0, 13], sizes = [8, 1], strides = [1, 1]} : vector<8x128xf32> to vector<8x1xf32>
    %126 = arith.extf %124 : vector<8x32xbf16> to vector<8x32xf32>
    %127 = vector.broadcast %125 : vector<8x1xf32> to vector<8x32xf32>
    %128 = arith.mulf %126, %127 : vector<8x32xf32>
    %129 = arith.addf %123, %128 : vector<8x32xf32>
    %130 = vector.extract_strided_slice %118 {offsets = [0, 64], sizes = [8, 32], strides = [1, 1]} : vector<8x128xbf16> to vector<8x32xbf16>
    %131 = vector.extract_strided_slice %7 {offsets = [0, 14], sizes = [8, 1], strides = [1, 1]} : vector<8x128xf32> to vector<8x1xf32>
    %132 = arith.extf %130 : vector<8x32xbf16> to vector<8x32xf32>
    %133 = vector.broadcast %131 : vector<8x1xf32> to vector<8x32xf32>
    %134 = arith.mulf %132, %133 : vector<8x32xf32>
    %135 = arith.addf %129, %134 : vector<8x32xf32>
    %136 = vector.extract_strided_slice %118 {offsets = [0, 96], sizes = [8, 32], strides = [1, 1]} : vector<8x128xbf16> to vector<8x32xbf16>
    %137 = vector.extract_strided_slice %7 {offsets = [0, 15], sizes = [8, 1], strides = [1, 1]} : vector<8x128xf32> to vector<8x1xf32>
    %138 = arith.extf %136 : vector<8x32xbf16> to vector<8x32xf32>
    %139 = vector.broadcast %137 : vector<8x1xf32> to vector<8x32xf32>
    %140 = arith.mulf %138, %139 : vector<8x32xf32>
    %141 = arith.addf %135, %140 : vector<8x32xf32>
    %142 = arith.addf %74, %108 : vector<8x32xf32>
    %cst_27 = arith.constant 3.000000e+00 : f32
    %143 = vector.broadcast %cst_27 : f32 to vector<8x32xf32>
    %144 = arith.mulf %143, %142 : vector<8x32xf32>
    %145 = arith.addf %41, %144 : vector<8x32xf32>
    %146 = arith.addf %145, %141 : vector<8x32xf32>
    %cst_28 = arith.constant 1.250000e-01 : f32
    %147 = vector.broadcast %cst_28 : f32 to vector<8x32xf32>
    %148 = arith.mulf %146, %147 : vector<8x32xf32>
    %149 = arith.addf %8, %148 : vector<8x32xf32>
    %150 = vector.broadcast %11 : i32 to vector<8x1xi32>
    %151 = arith.cmpi eq, %3, %150 : vector<8x1xi32>
    %152 = arith.subf %149, %8 : vector<8x32xf32>
    %153 = vector.broadcast %4 : vector<8x1xf32> to vector<8x32xf32>
    %154 = arith.mulf %153, %152 : vector<8x32xf32>
    %155 = arith.addf %8, %154 : vector<8x32xf32>
    %156 = vector.shape_cast %151 : vector<8x1xi1> to vector<8x1xi1>
    %157 = vector.broadcast %156 : vector<8x1xi1> to vector<8x32xi1>
    %158 = arith.select %157, %155, %9 : vector<8x32xi1>, vector<8x32xf32>
    %c8_i32_29 = arith.constant 8 : i32
    %159 = arith.muli %arg1, %c8_i32_29 : i32
    %c1_i32 = arith.constant 1 : i32
    %160 = arith.addi %159, %c1_i32 : i32
    %161 = arith.truncf %149 : vector<8x32xf32> to vector<8x32xbf16>
    %c0_30 = arith.constant 0 : index
    %c0_31 = arith.constant 0 : index
    %162 = vector.load %arg6[%c0_30, %c0_31] : memref<32x128xbf16, #tpu.memory_space<vmem>>, vector<32x128xbf16>
    %cst_32 = arith.constant dense<0.000000e+00> : vector<8x128xf32>
    %163 = tpu.matmul %161, %162, %cst_32 {dimension_numbers = #tpu.dot_dimension_numbers<[1], [0], [0], [1], [0, 0, 1, 1], [], []>} : vector<8x32xbf16>, vector<32x128xbf16>, vector<8x128xf32> -> vector<8x128xf32>
    %164 = vector.broadcast %5 : vector<1x128xf32> to vector<8x128xf32>
    %165 = arith.addf %163, %164 : vector<8x128xf32>
    %166 = arith.truncf %165 : vector<8x128xf32> to vector<8x128xbf16>
    %167 = math.tanh %166 : vector<8x128xbf16>
    %168 = vector.extract_strided_slice %167 {offsets = [0, 0], sizes = [8, 32], strides = [1, 1]} : vector<8x128xbf16> to vector<8x32xbf16>
    %169 = vector.extract_strided_slice %7 {offsets = [0, 16], sizes = [8, 1], strides = [1, 1]} : vector<8x128xf32> to vector<8x1xf32>
    %170 = arith.extf %168 : vector<8x32xbf16> to vector<8x32xf32>
    %171 = vector.broadcast %169 : vector<8x1xf32> to vector<8x32xf32>
    %172 = arith.mulf %170, %171 : vector<8x32xf32>
    %173 = vector.extract_strided_slice %167 {offsets = [0, 32], sizes = [8, 32], strides = [1, 1]} : vector<8x128xbf16> to vector<8x32xbf16>
    %174 = vector.extract_strided_slice %7 {offsets = [0, 17], sizes = [8, 1], strides = [1, 1]} : vector<8x128xf32> to vector<8x1xf32>
    %175 = arith.extf %173 : vector<8x32xbf16> to vector<8x32xf32>
    %176 = vector.broadcast %174 : vector<8x1xf32> to vector<8x32xf32>
    %177 = arith.mulf %175, %176 : vector<8x32xf32>
    %178 = arith.addf %172, %177 : vector<8x32xf32>
    %179 = vector.extract_strided_slice %167 {offsets = [0, 64], sizes = [8, 32], strides = [1, 1]} : vector<8x128xbf16> to vector<8x32xbf16>
    %180 = vector.extract_strided_slice %7 {offsets = [0, 18], sizes = [8, 1], strides = [1, 1]} : vector<8x128xf32> to vector<8x1xf32>
    %181 = arith.extf %179 : vector<8x32xbf16> to vector<8x32xf32>
    %182 = vector.broadcast %180 : vector<8x1xf32> to vector<8x32xf32>
    %183 = arith.mulf %181, %182 : vector<8x32xf32>
    %184 = arith.addf %178, %183 : vector<8x32xf32>
    %185 = vector.extract_strided_slice %167 {offsets = [0, 96], sizes = [8, 32], strides = [1, 1]} : vector<8x128xbf16> to vector<8x32xbf16>
    %186 = vector.extract_strided_slice %7 {offsets = [0, 19], sizes = [8, 1], strides = [1, 1]} : vector<8x128xf32> to vector<8x1xf32>
    %187 = arith.extf %185 : vector<8x32xbf16> to vector<8x32xf32>
    %188 = vector.broadcast %186 : vector<8x1xf32> to vector<8x32xf32>
    %189 = arith.mulf %187, %188 : vector<8x32xf32>
    %190 = arith.addf %184, %189 : vector<8x32xf32>
    %cst_33 = arith.constant 0.333333343 : f32
    %191 = vector.broadcast %cst_33 : f32 to vector<8x32xf32>
    %192 = arith.mulf %190, %191 : vector<8x32xf32>
    %193 = arith.addf %149, %192 : vector<8x32xf32>
    %194 = arith.truncf %193 : vector<8x32xf32> to vector<8x32xbf16>
    %c0_34 = arith.constant 0 : index
    %c0_35 = arith.constant 0 : index
    %195 = vector.load %arg6[%c0_34, %c0_35] : memref<32x128xbf16, #tpu.memory_space<vmem>>, vector<32x128xbf16>
    %cst_36 = arith.constant dense<0.000000e+00> : vector<8x128xf32>
    %196 = tpu.matmul %194, %195, %cst_36 {dimension_numbers = #tpu.dot_dimension_numbers<[1], [0], [0], [1], [0, 0, 1, 1], [], []>} : vector<8x32xbf16>, vector<32x128xbf16>, vector<8x128xf32> -> vector<8x128xf32>
    %197 = vector.broadcast %5 : vector<1x128xf32> to vector<8x128xf32>
    %198 = arith.addf %196, %197 : vector<8x128xf32>
    %199 = arith.truncf %198 : vector<8x128xf32> to vector<8x128xbf16>
    %200 = math.tanh %199 : vector<8x128xbf16>
    %201 = vector.extract_strided_slice %200 {offsets = [0, 0], sizes = [8, 32], strides = [1, 1]} : vector<8x128xbf16> to vector<8x32xbf16>
    %202 = vector.extract_strided_slice %7 {offsets = [0, 20], sizes = [8, 1], strides = [1, 1]} : vector<8x128xf32> to vector<8x1xf32>
    %203 = arith.extf %201 : vector<8x32xbf16> to vector<8x32xf32>
    %204 = vector.broadcast %202 : vector<8x1xf32> to vector<8x32xf32>
    %205 = arith.mulf %203, %204 : vector<8x32xf32>
    %206 = vector.extract_strided_slice %200 {offsets = [0, 32], sizes = [8, 32], strides = [1, 1]} : vector<8x128xbf16> to vector<8x32xbf16>
    %207 = vector.extract_strided_slice %7 {offsets = [0, 21], sizes = [8, 1], strides = [1, 1]} : vector<8x128xf32> to vector<8x1xf32>
    %208 = arith.extf %206 : vector<8x32xbf16> to vector<8x32xf32>
    %209 = vector.broadcast %207 : vector<8x1xf32> to vector<8x32xf32>
    %210 = arith.mulf %208, %209 : vector<8x32xf32>
    %211 = arith.addf %205, %210 : vector<8x32xf32>
    %212 = vector.extract_strided_slice %200 {offsets = [0, 64], sizes = [8, 32], strides = [1, 1]} : vector<8x128xbf16> to vector<8x32xbf16>
    %213 = vector.extract_strided_slice %7 {offsets = [0, 22], sizes = [8, 1], strides = [1, 1]} : vector<8x128xf32> to vector<8x1xf32>
    %214 = arith.extf %212 : vector<8x32xbf16> to vector<8x32xf32>
    %215 = vector.broadcast %213 : vector<8x1xf32> to vector<8x32xf32>
    %216 = arith.mulf %214, %215 : vector<8x32xf32>
    %217 = arith.addf %211, %216 : vector<8x32xf32>
    %218 = vector.extract_strided_slice %200 {offsets = [0, 96], sizes = [8, 32], strides = [1, 1]} : vector<8x128xbf16> to vector<8x32xbf16>
    %219 = vector.extract_strided_slice %7 {offsets = [0, 23], sizes = [8, 1], strides = [1, 1]} : vector<8x128xf32> to vector<8x1xf32>
    %220 = arith.extf %218 : vector<8x32xbf16> to vector<8x32xf32>
    %221 = vector.broadcast %219 : vector<8x1xf32> to vector<8x32xf32>
    %222 = arith.mulf %220, %221 : vector<8x32xf32>
    %223 = arith.addf %217, %222 : vector<8x32xf32>
    %cst_37 = arith.constant 0.333333343 : f32
    %224 = vector.broadcast %cst_37 : f32 to vector<8x32xf32>
    %225 = arith.mulf %190, %224 : vector<8x32xf32>
    %226 = arith.subf %223, %225 : vector<8x32xf32>
    %227 = arith.addf %149, %226 : vector<8x32xf32>
    %228 = arith.truncf %227 : vector<8x32xf32> to vector<8x32xbf16>
    %c0_38 = arith.constant 0 : index
    %c0_39 = arith.constant 0 : index
    %229 = vector.load %arg6[%c0_38, %c0_39] : memref<32x128xbf16, #tpu.memory_space<vmem>>, vector<32x128xbf16>
    %cst_40 = arith.constant dense<0.000000e+00> : vector<8x128xf32>
    %230 = tpu.matmul %228, %229, %cst_40 {dimension_numbers = #tpu.dot_dimension_numbers<[1], [0], [0], [1], [0, 0, 1, 1], [], []>} : vector<8x32xbf16>, vector<32x128xbf16>, vector<8x128xf32> -> vector<8x128xf32>
    %231 = vector.broadcast %5 : vector<1x128xf32> to vector<8x128xf32>
    %232 = arith.addf %230, %231 : vector<8x128xf32>
    %233 = arith.truncf %232 : vector<8x128xf32> to vector<8x128xbf16>
    %234 = math.tanh %233 : vector<8x128xbf16>
    %235 = vector.extract_strided_slice %234 {offsets = [0, 0], sizes = [8, 32], strides = [1, 1]} : vector<8x128xbf16> to vector<8x32xbf16>
    %236 = vector.extract_strided_slice %7 {offsets = [0, 24], sizes = [8, 1], strides = [1, 1]} : vector<8x128xf32> to vector<8x1xf32>
    %237 = arith.extf %235 : vector<8x32xbf16> to vector<8x32xf32>
    %238 = vector.broadcast %236 : vector<8x1xf32> to vector<8x32xf32>
    %239 = arith.mulf %237, %238 : vector<8x32xf32>
    %240 = vector.extract_strided_slice %234 {offsets = [0, 32], sizes = [8, 32], strides = [1, 1]} : vector<8x128xbf16> to vector<8x32xbf16>
    %241 = vector.extract_strided_slice %7 {offsets = [0, 25], sizes = [8, 1], strides = [1, 1]} : vector<8x128xf32> to vector<8x1xf32>
    %242 = arith.extf %240 : vector<8x32xbf16> to vector<8x32xf32>
    %243 = vector.broadcast %241 : vector<8x1xf32> to vector<8x32xf32>
    %244 = arith.mulf %242, %243 : vector<8x32xf32>
    %245 = arith.addf %239, %244 : vector<8x32xf32>
    %246 = vector.extract_strided_slice %234 {offsets = [0, 64], sizes = [8, 32], strides = [1, 1]} : vector<8x128xbf16> to vector<8x32xbf16>
    %247 = vector.extract_strided_slice %7 {offsets = [0, 26], sizes = [8, 1], strides = [1, 1]} : vector<8x128xf32> to vector<8x1xf32>
    %248 = arith.extf %246 : vector<8x32xbf16> to vector<8x32xf32>
    %249 = vector.broadcast %247 : vector<8x1xf32> to vector<8x32xf32>
    %250 = arith.mulf %248, %249 : vector<8x32xf32>
    %251 = arith.addf %245, %250 : vector<8x32xf32>
    %252 = vector.extract_strided_slice %234 {offsets = [0, 96], sizes = [8, 32], strides = [1, 1]} : vector<8x128xbf16> to vector<8x32xbf16>
    %253 = vector.extract_strided_slice %7 {offsets = [0, 27], sizes = [8, 1], strides = [1, 1]} : vector<8x128xf32> to vector<8x1xf32>
    %254 = arith.extf %252 : vector<8x32xbf16> to vector<8x32xf32>
    %255 = vector.broadcast %253 : vector<8x1xf32> to vector<8x32xf32>
    %256 = arith.mulf %254, %255 : vector<8x32xf32>
    %257 = arith.addf %251, %256 : vector<8x32xf32>
    %258 = arith.subf %190, %223 : vector<8x32xf32>
    %259 = arith.addf %258, %257 : vector<8x32xf32>
    %260 = arith.addf %149, %259 : vector<8x32xf32>
    %261 = arith.truncf %260 : vector<8x32xf32> to vector<8x32xbf16>
    %c0_41 = arith.constant 0 : index
    %c0_42 = arith.constant 0 : index
    %262 = vector.load %arg6[%c0_41, %c0_42] : memref<32x128xbf16, #tpu.memory_space<vmem>>, vector<32x128xbf16>
    %cst_43 = arith.constant dense<0.000000e+00> : vector<8x128xf32>
    %263 = tpu.matmul %261, %262, %cst_43 {dimension_numbers = #tpu.dot_dimension_numbers<[1], [0], [0], [1], [0, 0, 1, 1], [], []>} : vector<8x32xbf16>, vector<32x128xbf16>, vector<8x128xf32> -> vector<8x128xf32>
    %264 = vector.broadcast %5 : vector<1x128xf32> to vector<8x128xf32>
    %265 = arith.addf %263, %264 : vector<8x128xf32>
    %266 = arith.truncf %265 : vector<8x128xf32> to vector<8x128xbf16>
    %267 = math.tanh %266 : vector<8x128xbf16>
    %268 = vector.extract_strided_slice %267 {offsets = [0, 0], sizes = [8, 32], strides = [1, 1]} : vector<8x128xbf16> to vector<8x32xbf16>
    %269 = vector.extract_strided_slice %7 {offsets = [0, 28], sizes = [8, 1], strides = [1, 1]} : vector<8x128xf32> to vector<8x1xf32>
    %270 = arith.extf %268 : vector<8x32xbf16> to vector<8x32xf32>
    %271 = vector.broadcast %269 : vector<8x1xf32> to vector<8x32xf32>
    %272 = arith.mulf %270, %271 : vector<8x32xf32>
    %273 = vector.extract_strided_slice %267 {offsets = [0, 32], sizes = [8, 32], strides = [1, 1]} : vector<8x128xbf16> to vector<8x32xbf16>
    %274 = vector.extract_strided_slice %7 {offsets = [0, 29], sizes = [8, 1], strides = [1, 1]} : vector<8x128xf32> to vector<8x1xf32>
    %275 = arith.extf %273 : vector<8x32xbf16> to vector<8x32xf32>
    %276 = vector.broadcast %274 : vector<8x1xf32> to vector<8x32xf32>
    %277 = arith.mulf %275, %276 : vector<8x32xf32>
    %278 = arith.addf %272, %277 : vector<8x32xf32>
    %279 = vector.extract_strided_slice %267 {offsets = [0, 64], sizes = [8, 32], strides = [1, 1]} : vector<8x128xbf16> to vector<8x32xbf16>
    %280 = vector.extract_strided_slice %7 {offsets = [0, 30], sizes = [8, 1], strides = [1, 1]} : vector<8x128xf32> to vector<8x1xf32>
    %281 = arith.extf %279 : vector<8x32xbf16> to vector<8x32xf32>
    %282 = vector.broadcast %280 : vector<8x1xf32> to vector<8x32xf32>
    %283 = arith.mulf %281, %282 : vector<8x32xf32>
    %284 = arith.addf %278, %283 : vector<8x32xf32>
    %285 = vector.extract_strided_slice %267 {offsets = [0, 96], sizes = [8, 32], strides = [1, 1]} : vector<8x128xbf16> to vector<8x32xbf16>
    %286 = vector.extract_strided_slice %7 {offsets = [0, 31], sizes = [8, 1], strides = [1, 1]} : vector<8x128xf32> to vector<8x1xf32>
    %287 = arith.extf %285 : vector<8x32xbf16> to vector<8x32xf32>
    %288 = vector.broadcast %286 : vector<8x1xf32> to vector<8x32xf32>
    %289 = arith.mulf %287, %288 : vector<8x32xf32>
    %290 = arith.addf %284, %289 : vector<8x32xf32>
    %291 = arith.addf %223, %257 : vector<8x32xf32>
    %cst_44 = arith.constant 3.000000e+00 : f32
    %292 = vector.broadcast %cst_44 : f32 to vector<8x32xf32>
    %293 = arith.mulf %292, %291 : vector<8x32xf32>
    %294 = arith.addf %190, %293 : vector<8x32xf32>
    %295 = arith.addf %294, %290 : vector<8x32xf32>
    %cst_45 = arith.constant 1.250000e-01 : f32
    %296 = vector.broadcast %cst_45 : f32 to vector<8x32xf32>
    %297 = arith.mulf %295, %296 : vector<8x32xf32>
    %298 = arith.addf %149, %297 : vector<8x32xf32>
    %299 = vector.broadcast %160 : i32 to vector<8x1xi32>
    %300 = arith.cmpi eq, %3, %299 : vector<8x1xi32>
    %301 = arith.subf %298, %149 : vector<8x32xf32>
    %302 = vector.broadcast %4 : vector<8x1xf32> to vector<8x32xf32>
    %303 = arith.mulf %302, %301 : vector<8x32xf32>
    %304 = arith.addf %149, %303 : vector<8x32xf32>
    %305 = vector.shape_cast %300 : vector<8x1xi1> to vector<8x1xi1>
    %306 = vector.broadcast %305 : vector<8x1xi1> to vector<8x32xi1>
    %307 = arith.select %306, %304, %158 : vector<8x32xi1>, vector<8x32xf32>
    %c8_i32_46 = arith.constant 8 : i32
    %308 = arith.muli %arg1, %c8_i32_46 : i32
    %c2_i32 = arith.constant 2 : i32
    %309 = arith.addi %308, %c2_i32 : i32
    %310 = arith.truncf %298 : vector<8x32xf32> to vector<8x32xbf16>
    %c0_47 = arith.constant 0 : index
    %c0_48 = arith.constant 0 : index
    %311 = vector.load %arg6[%c0_47, %c0_48] : memref<32x128xbf16, #tpu.memory_space<vmem>>, vector<32x128xbf16>
    %cst_49 = arith.constant dense<0.000000e+00> : vector<8x128xf32>
    %312 = tpu.matmul %310, %311, %cst_49 {dimension_numbers = #tpu.dot_dimension_numbers<[1], [0], [0], [1], [0, 0, 1, 1], [], []>} : vector<8x32xbf16>, vector<32x128xbf16>, vector<8x128xf32> -> vector<8x128xf32>
    %313 = vector.broadcast %5 : vector<1x128xf32> to vector<8x128xf32>
    %314 = arith.addf %312, %313 : vector<8x128xf32>
    %315 = arith.truncf %314 : vector<8x128xf32> to vector<8x128xbf16>
    %316 = math.tanh %315 : vector<8x128xbf16>
    %317 = vector.extract_strided_slice %316 {offsets = [0, 0], sizes = [8, 32], strides = [1, 1]} : vector<8x128xbf16> to vector<8x32xbf16>
    %318 = vector.extract_strided_slice %7 {offsets = [0, 32], sizes = [8, 1], strides = [1, 1]} : vector<8x128xf32> to vector<8x1xf32>
    %319 = arith.extf %317 : vector<8x32xbf16> to vector<8x32xf32>
    %320 = vector.broadcast %318 : vector<8x1xf32> to vector<8x32xf32>
    %321 = arith.mulf %319, %320 : vector<8x32xf32>
    %322 = vector.extract_strided_slice %316 {offsets = [0, 32], sizes = [8, 32], strides = [1, 1]} : vector<8x128xbf16> to vector<8x32xbf16>
    %323 = vector.extract_strided_slice %7 {offsets = [0, 33], sizes = [8, 1], strides = [1, 1]} : vector<8x128xf32> to vector<8x1xf32>
    %324 = arith.extf %322 : vector<8x32xbf16> to vector<8x32xf32>
    %325 = vector.broadcast %323 : vector<8x1xf32> to vector<8x32xf32>
    %326 = arith.mulf %324, %325 : vector<8x32xf32>
    %327 = arith.addf %321, %326 : vector<8x32xf32>
    %328 = vector.extract_strided_slice %316 {offsets = [0, 64], sizes = [8, 32], strides = [1, 1]} : vector<8x128xbf16> to vector<8x32xbf16>
    %329 = vector.extract_strided_slice %7 {offsets = [0, 34], sizes = [8, 1], strides = [1, 1]} : vector<8x128xf32> to vector<8x1xf32>
    %330 = arith.extf %328 : vector<8x32xbf16> to vector<8x32xf32>
    %331 = vector.broadcast %329 : vector<8x1xf32> to vector<8x32xf32>
    %332 = arith.mulf %330, %331 : vector<8x32xf32>
    %333 = arith.addf %327, %332 : vector<8x32xf32>
    %334 = vector.extract_strided_slice %316 {offsets = [0, 96], sizes = [8, 32], strides = [1, 1]} : vector<8x128xbf16> to vector<8x32xbf16>
    %335 = vector.extract_strided_slice %7 {offsets = [0, 35], sizes = [8, 1], strides = [1, 1]} : vector<8x128xf32> to vector<8x1xf32>
    %336 = arith.extf %334 : vector<8x32xbf16> to vector<8x32xf32>
    %337 = vector.broadcast %335 : vector<8x1xf32> to vector<8x32xf32>
    %338 = arith.mulf %336, %337 : vector<8x32xf32>
    %339 = arith.addf %333, %338 : vector<8x32xf32>
    %cst_50 = arith.constant 0.333333343 : f32
    %340 = vector.broadcast %cst_50 : f32 to vector<8x32xf32>
    %341 = arith.mulf %339, %340 : vector<8x32xf32>
    %342 = arith.addf %298, %341 : vector<8x32xf32>
    %343 = arith.truncf %342 : vector<8x32xf32> to vector<8x32xbf16>
    %c0_51 = arith.constant 0 : index
    %c0_52 = arith.constant 0 : index
    %344 = vector.load %arg6[%c0_51, %c0_52] : memref<32x128xbf16, #tpu.memory_space<vmem>>, vector<32x128xbf16>
    %cst_53 = arith.constant dense<0.000000e+00> : vector<8x128xf32>
    %345 = tpu.matmul %343, %344, %cst_53 {dimension_numbers = #tpu.dot_dimension_numbers<[1], [0], [0], [1], [0, 0, 1, 1], [], []>} : vector<8x32xbf16>, vector<32x128xbf16>, vector<8x128xf32> -> vector<8x128xf32>
    %346 = vector.broadcast %5 : vector<1x128xf32> to vector<8x128xf32>
    %347 = arith.addf %345, %346 : vector<8x128xf32>
    %348 = arith.truncf %347 : vector<8x128xf32> to vector<8x128xbf16>
    %349 = math.tanh %348 : vector<8x128xbf16>
    %350 = vector.extract_strided_slice %349 {offsets = [0, 0], sizes = [8, 32], strides = [1, 1]} : vector<8x128xbf16> to vector<8x32xbf16>
    %351 = vector.extract_strided_slice %7 {offsets = [0, 36], sizes = [8, 1], strides = [1, 1]} : vector<8x128xf32> to vector<8x1xf32>
    %352 = arith.extf %350 : vector<8x32xbf16> to vector<8x32xf32>
    %353 = vector.broadcast %351 : vector<8x1xf32> to vector<8x32xf32>
    %354 = arith.mulf %352, %353 : vector<8x32xf32>
    %355 = vector.extract_strided_slice %349 {offsets = [0, 32], sizes = [8, 32], strides = [1, 1]} : vector<8x128xbf16> to vector<8x32xbf16>
    %356 = vector.extract_strided_slice %7 {offsets = [0, 37], sizes = [8, 1], strides = [1, 1]} : vector<8x128xf32> to vector<8x1xf32>
    %357 = arith.extf %355 : vector<8x32xbf16> to vector<8x32xf32>
    %358 = vector.broadcast %356 : vector<8x1xf32> to vector<8x32xf32>
    %359 = arith.mulf %357, %358 : vector<8x32xf32>
    %360 = arith.addf %354, %359 : vector<8x32xf32>
    %361 = vector.extract_strided_slice %349 {offsets = [0, 64], sizes = [8, 32], strides = [1, 1]} : vector<8x128xbf16> to vector<8x32xbf16>
    %362 = vector.extract_strided_slice %7 {offsets = [0, 38], sizes = [8, 1], strides = [1, 1]} : vector<8x128xf32> to vector<8x1xf32>
    %363 = arith.extf %361 : vector<8x32xbf16> to vector<8x32xf32>
    %364 = vector.broadcast %362 : vector<8x1xf32> to vector<8x32xf32>
    %365 = arith.mulf %363, %364 : vector<8x32xf32>
    %366 = arith.addf %360, %365 : vector<8x32xf32>
    %367 = vector.extract_strided_slice %349 {offsets = [0, 96], sizes = [8, 32], strides = [1, 1]} : vector<8x128xbf16> to vector<8x32xbf16>
    %368 = vector.extract_strided_slice %7 {offsets = [0, 39], sizes = [8, 1], strides = [1, 1]} : vector<8x128xf32> to vector<8x1xf32>
    %369 = arith.extf %367 : vector<8x32xbf16> to vector<8x32xf32>
    %370 = vector.broadcast %368 : vector<8x1xf32> to vector<8x32xf32>
    %371 = arith.mulf %369, %370 : vector<8x32xf32>
    %372 = arith.addf %366, %371 : vector<8x32xf32>
    %cst_54 = arith.constant 0.333333343 : f32
    %373 = vector.broadcast %cst_54 : f32 to vector<8x32xf32>
    %374 = arith.mulf %339, %373 : vector<8x32xf32>
    %375 = arith.subf %372, %374 : vector<8x32xf32>
    %376 = arith.addf %298, %375 : vector<8x32xf32>
    %377 = arith.truncf %376 : vector<8x32xf32> to vector<8x32xbf16>
    %c0_55 = arith.constant 0 : index
    %c0_56 = arith.constant 0 : index
    %378 = vector.load %arg6[%c0_55, %c0_56] : memref<32x128xbf16, #tpu.memory_space<vmem>>, vector<32x128xbf16>
    %cst_57 = arith.constant dense<0.000000e+00> : vector<8x128xf32>
    %379 = tpu.matmul %377, %378, %cst_57 {dimension_numbers = #tpu.dot_dimension_numbers<[1], [0], [0], [1], [0, 0, 1, 1], [], []>} : vector<8x32xbf16>, vector<32x128xbf16>, vector<8x128xf32> -> vector<8x128xf32>
    %380 = vector.broadcast %5 : vector<1x128xf32> to vector<8x128xf32>
    %381 = arith.addf %379, %380 : vector<8x128xf32>
    %382 = arith.truncf %381 : vector<8x128xf32> to vector<8x128xbf16>
    %383 = math.tanh %382 : vector<8x128xbf16>
    %384 = vector.extract_strided_slice %383 {offsets = [0, 0], sizes = [8, 32], strides = [1, 1]} : vector<8x128xbf16> to vector<8x32xbf16>
    %385 = vector.extract_strided_slice %7 {offsets = [0, 40], sizes = [8, 1], strides = [1, 1]} : vector<8x128xf32> to vector<8x1xf32>
    %386 = arith.extf %384 : vector<8x32xbf16> to vector<8x32xf32>
    %387 = vector.broadcast %385 : vector<8x1xf32> to vector<8x32xf32>
    %388 = arith.mulf %386, %387 : vector<8x32xf32>
    %389 = vector.extract_strided_slice %383 {offsets = [0, 32], sizes = [8, 32], strides = [1, 1]} : vector<8x128xbf16> to vector<8x32xbf16>
    %390 = vector.extract_strided_slice %7 {offsets = [0, 41], sizes = [8, 1], strides = [1, 1]} : vector<8x128xf32> to vector<8x1xf32>
    %391 = arith.extf %389 : vector<8x32xbf16> to vector<8x32xf32>
    %392 = vector.broadcast %390 : vector<8x1xf32> to vector<8x32xf32>
    %393 = arith.mulf %391, %392 : vector<8x32xf32>
    %394 = arith.addf %388, %393 : vector<8x32xf32>
    %395 = vector.extract_strided_slice %383 {offsets = [0, 64], sizes = [8, 32], strides = [1, 1]} : vector<8x128xbf16> to vector<8x32xbf16>
    %396 = vector.extract_strided_slice %7 {offsets = [0, 42], sizes = [8, 1], strides = [1, 1]} : vector<8x128xf32> to vector<8x1xf32>
    %397 = arith.extf %395 : vector<8x32xbf16> to vector<8x32xf32>
    %398 = vector.broadcast %396 : vector<8x1xf32> to vector<8x32xf32>
    %399 = arith.mulf %397, %398 : vector<8x32xf32>
    %400 = arith.addf %394, %399 : vector<8x32xf32>
    %401 = vector.extract_strided_slice %383 {offsets = [0, 96], sizes = [8, 32], strides = [1, 1]} : vector<8x128xbf16> to vector<8x32xbf16>
    %402 = vector.extract_strided_slice %7 {offsets = [0, 43], sizes = [8, 1], strides = [1, 1]} : vector<8x128xf32> to vector<8x1xf32>
    %403 = arith.extf %401 : vector<8x32xbf16> to vector<8x32xf32>
    %404 = vector.broadcast %402 : vector<8x1xf32> to vector<8x32xf32>
    %405 = arith.mulf %403, %404 : vector<8x32xf32>
    %406 = arith.addf %400, %405 : vector<8x32xf32>
    %407 = arith.subf %339, %372 : vector<8x32xf32>
    %408 = arith.addf %407, %406 : vector<8x32xf32>
    %409 = arith.addf %298, %408 : vector<8x32xf32>
    %410 = arith.truncf %409 : vector<8x32xf32> to vector<8x32xbf16>
    %c0_58 = arith.constant 0 : index
    %c0_59 = arith.constant 0 : index
    %411 = vector.load %arg6[%c0_58, %c0_59] : memref<32x128xbf16, #tpu.memory_space<vmem>>, vector<32x128xbf16>
    %cst_60 = arith.constant dense<0.000000e+00> : vector<8x128xf32>
    %412 = tpu.matmul %410, %411, %cst_60 {dimension_numbers = #tpu.dot_dimension_numbers<[1], [0], [0], [1], [0, 0, 1, 1], [], []>} : vector<8x32xbf16>, vector<32x128xbf16>, vector<8x128xf32> -> vector<8x128xf32>
    %413 = vector.broadcast %5 : vector<1x128xf32> to vector<8x128xf32>
    %414 = arith.addf %412, %413 : vector<8x128xf32>
    %415 = arith.truncf %414 : vector<8x128xf32> to vector<8x128xbf16>
    %416 = math.tanh %415 : vector<8x128xbf16>
    %417 = vector.extract_strided_slice %416 {offsets = [0, 0], sizes = [8, 32], strides = [1, 1]} : vector<8x128xbf16> to vector<8x32xbf16>
    %418 = vector.extract_strided_slice %7 {offsets = [0, 44], sizes = [8, 1], strides = [1, 1]} : vector<8x128xf32> to vector<8x1xf32>
    %419 = arith.extf %417 : vector<8x32xbf16> to vector<8x32xf32>
    %420 = vector.broadcast %418 : vector<8x1xf32> to vector<8x32xf32>
    %421 = arith.mulf %419, %420 : vector<8x32xf32>
    %422 = vector.extract_strided_slice %416 {offsets = [0, 32], sizes = [8, 32], strides = [1, 1]} : vector<8x128xbf16> to vector<8x32xbf16>
    %423 = vector.extract_strided_slice %7 {offsets = [0, 45], sizes = [8, 1], strides = [1, 1]} : vector<8x128xf32> to vector<8x1xf32>
    %424 = arith.extf %422 : vector<8x32xbf16> to vector<8x32xf32>
    %425 = vector.broadcast %423 : vector<8x1xf32> to vector<8x32xf32>
    %426 = arith.mulf %424, %425 : vector<8x32xf32>
    %427 = arith.addf %421, %426 : vector<8x32xf32>
    %428 = vector.extract_strided_slice %416 {offsets = [0, 64], sizes = [8, 32], strides = [1, 1]} : vector<8x128xbf16> to vector<8x32xbf16>
    %429 = vector.extract_strided_slice %7 {offsets = [0, 46], sizes = [8, 1], strides = [1, 1]} : vector<8x128xf32> to vector<8x1xf32>
    %430 = arith.extf %428 : vector<8x32xbf16> to vector<8x32xf32>
    %431 = vector.broadcast %429 : vector<8x1xf32> to vector<8x32xf32>
    %432 = arith.mulf %430, %431 : vector<8x32xf32>
    %433 = arith.addf %427, %432 : vector<8x32xf32>
    %434 = vector.extract_strided_slice %416 {offsets = [0, 96], sizes = [8, 32], strides = [1, 1]} : vector<8x128xbf16> to vector<8x32xbf16>
    %435 = vector.extract_strided_slice %7 {offsets = [0, 47], sizes = [8, 1], strides = [1, 1]} : vector<8x128xf32> to vector<8x1xf32>
    %436 = arith.extf %434 : vector<8x32xbf16> to vector<8x32xf32>
    %437 = vector.broadcast %435 : vector<8x1xf32> to vector<8x32xf32>
    %438 = arith.mulf %436, %437 : vector<8x32xf32>
    %439 = arith.addf %433, %438 : vector<8x32xf32>
    %440 = arith.addf %372, %406 : vector<8x32xf32>
    %cst_61 = arith.constant 3.000000e+00 : f32
    %441 = vector.broadcast %cst_61 : f32 to vector<8x32xf32>
    %442 = arith.mulf %441, %440 : vector<8x32xf32>
    %443 = arith.addf %339, %442 : vector<8x32xf32>
    %444 = arith.addf %443, %439 : vector<8x32xf32>
    %cst_62 = arith.constant 1.250000e-01 : f32
    %445 = vector.broadcast %cst_62 : f32 to vector<8x32xf32>
    %446 = arith.mulf %444, %445 : vector<8x32xf32>
    %447 = arith.addf %298, %446 : vector<8x32xf32>
    %448 = vector.broadcast %309 : i32 to vector<8x1xi32>
    %449 = arith.cmpi eq, %3, %448 : vector<8x1xi32>
    %450 = arith.subf %447, %298 : vector<8x32xf32>
    %451 = vector.broadcast %4 : vector<8x1xf32> to vector<8x32xf32>
    %452 = arith.mulf %451, %450 : vector<8x32xf32>
    %453 = arith.addf %298, %452 : vector<8x32xf32>
    %454 = vector.shape_cast %449 : vector<8x1xi1> to vector<8x1xi1>
    %455 = vector.broadcast %454 : vector<8x1xi1> to vector<8x32xi1>
    %456 = arith.select %455, %453, %307 : vector<8x32xi1>, vector<8x32xf32>
    %c8_i32_63 = arith.constant 8 : i32
    %457 = arith.muli %arg1, %c8_i32_63 : i32
    %c3_i32 = arith.constant 3 : i32
    %458 = arith.addi %457, %c3_i32 : i32
    %459 = arith.truncf %447 : vector<8x32xf32> to vector<8x32xbf16>
    %c0_64 = arith.constant 0 : index
    %c0_65 = arith.constant 0 : index
    %460 = vector.load %arg6[%c0_64, %c0_65] : memref<32x128xbf16, #tpu.memory_space<vmem>>, vector<32x128xbf16>
    %cst_66 = arith.constant dense<0.000000e+00> : vector<8x128xf32>
    %461 = tpu.matmul %459, %460, %cst_66 {dimension_numbers = #tpu.dot_dimension_numbers<[1], [0], [0], [1], [0, 0, 1, 1], [], []>} : vector<8x32xbf16>, vector<32x128xbf16>, vector<8x128xf32> -> vector<8x128xf32>
    %462 = vector.broadcast %5 : vector<1x128xf32> to vector<8x128xf32>
    %463 = arith.addf %461, %462 : vector<8x128xf32>
    %464 = arith.truncf %463 : vector<8x128xf32> to vector<8x128xbf16>
    %465 = math.tanh %464 : vector<8x128xbf16>
    %466 = vector.extract_strided_slice %465 {offsets = [0, 0], sizes = [8, 32], strides = [1, 1]} : vector<8x128xbf16> to vector<8x32xbf16>
    %467 = vector.extract_strided_slice %7 {offsets = [0, 48], sizes = [8, 1], strides = [1, 1]} : vector<8x128xf32> to vector<8x1xf32>
    %468 = arith.extf %466 : vector<8x32xbf16> to vector<8x32xf32>
    %469 = vector.broadcast %467 : vector<8x1xf32> to vector<8x32xf32>
    %470 = arith.mulf %468, %469 : vector<8x32xf32>
    %471 = vector.extract_strided_slice %465 {offsets = [0, 32], sizes = [8, 32], strides = [1, 1]} : vector<8x128xbf16> to vector<8x32xbf16>
    %472 = vector.extract_strided_slice %7 {offsets = [0, 49], sizes = [8, 1], strides = [1, 1]} : vector<8x128xf32> to vector<8x1xf32>
    %473 = arith.extf %471 : vector<8x32xbf16> to vector<8x32xf32>
    %474 = vector.broadcast %472 : vector<8x1xf32> to vector<8x32xf32>
    %475 = arith.mulf %473, %474 : vector<8x32xf32>
    %476 = arith.addf %470, %475 : vector<8x32xf32>
    %477 = vector.extract_strided_slice %465 {offsets = [0, 64], sizes = [8, 32], strides = [1, 1]} : vector<8x128xbf16> to vector<8x32xbf16>
    %478 = vector.extract_strided_slice %7 {offsets = [0, 50], sizes = [8, 1], strides = [1, 1]} : vector<8x128xf32> to vector<8x1xf32>
    %479 = arith.extf %477 : vector<8x32xbf16> to vector<8x32xf32>
    %480 = vector.broadcast %478 : vector<8x1xf32> to vector<8x32xf32>
    %481 = arith.mulf %479, %480 : vector<8x32xf32>
    %482 = arith.addf %476, %481 : vector<8x32xf32>
    %483 = vector.extract_strided_slice %465 {offsets = [0, 96], sizes = [8, 32], strides = [1, 1]} : vector<8x128xbf16> to vector<8x32xbf16>
    %484 = vector.extract_strided_slice %7 {offsets = [0, 51], sizes = [8, 1], strides = [1, 1]} : vector<8x128xf32> to vector<8x1xf32>
    %485 = arith.extf %483 : vector<8x32xbf16> to vector<8x32xf32>
    %486 = vector.broadcast %484 : vector<8x1xf32> to vector<8x32xf32>
    %487 = arith.mulf %485, %486 : vector<8x32xf32>
    %488 = arith.addf %482, %487 : vector<8x32xf32>
    %cst_67 = arith.constant 0.333333343 : f32
    %489 = vector.broadcast %cst_67 : f32 to vector<8x32xf32>
    %490 = arith.mulf %488, %489 : vector<8x32xf32>
    %491 = arith.addf %447, %490 : vector<8x32xf32>
    %492 = arith.truncf %491 : vector<8x32xf32> to vector<8x32xbf16>
    %c0_68 = arith.constant 0 : index
    %c0_69 = arith.constant 0 : index
    %493 = vector.load %arg6[%c0_68, %c0_69] : memref<32x128xbf16, #tpu.memory_space<vmem>>, vector<32x128xbf16>
    %cst_70 = arith.constant dense<0.000000e+00> : vector<8x128xf32>
    %494 = tpu.matmul %492, %493, %cst_70 {dimension_numbers = #tpu.dot_dimension_numbers<[1], [0], [0], [1], [0, 0, 1, 1], [], []>} : vector<8x32xbf16>, vector<32x128xbf16>, vector<8x128xf32> -> vector<8x128xf32>
    %495 = vector.broadcast %5 : vector<1x128xf32> to vector<8x128xf32>
    %496 = arith.addf %494, %495 : vector<8x128xf32>
    %497 = arith.truncf %496 : vector<8x128xf32> to vector<8x128xbf16>
    %498 = math.tanh %497 : vector<8x128xbf16>
    %499 = vector.extract_strided_slice %498 {offsets = [0, 0], sizes = [8, 32], strides = [1, 1]} : vector<8x128xbf16> to vector<8x32xbf16>
    %500 = vector.extract_strided_slice %7 {offsets = [0, 52], sizes = [8, 1], strides = [1, 1]} : vector<8x128xf32> to vector<8x1xf32>
    %501 = arith.extf %499 : vector<8x32xbf16> to vector<8x32xf32>
    %502 = vector.broadcast %500 : vector<8x1xf32> to vector<8x32xf32>
    %503 = arith.mulf %501, %502 : vector<8x32xf32>
    %504 = vector.extract_strided_slice %498 {offsets = [0, 32], sizes = [8, 32], strides = [1, 1]} : vector<8x128xbf16> to vector<8x32xbf16>
    %505 = vector.extract_strided_slice %7 {offsets = [0, 53], sizes = [8, 1], strides = [1, 1]} : vector<8x128xf32> to vector<8x1xf32>
    %506 = arith.extf %504 : vector<8x32xbf16> to vector<8x32xf32>
    %507 = vector.broadcast %505 : vector<8x1xf32> to vector<8x32xf32>
    %508 = arith.mulf %506, %507 : vector<8x32xf32>
    %509 = arith.addf %503, %508 : vector<8x32xf32>
    %510 = vector.extract_strided_slice %498 {offsets = [0, 64], sizes = [8, 32], strides = [1, 1]} : vector<8x128xbf16> to vector<8x32xbf16>
    %511 = vector.extract_strided_slice %7 {offsets = [0, 54], sizes = [8, 1], strides = [1, 1]} : vector<8x128xf32> to vector<8x1xf32>
    %512 = arith.extf %510 : vector<8x32xbf16> to vector<8x32xf32>
    %513 = vector.broadcast %511 : vector<8x1xf32> to vector<8x32xf32>
    %514 = arith.mulf %512, %513 : vector<8x32xf32>
    %515 = arith.addf %509, %514 : vector<8x32xf32>
    %516 = vector.extract_strided_slice %498 {offsets = [0, 96], sizes = [8, 32], strides = [1, 1]} : vector<8x128xbf16> to vector<8x32xbf16>
    %517 = vector.extract_strided_slice %7 {offsets = [0, 55], sizes = [8, 1], strides = [1, 1]} : vector<8x128xf32> to vector<8x1xf32>
    %518 = arith.extf %516 : vector<8x32xbf16> to vector<8x32xf32>
    %519 = vector.broadcast %517 : vector<8x1xf32> to vector<8x32xf32>
    %520 = arith.mulf %518, %519 : vector<8x32xf32>
    %521 = arith.addf %515, %520 : vector<8x32xf32>
    %cst_71 = arith.constant 0.333333343 : f32
    %522 = vector.broadcast %cst_71 : f32 to vector<8x32xf32>
    %523 = arith.mulf %488, %522 : vector<8x32xf32>
    %524 = arith.subf %521, %523 : vector<8x32xf32>
    %525 = arith.addf %447, %524 : vector<8x32xf32>
    %526 = arith.truncf %525 : vector<8x32xf32> to vector<8x32xbf16>
    %c0_72 = arith.constant 0 : index
    %c0_73 = arith.constant 0 : index
    %527 = vector.load %arg6[%c0_72, %c0_73] : memref<32x128xbf16, #tpu.memory_space<vmem>>, vector<32x128xbf16>
    %cst_74 = arith.constant dense<0.000000e+00> : vector<8x128xf32>
    %528 = tpu.matmul %526, %527, %cst_74 {dimension_numbers = #tpu.dot_dimension_numbers<[1], [0], [0], [1], [0, 0, 1, 1], [], []>} : vector<8x32xbf16>, vector<32x128xbf16>, vector<8x128xf32> -> vector<8x128xf32>
    %529 = vector.broadcast %5 : vector<1x128xf32> to vector<8x128xf32>
    %530 = arith.addf %528, %529 : vector<8x128xf32>
    %531 = arith.truncf %530 : vector<8x128xf32> to vector<8x128xbf16>
    %532 = math.tanh %531 : vector<8x128xbf16>
    %533 = vector.extract_strided_slice %532 {offsets = [0, 0], sizes = [8, 32], strides = [1, 1]} : vector<8x128xbf16> to vector<8x32xbf16>
    %534 = vector.extract_strided_slice %7 {offsets = [0, 56], sizes = [8, 1], strides = [1, 1]} : vector<8x128xf32> to vector<8x1xf32>
    %535 = arith.extf %533 : vector<8x32xbf16> to vector<8x32xf32>
    %536 = vector.broadcast %534 : vector<8x1xf32> to vector<8x32xf32>
    %537 = arith.mulf %535, %536 : vector<8x32xf32>
    %538 = vector.extract_strided_slice %532 {offsets = [0, 32], sizes = [8, 32], strides = [1, 1]} : vector<8x128xbf16> to vector<8x32xbf16>
    %539 = vector.extract_strided_slice %7 {offsets = [0, 57], sizes = [8, 1], strides = [1, 1]} : vector<8x128xf32> to vector<8x1xf32>
    %540 = arith.extf %538 : vector<8x32xbf16> to vector<8x32xf32>
    %541 = vector.broadcast %539 : vector<8x1xf32> to vector<8x32xf32>
    %542 = arith.mulf %540, %541 : vector<8x32xf32>
    %543 = arith.addf %537, %542 : vector<8x32xf32>
    %544 = vector.extract_strided_slice %532 {offsets = [0, 64], sizes = [8, 32], strides = [1, 1]} : vector<8x128xbf16> to vector<8x32xbf16>
    %545 = vector.extract_strided_slice %7 {offsets = [0, 58], sizes = [8, 1], strides = [1, 1]} : vector<8x128xf32> to vector<8x1xf32>
    %546 = arith.extf %544 : vector<8x32xbf16> to vector<8x32xf32>
    %547 = vector.broadcast %545 : vector<8x1xf32> to vector<8x32xf32>
    %548 = arith.mulf %546, %547 : vector<8x32xf32>
    %549 = arith.addf %543, %548 : vector<8x32xf32>
    %550 = vector.extract_strided_slice %532 {offsets = [0, 96], sizes = [8, 32], strides = [1, 1]} : vector<8x128xbf16> to vector<8x32xbf16>
    %551 = vector.extract_strided_slice %7 {offsets = [0, 59], sizes = [8, 1], strides = [1, 1]} : vector<8x128xf32> to vector<8x1xf32>
    %552 = arith.extf %550 : vector<8x32xbf16> to vector<8x32xf32>
    %553 = vector.broadcast %551 : vector<8x1xf32> to vector<8x32xf32>
    %554 = arith.mulf %552, %553 : vector<8x32xf32>
    %555 = arith.addf %549, %554 : vector<8x32xf32>
    %556 = arith.subf %488, %521 : vector<8x32xf32>
    %557 = arith.addf %556, %555 : vector<8x32xf32>
    %558 = arith.addf %447, %557 : vector<8x32xf32>
    %559 = arith.truncf %558 : vector<8x32xf32> to vector<8x32xbf16>
    %c0_75 = arith.constant 0 : index
    %c0_76 = arith.constant 0 : index
    %560 = vector.load %arg6[%c0_75, %c0_76] : memref<32x128xbf16, #tpu.memory_space<vmem>>, vector<32x128xbf16>
    %cst_77 = arith.constant dense<0.000000e+00> : vector<8x128xf32>
    %561 = tpu.matmul %559, %560, %cst_77 {dimension_numbers = #tpu.dot_dimension_numbers<[1], [0], [0], [1], [0, 0, 1, 1], [], []>} : vector<8x32xbf16>, vector<32x128xbf16>, vector<8x128xf32> -> vector<8x128xf32>
    %562 = vector.broadcast %5 : vector<1x128xf32> to vector<8x128xf32>
    %563 = arith.addf %561, %562 : vector<8x128xf32>
    %564 = arith.truncf %563 : vector<8x128xf32> to vector<8x128xbf16>
    %565 = math.tanh %564 : vector<8x128xbf16>
    %566 = vector.extract_strided_slice %565 {offsets = [0, 0], sizes = [8, 32], strides = [1, 1]} : vector<8x128xbf16> to vector<8x32xbf16>
    %567 = vector.extract_strided_slice %7 {offsets = [0, 60], sizes = [8, 1], strides = [1, 1]} : vector<8x128xf32> to vector<8x1xf32>
    %568 = arith.extf %566 : vector<8x32xbf16> to vector<8x32xf32>
    %569 = vector.broadcast %567 : vector<8x1xf32> to vector<8x32xf32>
    %570 = arith.mulf %568, %569 : vector<8x32xf32>
    %571 = vector.extract_strided_slice %565 {offsets = [0, 32], sizes = [8, 32], strides = [1, 1]} : vector<8x128xbf16> to vector<8x32xbf16>
    %572 = vector.extract_strided_slice %7 {offsets = [0, 61], sizes = [8, 1], strides = [1, 1]} : vector<8x128xf32> to vector<8x1xf32>
    %573 = arith.extf %571 : vector<8x32xbf16> to vector<8x32xf32>
    %574 = vector.broadcast %572 : vector<8x1xf32> to vector<8x32xf32>
    %575 = arith.mulf %573, %574 : vector<8x32xf32>
    %576 = arith.addf %570, %575 : vector<8x32xf32>
    %577 = vector.extract_strided_slice %565 {offsets = [0, 64], sizes = [8, 32], strides = [1, 1]} : vector<8x128xbf16> to vector<8x32xbf16>
    %578 = vector.extract_strided_slice %7 {offsets = [0, 62], sizes = [8, 1], strides = [1, 1]} : vector<8x128xf32> to vector<8x1xf32>
    %579 = arith.extf %577 : vector<8x32xbf16> to vector<8x32xf32>
    %580 = vector.broadcast %578 : vector<8x1xf32> to vector<8x32xf32>
    %581 = arith.mulf %579, %580 : vector<8x32xf32>
    %582 = arith.addf %576, %581 : vector<8x32xf32>
    %583 = vector.extract_strided_slice %565 {offsets = [0, 96], sizes = [8, 32], strides = [1, 1]} : vector<8x128xbf16> to vector<8x32xbf16>
    %584 = vector.extract_strided_slice %7 {offsets = [0, 63], sizes = [8, 1], strides = [1, 1]} : vector<8x128xf32> to vector<8x1xf32>
    %585 = arith.extf %583 : vector<8x32xbf16> to vector<8x32xf32>
    %586 = vector.broadcast %584 : vector<8x1xf32> to vector<8x32xf32>
    %587 = arith.mulf %585, %586 : vector<8x32xf32>
    %588 = arith.addf %582, %587 : vector<8x32xf32>
    %589 = arith.addf %521, %555 : vector<8x32xf32>
    %cst_78 = arith.constant 3.000000e+00 : f32
    %590 = vector.broadcast %cst_78 : f32 to vector<8x32xf32>
    %591 = arith.mulf %590, %589 : vector<8x32xf32>
    %592 = arith.addf %488, %591 : vector<8x32xf32>
    %593 = arith.addf %592, %588 : vector<8x32xf32>
    %cst_79 = arith.constant 1.250000e-01 : f32
    %594 = vector.broadcast %cst_79 : f32 to vector<8x32xf32>
    %595 = arith.mulf %593, %594 : vector<8x32xf32>
    %596 = arith.addf %447, %595 : vector<8x32xf32>
    %597 = vector.broadcast %458 : i32 to vector<8x1xi32>
    %598 = arith.cmpi eq, %3, %597 : vector<8x1xi32>
    %599 = arith.subf %596, %447 : vector<8x32xf32>
    %600 = vector.broadcast %4 : vector<8x1xf32> to vector<8x32xf32>
    %601 = arith.mulf %600, %599 : vector<8x32xf32>
    %602 = arith.addf %447, %601 : vector<8x32xf32>
    %603 = vector.shape_cast %598 : vector<8x1xi1> to vector<8x1xi1>
    %604 = vector.broadcast %603 : vector<8x1xi1> to vector<8x32xi1>
    %605 = arith.select %604, %602, %456 : vector<8x32xi1>, vector<8x32xf32>
    %c8_i32_80 = arith.constant 8 : i32
    %606 = arith.muli %arg1, %c8_i32_80 : i32
    %c4_i32 = arith.constant 4 : i32
    %607 = arith.addi %606, %c4_i32 : i32
    %608 = arith.truncf %596 : vector<8x32xf32> to vector<8x32xbf16>
    %c0_81 = arith.constant 0 : index
    %c0_82 = arith.constant 0 : index
    %609 = vector.load %arg6[%c0_81, %c0_82] : memref<32x128xbf16, #tpu.memory_space<vmem>>, vector<32x128xbf16>
    %cst_83 = arith.constant dense<0.000000e+00> : vector<8x128xf32>
    %610 = tpu.matmul %608, %609, %cst_83 {dimension_numbers = #tpu.dot_dimension_numbers<[1], [0], [0], [1], [0, 0, 1, 1], [], []>} : vector<8x32xbf16>, vector<32x128xbf16>, vector<8x128xf32> -> vector<8x128xf32>
    %611 = vector.broadcast %5 : vector<1x128xf32> to vector<8x128xf32>
    %612 = arith.addf %610, %611 : vector<8x128xf32>
    %613 = arith.truncf %612 : vector<8x128xf32> to vector<8x128xbf16>
    %614 = math.tanh %613 : vector<8x128xbf16>
    %615 = vector.extract_strided_slice %614 {offsets = [0, 0], sizes = [8, 32], strides = [1, 1]} : vector<8x128xbf16> to vector<8x32xbf16>
    %616 = vector.extract_strided_slice %7 {offsets = [0, 64], sizes = [8, 1], strides = [1, 1]} : vector<8x128xf32> to vector<8x1xf32>
    %617 = arith.extf %615 : vector<8x32xbf16> to vector<8x32xf32>
    %618 = vector.broadcast %616 : vector<8x1xf32> to vector<8x32xf32>
    %619 = arith.mulf %617, %618 : vector<8x32xf32>
    %620 = vector.extract_strided_slice %614 {offsets = [0, 32], sizes = [8, 32], strides = [1, 1]} : vector<8x128xbf16> to vector<8x32xbf16>
    %621 = vector.extract_strided_slice %7 {offsets = [0, 65], sizes = [8, 1], strides = [1, 1]} : vector<8x128xf32> to vector<8x1xf32>
    %622 = arith.extf %620 : vector<8x32xbf16> to vector<8x32xf32>
    %623 = vector.broadcast %621 : vector<8x1xf32> to vector<8x32xf32>
    %624 = arith.mulf %622, %623 : vector<8x32xf32>
    %625 = arith.addf %619, %624 : vector<8x32xf32>
    %626 = vector.extract_strided_slice %614 {offsets = [0, 64], sizes = [8, 32], strides = [1, 1]} : vector<8x128xbf16> to vector<8x32xbf16>
    %627 = vector.extract_strided_slice %7 {offsets = [0, 66], sizes = [8, 1], strides = [1, 1]} : vector<8x128xf32> to vector<8x1xf32>
    %628 = arith.extf %626 : vector<8x32xbf16> to vector<8x32xf32>
    %629 = vector.broadcast %627 : vector<8x1xf32> to vector<8x32xf32>
    %630 = arith.mulf %628, %629 : vector<8x32xf32>
    %631 = arith.addf %625, %630 : vector<8x32xf32>
    %632 = vector.extract_strided_slice %614 {offsets = [0, 96], sizes = [8, 32], strides = [1, 1]} : vector<8x128xbf16> to vector<8x32xbf16>
    %633 = vector.extract_strided_slice %7 {offsets = [0, 67], sizes = [8, 1], strides = [1, 1]} : vector<8x128xf32> to vector<8x1xf32>
    %634 = arith.extf %632 : vector<8x32xbf16> to vector<8x32xf32>
    %635 = vector.broadcast %633 : vector<8x1xf32> to vector<8x32xf32>
    %636 = arith.mulf %634, %635 : vector<8x32xf32>
    %637 = arith.addf %631, %636 : vector<8x32xf32>
    %cst_84 = arith.constant 0.333333343 : f32
    %638 = vector.broadcast %cst_84 : f32 to vector<8x32xf32>
    %639 = arith.mulf %637, %638 : vector<8x32xf32>
    %640 = arith.addf %596, %639 : vector<8x32xf32>
    %641 = arith.truncf %640 : vector<8x32xf32> to vector<8x32xbf16>
    %c0_85 = arith.constant 0 : index
    %c0_86 = arith.constant 0 : index
    %642 = vector.load %arg6[%c0_85, %c0_86] : memref<32x128xbf16, #tpu.memory_space<vmem>>, vector<32x128xbf16>
    %cst_87 = arith.constant dense<0.000000e+00> : vector<8x128xf32>
    %643 = tpu.matmul %641, %642, %cst_87 {dimension_numbers = #tpu.dot_dimension_numbers<[1], [0], [0], [1], [0, 0, 1, 1], [], []>} : vector<8x32xbf16>, vector<32x128xbf16>, vector<8x128xf32> -> vector<8x128xf32>
    %644 = vector.broadcast %5 : vector<1x128xf32> to vector<8x128xf32>
    %645 = arith.addf %643, %644 : vector<8x128xf32>
    %646 = arith.truncf %645 : vector<8x128xf32> to vector<8x128xbf16>
    %647 = math.tanh %646 : vector<8x128xbf16>
    %648 = vector.extract_strided_slice %647 {offsets = [0, 0], sizes = [8, 32], strides = [1, 1]} : vector<8x128xbf16> to vector<8x32xbf16>
    %649 = vector.extract_strided_slice %7 {offsets = [0, 68], sizes = [8, 1], strides = [1, 1]} : vector<8x128xf32> to vector<8x1xf32>
    %650 = arith.extf %648 : vector<8x32xbf16> to vector<8x32xf32>
    %651 = vector.broadcast %649 : vector<8x1xf32> to vector<8x32xf32>
    %652 = arith.mulf %650, %651 : vector<8x32xf32>
    %653 = vector.extract_strided_slice %647 {offsets = [0, 32], sizes = [8, 32], strides = [1, 1]} : vector<8x128xbf16> to vector<8x32xbf16>
    %654 = vector.extract_strided_slice %7 {offsets = [0, 69], sizes = [8, 1], strides = [1, 1]} : vector<8x128xf32> to vector<8x1xf32>
    %655 = arith.extf %653 : vector<8x32xbf16> to vector<8x32xf32>
    %656 = vector.broadcast %654 : vector<8x1xf32> to vector<8x32xf32>
    %657 = arith.mulf %655, %656 : vector<8x32xf32>
    %658 = arith.addf %652, %657 : vector<8x32xf32>
    %659 = vector.extract_strided_slice %647 {offsets = [0, 64], sizes = [8, 32], strides = [1, 1]} : vector<8x128xbf16> to vector<8x32xbf16>
    %660 = vector.extract_strided_slice %7 {offsets = [0, 70], sizes = [8, 1], strides = [1, 1]} : vector<8x128xf32> to vector<8x1xf32>
    %661 = arith.extf %659 : vector<8x32xbf16> to vector<8x32xf32>
    %662 = vector.broadcast %660 : vector<8x1xf32> to vector<8x32xf32>
    %663 = arith.mulf %661, %662 : vector<8x32xf32>
    %664 = arith.addf %658, %663 : vector<8x32xf32>
    %665 = vector.extract_strided_slice %647 {offsets = [0, 96], sizes = [8, 32], strides = [1, 1]} : vector<8x128xbf16> to vector<8x32xbf16>
    %666 = vector.extract_strided_slice %7 {offsets = [0, 71], sizes = [8, 1], strides = [1, 1]} : vector<8x128xf32> to vector<8x1xf32>
    %667 = arith.extf %665 : vector<8x32xbf16> to vector<8x32xf32>
    %668 = vector.broadcast %666 : vector<8x1xf32> to vector<8x32xf32>
    %669 = arith.mulf %667, %668 : vector<8x32xf32>
    %670 = arith.addf %664, %669 : vector<8x32xf32>
    %cst_88 = arith.constant 0.333333343 : f32
    %671 = vector.broadcast %cst_88 : f32 to vector<8x32xf32>
    %672 = arith.mulf %637, %671 : vector<8x32xf32>
    %673 = arith.subf %670, %672 : vector<8x32xf32>
    %674 = arith.addf %596, %673 : vector<8x32xf32>
    %675 = arith.truncf %674 : vector<8x32xf32> to vector<8x32xbf16>
    %c0_89 = arith.constant 0 : index
    %c0_90 = arith.constant 0 : index
    %676 = vector.load %arg6[%c0_89, %c0_90] : memref<32x128xbf16, #tpu.memory_space<vmem>>, vector<32x128xbf16>
    %cst_91 = arith.constant dense<0.000000e+00> : vector<8x128xf32>
    %677 = tpu.matmul %675, %676, %cst_91 {dimension_numbers = #tpu.dot_dimension_numbers<[1], [0], [0], [1], [0, 0, 1, 1], [], []>} : vector<8x32xbf16>, vector<32x128xbf16>, vector<8x128xf32> -> vector<8x128xf32>
    %678 = vector.broadcast %5 : vector<1x128xf32> to vector<8x128xf32>
    %679 = arith.addf %677, %678 : vector<8x128xf32>
    %680 = arith.truncf %679 : vector<8x128xf32> to vector<8x128xbf16>
    %681 = math.tanh %680 : vector<8x128xbf16>
    %682 = vector.extract_strided_slice %681 {offsets = [0, 0], sizes = [8, 32], strides = [1, 1]} : vector<8x128xbf16> to vector<8x32xbf16>
    %683 = vector.extract_strided_slice %7 {offsets = [0, 72], sizes = [8, 1], strides = [1, 1]} : vector<8x128xf32> to vector<8x1xf32>
    %684 = arith.extf %682 : vector<8x32xbf16> to vector<8x32xf32>
    %685 = vector.broadcast %683 : vector<8x1xf32> to vector<8x32xf32>
    %686 = arith.mulf %684, %685 : vector<8x32xf32>
    %687 = vector.extract_strided_slice %681 {offsets = [0, 32], sizes = [8, 32], strides = [1, 1]} : vector<8x128xbf16> to vector<8x32xbf16>
    %688 = vector.extract_strided_slice %7 {offsets = [0, 73], sizes = [8, 1], strides = [1, 1]} : vector<8x128xf32> to vector<8x1xf32>
    %689 = arith.extf %687 : vector<8x32xbf16> to vector<8x32xf32>
    %690 = vector.broadcast %688 : vector<8x1xf32> to vector<8x32xf32>
    %691 = arith.mulf %689, %690 : vector<8x32xf32>
    %692 = arith.addf %686, %691 : vector<8x32xf32>
    %693 = vector.extract_strided_slice %681 {offsets = [0, 64], sizes = [8, 32], strides = [1, 1]} : vector<8x128xbf16> to vector<8x32xbf16>
    %694 = vector.extract_strided_slice %7 {offsets = [0, 74], sizes = [8, 1], strides = [1, 1]} : vector<8x128xf32> to vector<8x1xf32>
    %695 = arith.extf %693 : vector<8x32xbf16> to vector<8x32xf32>
    %696 = vector.broadcast %694 : vector<8x1xf32> to vector<8x32xf32>
    %697 = arith.mulf %695, %696 : vector<8x32xf32>
    %698 = arith.addf %692, %697 : vector<8x32xf32>
    %699 = vector.extract_strided_slice %681 {offsets = [0, 96], sizes = [8, 32], strides = [1, 1]} : vector<8x128xbf16> to vector<8x32xbf16>
    %700 = vector.extract_strided_slice %7 {offsets = [0, 75], sizes = [8, 1], strides = [1, 1]} : vector<8x128xf32> to vector<8x1xf32>
    %701 = arith.extf %699 : vector<8x32xbf16> to vector<8x32xf32>
    %702 = vector.broadcast %700 : vector<8x1xf32> to vector<8x32xf32>
    %703 = arith.mulf %701, %702 : vector<8x32xf32>
    %704 = arith.addf %698, %703 : vector<8x32xf32>
    %705 = arith.subf %637, %670 : vector<8x32xf32>
    %706 = arith.addf %705, %704 : vector<8x32xf32>
    %707 = arith.addf %596, %706 : vector<8x32xf32>
    %708 = arith.truncf %707 : vector<8x32xf32> to vector<8x32xbf16>
    %c0_92 = arith.constant 0 : index
    %c0_93 = arith.constant 0 : index
    %709 = vector.load %arg6[%c0_92, %c0_93] : memref<32x128xbf16, #tpu.memory_space<vmem>>, vector<32x128xbf16>
    %cst_94 = arith.constant dense<0.000000e+00> : vector<8x128xf32>
    %710 = tpu.matmul %708, %709, %cst_94 {dimension_numbers = #tpu.dot_dimension_numbers<[1], [0], [0], [1], [0, 0, 1, 1], [], []>} : vector<8x32xbf16>, vector<32x128xbf16>, vector<8x128xf32> -> vector<8x128xf32>
    %711 = vector.broadcast %5 : vector<1x128xf32> to vector<8x128xf32>
    %712 = arith.addf %710, %711 : vector<8x128xf32>
    %713 = arith.truncf %712 : vector<8x128xf32> to vector<8x128xbf16>
    %714 = math.tanh %713 : vector<8x128xbf16>
    %715 = vector.extract_strided_slice %714 {offsets = [0, 0], sizes = [8, 32], strides = [1, 1]} : vector<8x128xbf16> to vector<8x32xbf16>
    %716 = vector.extract_strided_slice %7 {offsets = [0, 76], sizes = [8, 1], strides = [1, 1]} : vector<8x128xf32> to vector<8x1xf32>
    %717 = arith.extf %715 : vector<8x32xbf16> to vector<8x32xf32>
    %718 = vector.broadcast %716 : vector<8x1xf32> to vector<8x32xf32>
    %719 = arith.mulf %717, %718 : vector<8x32xf32>
    %720 = vector.extract_strided_slice %714 {offsets = [0, 32], sizes = [8, 32], strides = [1, 1]} : vector<8x128xbf16> to vector<8x32xbf16>
    %721 = vector.extract_strided_slice %7 {offsets = [0, 77], sizes = [8, 1], strides = [1, 1]} : vector<8x128xf32> to vector<8x1xf32>
    %722 = arith.extf %720 : vector<8x32xbf16> to vector<8x32xf32>
    %723 = vector.broadcast %721 : vector<8x1xf32> to vector<8x32xf32>
    %724 = arith.mulf %722, %723 : vector<8x32xf32>
    %725 = arith.addf %719, %724 : vector<8x32xf32>
    %726 = vector.extract_strided_slice %714 {offsets = [0, 64], sizes = [8, 32], strides = [1, 1]} : vector<8x128xbf16> to vector<8x32xbf16>
    %727 = vector.extract_strided_slice %7 {offsets = [0, 78], sizes = [8, 1], strides = [1, 1]} : vector<8x128xf32> to vector<8x1xf32>
    %728 = arith.extf %726 : vector<8x32xbf16> to vector<8x32xf32>
    %729 = vector.broadcast %727 : vector<8x1xf32> to vector<8x32xf32>
    %730 = arith.mulf %728, %729 : vector<8x32xf32>
    %731 = arith.addf %725, %730 : vector<8x32xf32>
    %732 = vector.extract_strided_slice %714 {offsets = [0, 96], sizes = [8, 32], strides = [1, 1]} : vector<8x128xbf16> to vector<8x32xbf16>
    %733 = vector.extract_strided_slice %7 {offsets = [0, 79], sizes = [8, 1], strides = [1, 1]} : vector<8x128xf32> to vector<8x1xf32>
    %734 = arith.extf %732 : vector<8x32xbf16> to vector<8x32xf32>
    %735 = vector.broadcast %733 : vector<8x1xf32> to vector<8x32xf32>
    %736 = arith.mulf %734, %735 : vector<8x32xf32>
    %737 = arith.addf %731, %736 : vector<8x32xf32>
    %738 = arith.addf %670, %704 : vector<8x32xf32>
    %cst_95 = arith.constant 3.000000e+00 : f32
    %739 = vector.broadcast %cst_95 : f32 to vector<8x32xf32>
    %740 = arith.mulf %739, %738 : vector<8x32xf32>
    %741 = arith.addf %637, %740 : vector<8x32xf32>
    %742 = arith.addf %741, %737 : vector<8x32xf32>
    %cst_96 = arith.constant 1.250000e-01 : f32
    %743 = vector.broadcast %cst_96 : f32 to vector<8x32xf32>
    %744 = arith.mulf %742, %743 : vector<8x32xf32>
    %745 = arith.addf %596, %744 : vector<8x32xf32>
    %746 = vector.broadcast %607 : i32 to vector<8x1xi32>
    %747 = arith.cmpi eq, %3, %746 : vector<8x1xi32>
    %748 = arith.subf %745, %596 : vector<8x32xf32>
    %749 = vector.broadcast %4 : vector<8x1xf32> to vector<8x32xf32>
    %750 = arith.mulf %749, %748 : vector<8x32xf32>
    %751 = arith.addf %596, %750 : vector<8x32xf32>
    %752 = vector.shape_cast %747 : vector<8x1xi1> to vector<8x1xi1>
    %753 = vector.broadcast %752 : vector<8x1xi1> to vector<8x32xi1>
    %754 = arith.select %753, %751, %605 : vector<8x32xi1>, vector<8x32xf32>
    %c8_i32_97 = arith.constant 8 : i32
    %755 = arith.muli %arg1, %c8_i32_97 : i32
    %c5_i32 = arith.constant 5 : i32
    %756 = arith.addi %755, %c5_i32 : i32
    %757 = arith.truncf %745 : vector<8x32xf32> to vector<8x32xbf16>
    %c0_98 = arith.constant 0 : index
    %c0_99 = arith.constant 0 : index
    %758 = vector.load %arg6[%c0_98, %c0_99] : memref<32x128xbf16, #tpu.memory_space<vmem>>, vector<32x128xbf16>
    %cst_100 = arith.constant dense<0.000000e+00> : vector<8x128xf32>
    %759 = tpu.matmul %757, %758, %cst_100 {dimension_numbers = #tpu.dot_dimension_numbers<[1], [0], [0], [1], [0, 0, 1, 1], [], []>} : vector<8x32xbf16>, vector<32x128xbf16>, vector<8x128xf32> -> vector<8x128xf32>
    %760 = vector.broadcast %5 : vector<1x128xf32> to vector<8x128xf32>
    %761 = arith.addf %759, %760 : vector<8x128xf32>
    %762 = arith.truncf %761 : vector<8x128xf32> to vector<8x128xbf16>
    %763 = math.tanh %762 : vector<8x128xbf16>
    %764 = vector.extract_strided_slice %763 {offsets = [0, 0], sizes = [8, 32], strides = [1, 1]} : vector<8x128xbf16> to vector<8x32xbf16>
    %765 = vector.extract_strided_slice %7 {offsets = [0, 80], sizes = [8, 1], strides = [1, 1]} : vector<8x128xf32> to vector<8x1xf32>
    %766 = arith.extf %764 : vector<8x32xbf16> to vector<8x32xf32>
    %767 = vector.broadcast %765 : vector<8x1xf32> to vector<8x32xf32>
    %768 = arith.mulf %766, %767 : vector<8x32xf32>
    %769 = vector.extract_strided_slice %763 {offsets = [0, 32], sizes = [8, 32], strides = [1, 1]} : vector<8x128xbf16> to vector<8x32xbf16>
    %770 = vector.extract_strided_slice %7 {offsets = [0, 81], sizes = [8, 1], strides = [1, 1]} : vector<8x128xf32> to vector<8x1xf32>
    %771 = arith.extf %769 : vector<8x32xbf16> to vector<8x32xf32>
    %772 = vector.broadcast %770 : vector<8x1xf32> to vector<8x32xf32>
    %773 = arith.mulf %771, %772 : vector<8x32xf32>
    %774 = arith.addf %768, %773 : vector<8x32xf32>
    %775 = vector.extract_strided_slice %763 {offsets = [0, 64], sizes = [8, 32], strides = [1, 1]} : vector<8x128xbf16> to vector<8x32xbf16>
    %776 = vector.extract_strided_slice %7 {offsets = [0, 82], sizes = [8, 1], strides = [1, 1]} : vector<8x128xf32> to vector<8x1xf32>
    %777 = arith.extf %775 : vector<8x32xbf16> to vector<8x32xf32>
    %778 = vector.broadcast %776 : vector<8x1xf32> to vector<8x32xf32>
    %779 = arith.mulf %777, %778 : vector<8x32xf32>
    %780 = arith.addf %774, %779 : vector<8x32xf32>
    %781 = vector.extract_strided_slice %763 {offsets = [0, 96], sizes = [8, 32], strides = [1, 1]} : vector<8x128xbf16> to vector<8x32xbf16>
    %782 = vector.extract_strided_slice %7 {offsets = [0, 83], sizes = [8, 1], strides = [1, 1]} : vector<8x128xf32> to vector<8x1xf32>
    %783 = arith.extf %781 : vector<8x32xbf16> to vector<8x32xf32>
    %784 = vector.broadcast %782 : vector<8x1xf32> to vector<8x32xf32>
    %785 = arith.mulf %783, %784 : vector<8x32xf32>
    %786 = arith.addf %780, %785 : vector<8x32xf32>
    %cst_101 = arith.constant 0.333333343 : f32
    %787 = vector.broadcast %cst_101 : f32 to vector<8x32xf32>
    %788 = arith.mulf %786, %787 : vector<8x32xf32>
    %789 = arith.addf %745, %788 : vector<8x32xf32>
    %790 = arith.truncf %789 : vector<8x32xf32> to vector<8x32xbf16>
    %c0_102 = arith.constant 0 : index
    %c0_103 = arith.constant 0 : index
    %791 = vector.load %arg6[%c0_102, %c0_103] : memref<32x128xbf16, #tpu.memory_space<vmem>>, vector<32x128xbf16>
    %cst_104 = arith.constant dense<0.000000e+00> : vector<8x128xf32>
    %792 = tpu.matmul %790, %791, %cst_104 {dimension_numbers = #tpu.dot_dimension_numbers<[1], [0], [0], [1], [0, 0, 1, 1], [], []>} : vector<8x32xbf16>, vector<32x128xbf16>, vector<8x128xf32> -> vector<8x128xf32>
    %793 = vector.broadcast %5 : vector<1x128xf32> to vector<8x128xf32>
    %794 = arith.addf %792, %793 : vector<8x128xf32>
    %795 = arith.truncf %794 : vector<8x128xf32> to vector<8x128xbf16>
    %796 = math.tanh %795 : vector<8x128xbf16>
    %797 = vector.extract_strided_slice %796 {offsets = [0, 0], sizes = [8, 32], strides = [1, 1]} : vector<8x128xbf16> to vector<8x32xbf16>
    %798 = vector.extract_strided_slice %7 {offsets = [0, 84], sizes = [8, 1], strides = [1, 1]} : vector<8x128xf32> to vector<8x1xf32>
    %799 = arith.extf %797 : vector<8x32xbf16> to vector<8x32xf32>
    %800 = vector.broadcast %798 : vector<8x1xf32> to vector<8x32xf32>
    %801 = arith.mulf %799, %800 : vector<8x32xf32>
    %802 = vector.extract_strided_slice %796 {offsets = [0, 32], sizes = [8, 32], strides = [1, 1]} : vector<8x128xbf16> to vector<8x32xbf16>
    %803 = vector.extract_strided_slice %7 {offsets = [0, 85], sizes = [8, 1], strides = [1, 1]} : vector<8x128xf32> to vector<8x1xf32>
    %804 = arith.extf %802 : vector<8x32xbf16> to vector<8x32xf32>
    %805 = vector.broadcast %803 : vector<8x1xf32> to vector<8x32xf32>
    %806 = arith.mulf %804, %805 : vector<8x32xf32>
    %807 = arith.addf %801, %806 : vector<8x32xf32>
    %808 = vector.extract_strided_slice %796 {offsets = [0, 64], sizes = [8, 32], strides = [1, 1]} : vector<8x128xbf16> to vector<8x32xbf16>
    %809 = vector.extract_strided_slice %7 {offsets = [0, 86], sizes = [8, 1], strides = [1, 1]} : vector<8x128xf32> to vector<8x1xf32>
    %810 = arith.extf %808 : vector<8x32xbf16> to vector<8x32xf32>
    %811 = vector.broadcast %809 : vector<8x1xf32> to vector<8x32xf32>
    %812 = arith.mulf %810, %811 : vector<8x32xf32>
    %813 = arith.addf %807, %812 : vector<8x32xf32>
    %814 = vector.extract_strided_slice %796 {offsets = [0, 96], sizes = [8, 32], strides = [1, 1]} : vector<8x128xbf16> to vector<8x32xbf16>
    %815 = vector.extract_strided_slice %7 {offsets = [0, 87], sizes = [8, 1], strides = [1, 1]} : vector<8x128xf32> to vector<8x1xf32>
    %816 = arith.extf %814 : vector<8x32xbf16> to vector<8x32xf32>
    %817 = vector.broadcast %815 : vector<8x1xf32> to vector<8x32xf32>
    %818 = arith.mulf %816, %817 : vector<8x32xf32>
    %819 = arith.addf %813, %818 : vector<8x32xf32>
    %cst_105 = arith.constant 0.333333343 : f32
    %820 = vector.broadcast %cst_105 : f32 to vector<8x32xf32>
    %821 = arith.mulf %786, %820 : vector<8x32xf32>
    %822 = arith.subf %819, %821 : vector<8x32xf32>
    %823 = arith.addf %745, %822 : vector<8x32xf32>
    %824 = arith.truncf %823 : vector<8x32xf32> to vector<8x32xbf16>
    %c0_106 = arith.constant 0 : index
    %c0_107 = arith.constant 0 : index
    %825 = vector.load %arg6[%c0_106, %c0_107] : memref<32x128xbf16, #tpu.memory_space<vmem>>, vector<32x128xbf16>
    %cst_108 = arith.constant dense<0.000000e+00> : vector<8x128xf32>
    %826 = tpu.matmul %824, %825, %cst_108 {dimension_numbers = #tpu.dot_dimension_numbers<[1], [0], [0], [1], [0, 0, 1, 1], [], []>} : vector<8x32xbf16>, vector<32x128xbf16>, vector<8x128xf32> -> vector<8x128xf32>
    %827 = vector.broadcast %5 : vector<1x128xf32> to vector<8x128xf32>
    %828 = arith.addf %826, %827 : vector<8x128xf32>
    %829 = arith.truncf %828 : vector<8x128xf32> to vector<8x128xbf16>
    %830 = math.tanh %829 : vector<8x128xbf16>
    %831 = vector.extract_strided_slice %830 {offsets = [0, 0], sizes = [8, 32], strides = [1, 1]} : vector<8x128xbf16> to vector<8x32xbf16>
    %832 = vector.extract_strided_slice %7 {offsets = [0, 88], sizes = [8, 1], strides = [1, 1]} : vector<8x128xf32> to vector<8x1xf32>
    %833 = arith.extf %831 : vector<8x32xbf16> to vector<8x32xf32>
    %834 = vector.broadcast %832 : vector<8x1xf32> to vector<8x32xf32>
    %835 = arith.mulf %833, %834 : vector<8x32xf32>
    %836 = vector.extract_strided_slice %830 {offsets = [0, 32], sizes = [8, 32], strides = [1, 1]} : vector<8x128xbf16> to vector<8x32xbf16>
    %837 = vector.extract_strided_slice %7 {offsets = [0, 89], sizes = [8, 1], strides = [1, 1]} : vector<8x128xf32> to vector<8x1xf32>
    %838 = arith.extf %836 : vector<8x32xbf16> to vector<8x32xf32>
    %839 = vector.broadcast %837 : vector<8x1xf32> to vector<8x32xf32>
    %840 = arith.mulf %838, %839 : vector<8x32xf32>
    %841 = arith.addf %835, %840 : vector<8x32xf32>
    %842 = vector.extract_strided_slice %830 {offsets = [0, 64], sizes = [8, 32], strides = [1, 1]} : vector<8x128xbf16> to vector<8x32xbf16>
    %843 = vector.extract_strided_slice %7 {offsets = [0, 90], sizes = [8, 1], strides = [1, 1]} : vector<8x128xf32> to vector<8x1xf32>
    %844 = arith.extf %842 : vector<8x32xbf16> to vector<8x32xf32>
    %845 = vector.broadcast %843 : vector<8x1xf32> to vector<8x32xf32>
    %846 = arith.mulf %844, %845 : vector<8x32xf32>
    %847 = arith.addf %841, %846 : vector<8x32xf32>
    %848 = vector.extract_strided_slice %830 {offsets = [0, 96], sizes = [8, 32], strides = [1, 1]} : vector<8x128xbf16> to vector<8x32xbf16>
    %849 = vector.extract_strided_slice %7 {offsets = [0, 91], sizes = [8, 1], strides = [1, 1]} : vector<8x128xf32> to vector<8x1xf32>
    %850 = arith.extf %848 : vector<8x32xbf16> to vector<8x32xf32>
    %851 = vector.broadcast %849 : vector<8x1xf32> to vector<8x32xf32>
    %852 = arith.mulf %850, %851 : vector<8x32xf32>
    %853 = arith.addf %847, %852 : vector<8x32xf32>
    %854 = arith.subf %786, %819 : vector<8x32xf32>
    %855 = arith.addf %854, %853 : vector<8x32xf32>
    %856 = arith.addf %745, %855 : vector<8x32xf32>
    %857 = arith.truncf %856 : vector<8x32xf32> to vector<8x32xbf16>
    %c0_109 = arith.constant 0 : index
    %c0_110 = arith.constant 0 : index
    %858 = vector.load %arg6[%c0_109, %c0_110] : memref<32x128xbf16, #tpu.memory_space<vmem>>, vector<32x128xbf16>
    %cst_111 = arith.constant dense<0.000000e+00> : vector<8x128xf32>
    %859 = tpu.matmul %857, %858, %cst_111 {dimension_numbers = #tpu.dot_dimension_numbers<[1], [0], [0], [1], [0, 0, 1, 1], [], []>} : vector<8x32xbf16>, vector<32x128xbf16>, vector<8x128xf32> -> vector<8x128xf32>
    %860 = vector.broadcast %5 : vector<1x128xf32> to vector<8x128xf32>
    %861 = arith.addf %859, %860 : vector<8x128xf32>
    %862 = arith.truncf %861 : vector<8x128xf32> to vector<8x128xbf16>
    %863 = math.tanh %862 : vector<8x128xbf16>
    %864 = vector.extract_strided_slice %863 {offsets = [0, 0], sizes = [8, 32], strides = [1, 1]} : vector<8x128xbf16> to vector<8x32xbf16>
    %865 = vector.extract_strided_slice %7 {offsets = [0, 92], sizes = [8, 1], strides = [1, 1]} : vector<8x128xf32> to vector<8x1xf32>
    %866 = arith.extf %864 : vector<8x32xbf16> to vector<8x32xf32>
    %867 = vector.broadcast %865 : vector<8x1xf32> to vector<8x32xf32>
    %868 = arith.mulf %866, %867 : vector<8x32xf32>
    %869 = vector.extract_strided_slice %863 {offsets = [0, 32], sizes = [8, 32], strides = [1, 1]} : vector<8x128xbf16> to vector<8x32xbf16>
    %870 = vector.extract_strided_slice %7 {offsets = [0, 93], sizes = [8, 1], strides = [1, 1]} : vector<8x128xf32> to vector<8x1xf32>
    %871 = arith.extf %869 : vector<8x32xbf16> to vector<8x32xf32>
    %872 = vector.broadcast %870 : vector<8x1xf32> to vector<8x32xf32>
    %873 = arith.mulf %871, %872 : vector<8x32xf32>
    %874 = arith.addf %868, %873 : vector<8x32xf32>
    %875 = vector.extract_strided_slice %863 {offsets = [0, 64], sizes = [8, 32], strides = [1, 1]} : vector<8x128xbf16> to vector<8x32xbf16>
    %876 = vector.extract_strided_slice %7 {offsets = [0, 94], sizes = [8, 1], strides = [1, 1]} : vector<8x128xf32> to vector<8x1xf32>
    %877 = arith.extf %875 : vector<8x32xbf16> to vector<8x32xf32>
    %878 = vector.broadcast %876 : vector<8x1xf32> to vector<8x32xf32>
    %879 = arith.mulf %877, %878 : vector<8x32xf32>
    %880 = arith.addf %874, %879 : vector<8x32xf32>
    %881 = vector.extract_strided_slice %863 {offsets = [0, 96], sizes = [8, 32], strides = [1, 1]} : vector<8x128xbf16> to vector<8x32xbf16>
    %882 = vector.extract_strided_slice %7 {offsets = [0, 95], sizes = [8, 1], strides = [1, 1]} : vector<8x128xf32> to vector<8x1xf32>
    %883 = arith.extf %881 : vector<8x32xbf16> to vector<8x32xf32>
    %884 = vector.broadcast %882 : vector<8x1xf32> to vector<8x32xf32>
    %885 = arith.mulf %883, %884 : vector<8x32xf32>
    %886 = arith.addf %880, %885 : vector<8x32xf32>
    %887 = arith.addf %819, %853 : vector<8x32xf32>
    %cst_112 = arith.constant 3.000000e+00 : f32
    %888 = vector.broadcast %cst_112 : f32 to vector<8x32xf32>
    %889 = arith.mulf %888, %887 : vector<8x32xf32>
    %890 = arith.addf %786, %889 : vector<8x32xf32>
    %891 = arith.addf %890, %886 : vector<8x32xf32>
    %cst_113 = arith.constant 1.250000e-01 : f32
    %892 = vector.broadcast %cst_113 : f32 to vector<8x32xf32>
    %893 = arith.mulf %891, %892 : vector<8x32xf32>
    %894 = arith.addf %745, %893 : vector<8x32xf32>
    %895 = vector.broadcast %756 : i32 to vector<8x1xi32>
    %896 = arith.cmpi eq, %3, %895 : vector<8x1xi32>
    %897 = arith.subf %894, %745 : vector<8x32xf32>
    %898 = vector.broadcast %4 : vector<8x1xf32> to vector<8x32xf32>
    %899 = arith.mulf %898, %897 : vector<8x32xf32>
    %900 = arith.addf %745, %899 : vector<8x32xf32>
    %901 = vector.shape_cast %896 : vector<8x1xi1> to vector<8x1xi1>
    %902 = vector.broadcast %901 : vector<8x1xi1> to vector<8x32xi1>
    %903 = arith.select %902, %900, %754 : vector<8x32xi1>, vector<8x32xf32>
    %c8_i32_114 = arith.constant 8 : i32
    %904 = arith.muli %arg1, %c8_i32_114 : i32
    %c6_i32 = arith.constant 6 : i32
    %905 = arith.addi %904, %c6_i32 : i32
    %906 = arith.truncf %894 : vector<8x32xf32> to vector<8x32xbf16>
    %c0_115 = arith.constant 0 : index
    %c0_116 = arith.constant 0 : index
    %907 = vector.load %arg6[%c0_115, %c0_116] : memref<32x128xbf16, #tpu.memory_space<vmem>>, vector<32x128xbf16>
    %cst_117 = arith.constant dense<0.000000e+00> : vector<8x128xf32>
    %908 = tpu.matmul %906, %907, %cst_117 {dimension_numbers = #tpu.dot_dimension_numbers<[1], [0], [0], [1], [0, 0, 1, 1], [], []>} : vector<8x32xbf16>, vector<32x128xbf16>, vector<8x128xf32> -> vector<8x128xf32>
    %909 = vector.broadcast %5 : vector<1x128xf32> to vector<8x128xf32>
    %910 = arith.addf %908, %909 : vector<8x128xf32>
    %911 = arith.truncf %910 : vector<8x128xf32> to vector<8x128xbf16>
    %912 = math.tanh %911 : vector<8x128xbf16>
    %913 = vector.extract_strided_slice %912 {offsets = [0, 0], sizes = [8, 32], strides = [1, 1]} : vector<8x128xbf16> to vector<8x32xbf16>
    %914 = vector.extract_strided_slice %7 {offsets = [0, 96], sizes = [8, 1], strides = [1, 1]} : vector<8x128xf32> to vector<8x1xf32>
    %915 = arith.extf %913 : vector<8x32xbf16> to vector<8x32xf32>
    %916 = vector.broadcast %914 : vector<8x1xf32> to vector<8x32xf32>
    %917 = arith.mulf %915, %916 : vector<8x32xf32>
    %918 = vector.extract_strided_slice %912 {offsets = [0, 32], sizes = [8, 32], strides = [1, 1]} : vector<8x128xbf16> to vector<8x32xbf16>
    %919 = vector.extract_strided_slice %7 {offsets = [0, 97], sizes = [8, 1], strides = [1, 1]} : vector<8x128xf32> to vector<8x1xf32>
    %920 = arith.extf %918 : vector<8x32xbf16> to vector<8x32xf32>
    %921 = vector.broadcast %919 : vector<8x1xf32> to vector<8x32xf32>
    %922 = arith.mulf %920, %921 : vector<8x32xf32>
    %923 = arith.addf %917, %922 : vector<8x32xf32>
    %924 = vector.extract_strided_slice %912 {offsets = [0, 64], sizes = [8, 32], strides = [1, 1]} : vector<8x128xbf16> to vector<8x32xbf16>
    %925 = vector.extract_strided_slice %7 {offsets = [0, 98], sizes = [8, 1], strides = [1, 1]} : vector<8x128xf32> to vector<8x1xf32>
    %926 = arith.extf %924 : vector<8x32xbf16> to vector<8x32xf32>
    %927 = vector.broadcast %925 : vector<8x1xf32> to vector<8x32xf32>
    %928 = arith.mulf %926, %927 : vector<8x32xf32>
    %929 = arith.addf %923, %928 : vector<8x32xf32>
    %930 = vector.extract_strided_slice %912 {offsets = [0, 96], sizes = [8, 32], strides = [1, 1]} : vector<8x128xbf16> to vector<8x32xbf16>
    %931 = vector.extract_strided_slice %7 {offsets = [0, 99], sizes = [8, 1], strides = [1, 1]} : vector<8x128xf32> to vector<8x1xf32>
    %932 = arith.extf %930 : vector<8x32xbf16> to vector<8x32xf32>
    %933 = vector.broadcast %931 : vector<8x1xf32> to vector<8x32xf32>
    %934 = arith.mulf %932, %933 : vector<8x32xf32>
    %935 = arith.addf %929, %934 : vector<8x32xf32>
    %cst_118 = arith.constant 0.333333343 : f32
    %936 = vector.broadcast %cst_118 : f32 to vector<8x32xf32>
    %937 = arith.mulf %935, %936 : vector<8x32xf32>
    %938 = arith.addf %894, %937 : vector<8x32xf32>
    %939 = arith.truncf %938 : vector<8x32xf32> to vector<8x32xbf16>
    %c0_119 = arith.constant 0 : index
    %c0_120 = arith.constant 0 : index
    %940 = vector.load %arg6[%c0_119, %c0_120] : memref<32x128xbf16, #tpu.memory_space<vmem>>, vector<32x128xbf16>
    %cst_121 = arith.constant dense<0.000000e+00> : vector<8x128xf32>
    %941 = tpu.matmul %939, %940, %cst_121 {dimension_numbers = #tpu.dot_dimension_numbers<[1], [0], [0], [1], [0, 0, 1, 1], [], []>} : vector<8x32xbf16>, vector<32x128xbf16>, vector<8x128xf32> -> vector<8x128xf32>
    %942 = vector.broadcast %5 : vector<1x128xf32> to vector<8x128xf32>
    %943 = arith.addf %941, %942 : vector<8x128xf32>
    %944 = arith.truncf %943 : vector<8x128xf32> to vector<8x128xbf16>
    %945 = math.tanh %944 : vector<8x128xbf16>
    %946 = vector.extract_strided_slice %945 {offsets = [0, 0], sizes = [8, 32], strides = [1, 1]} : vector<8x128xbf16> to vector<8x32xbf16>
    %947 = vector.extract_strided_slice %7 {offsets = [0, 100], sizes = [8, 1], strides = [1, 1]} : vector<8x128xf32> to vector<8x1xf32>
    %948 = arith.extf %946 : vector<8x32xbf16> to vector<8x32xf32>
    %949 = vector.broadcast %947 : vector<8x1xf32> to vector<8x32xf32>
    %950 = arith.mulf %948, %949 : vector<8x32xf32>
    %951 = vector.extract_strided_slice %945 {offsets = [0, 32], sizes = [8, 32], strides = [1, 1]} : vector<8x128xbf16> to vector<8x32xbf16>
    %952 = vector.extract_strided_slice %7 {offsets = [0, 101], sizes = [8, 1], strides = [1, 1]} : vector<8x128xf32> to vector<8x1xf32>
    %953 = arith.extf %951 : vector<8x32xbf16> to vector<8x32xf32>
    %954 = vector.broadcast %952 : vector<8x1xf32> to vector<8x32xf32>
    %955 = arith.mulf %953, %954 : vector<8x32xf32>
    %956 = arith.addf %950, %955 : vector<8x32xf32>
    %957 = vector.extract_strided_slice %945 {offsets = [0, 64], sizes = [8, 32], strides = [1, 1]} : vector<8x128xbf16> to vector<8x32xbf16>
    %958 = vector.extract_strided_slice %7 {offsets = [0, 102], sizes = [8, 1], strides = [1, 1]} : vector<8x128xf32> to vector<8x1xf32>
    %959 = arith.extf %957 : vector<8x32xbf16> to vector<8x32xf32>
    %960 = vector.broadcast %958 : vector<8x1xf32> to vector<8x32xf32>
    %961 = arith.mulf %959, %960 : vector<8x32xf32>
    %962 = arith.addf %956, %961 : vector<8x32xf32>
    %963 = vector.extract_strided_slice %945 {offsets = [0, 96], sizes = [8, 32], strides = [1, 1]} : vector<8x128xbf16> to vector<8x32xbf16>
    %964 = vector.extract_strided_slice %7 {offsets = [0, 103], sizes = [8, 1], strides = [1, 1]} : vector<8x128xf32> to vector<8x1xf32>
    %965 = arith.extf %963 : vector<8x32xbf16> to vector<8x32xf32>
    %966 = vector.broadcast %964 : vector<8x1xf32> to vector<8x32xf32>
    %967 = arith.mulf %965, %966 : vector<8x32xf32>
    %968 = arith.addf %962, %967 : vector<8x32xf32>
    %cst_122 = arith.constant 0.333333343 : f32
    %969 = vector.broadcast %cst_122 : f32 to vector<8x32xf32>
    %970 = arith.mulf %935, %969 : vector<8x32xf32>
    %971 = arith.subf %968, %970 : vector<8x32xf32>
    %972 = arith.addf %894, %971 : vector<8x32xf32>
    %973 = arith.truncf %972 : vector<8x32xf32> to vector<8x32xbf16>
    %c0_123 = arith.constant 0 : index
    %c0_124 = arith.constant 0 : index
    %974 = vector.load %arg6[%c0_123, %c0_124] : memref<32x128xbf16, #tpu.memory_space<vmem>>, vector<32x128xbf16>
    %cst_125 = arith.constant dense<0.000000e+00> : vector<8x128xf32>
    %975 = tpu.matmul %973, %974, %cst_125 {dimension_numbers = #tpu.dot_dimension_numbers<[1], [0], [0], [1], [0, 0, 1, 1], [], []>} : vector<8x32xbf16>, vector<32x128xbf16>, vector<8x128xf32> -> vector<8x128xf32>
    %976 = vector.broadcast %5 : vector<1x128xf32> to vector<8x128xf32>
    %977 = arith.addf %975, %976 : vector<8x128xf32>
    %978 = arith.truncf %977 : vector<8x128xf32> to vector<8x128xbf16>
    %979 = math.tanh %978 : vector<8x128xbf16>
    %980 = vector.extract_strided_slice %979 {offsets = [0, 0], sizes = [8, 32], strides = [1, 1]} : vector<8x128xbf16> to vector<8x32xbf16>
    %981 = vector.extract_strided_slice %7 {offsets = [0, 104], sizes = [8, 1], strides = [1, 1]} : vector<8x128xf32> to vector<8x1xf32>
    %982 = arith.extf %980 : vector<8x32xbf16> to vector<8x32xf32>
    %983 = vector.broadcast %981 : vector<8x1xf32> to vector<8x32xf32>
    %984 = arith.mulf %982, %983 : vector<8x32xf32>
    %985 = vector.extract_strided_slice %979 {offsets = [0, 32], sizes = [8, 32], strides = [1, 1]} : vector<8x128xbf16> to vector<8x32xbf16>
    %986 = vector.extract_strided_slice %7 {offsets = [0, 105], sizes = [8, 1], strides = [1, 1]} : vector<8x128xf32> to vector<8x1xf32>
    %987 = arith.extf %985 : vector<8x32xbf16> to vector<8x32xf32>
    %988 = vector.broadcast %986 : vector<8x1xf32> to vector<8x32xf32>
    %989 = arith.mulf %987, %988 : vector<8x32xf32>
    %990 = arith.addf %984, %989 : vector<8x32xf32>
    %991 = vector.extract_strided_slice %979 {offsets = [0, 64], sizes = [8, 32], strides = [1, 1]} : vector<8x128xbf16> to vector<8x32xbf16>
    %992 = vector.extract_strided_slice %7 {offsets = [0, 106], sizes = [8, 1], strides = [1, 1]} : vector<8x128xf32> to vector<8x1xf32>
    %993 = arith.extf %991 : vector<8x32xbf16> to vector<8x32xf32>
    %994 = vector.broadcast %992 : vector<8x1xf32> to vector<8x32xf32>
    %995 = arith.mulf %993, %994 : vector<8x32xf32>
    %996 = arith.addf %990, %995 : vector<8x32xf32>
    %997 = vector.extract_strided_slice %979 {offsets = [0, 96], sizes = [8, 32], strides = [1, 1]} : vector<8x128xbf16> to vector<8x32xbf16>
    %998 = vector.extract_strided_slice %7 {offsets = [0, 107], sizes = [8, 1], strides = [1, 1]} : vector<8x128xf32> to vector<8x1xf32>
    %999 = arith.extf %997 : vector<8x32xbf16> to vector<8x32xf32>
    %1000 = vector.broadcast %998 : vector<8x1xf32> to vector<8x32xf32>
    %1001 = arith.mulf %999, %1000 : vector<8x32xf32>
    %1002 = arith.addf %996, %1001 : vector<8x32xf32>
    %1003 = arith.subf %935, %968 : vector<8x32xf32>
    %1004 = arith.addf %1003, %1002 : vector<8x32xf32>
    %1005 = arith.addf %894, %1004 : vector<8x32xf32>
    %1006 = arith.truncf %1005 : vector<8x32xf32> to vector<8x32xbf16>
    %c0_126 = arith.constant 0 : index
    %c0_127 = arith.constant 0 : index
    %1007 = vector.load %arg6[%c0_126, %c0_127] : memref<32x128xbf16, #tpu.memory_space<vmem>>, vector<32x128xbf16>
    %cst_128 = arith.constant dense<0.000000e+00> : vector<8x128xf32>
    %1008 = tpu.matmul %1006, %1007, %cst_128 {dimension_numbers = #tpu.dot_dimension_numbers<[1], [0], [0], [1], [0, 0, 1, 1], [], []>} : vector<8x32xbf16>, vector<32x128xbf16>, vector<8x128xf32> -> vector<8x128xf32>
    %1009 = vector.broadcast %5 : vector<1x128xf32> to vector<8x128xf32>
    %1010 = arith.addf %1008, %1009 : vector<8x128xf32>
    %1011 = arith.truncf %1010 : vector<8x128xf32> to vector<8x128xbf16>
    %1012 = math.tanh %1011 : vector<8x128xbf16>
    %1013 = vector.extract_strided_slice %1012 {offsets = [0, 0], sizes = [8, 32], strides = [1, 1]} : vector<8x128xbf16> to vector<8x32xbf16>
    %1014 = vector.extract_strided_slice %7 {offsets = [0, 108], sizes = [8, 1], strides = [1, 1]} : vector<8x128xf32> to vector<8x1xf32>
    %1015 = arith.extf %1013 : vector<8x32xbf16> to vector<8x32xf32>
    %1016 = vector.broadcast %1014 : vector<8x1xf32> to vector<8x32xf32>
    %1017 = arith.mulf %1015, %1016 : vector<8x32xf32>
    %1018 = vector.extract_strided_slice %1012 {offsets = [0, 32], sizes = [8, 32], strides = [1, 1]} : vector<8x128xbf16> to vector<8x32xbf16>
    %1019 = vector.extract_strided_slice %7 {offsets = [0, 109], sizes = [8, 1], strides = [1, 1]} : vector<8x128xf32> to vector<8x1xf32>
    %1020 = arith.extf %1018 : vector<8x32xbf16> to vector<8x32xf32>
    %1021 = vector.broadcast %1019 : vector<8x1xf32> to vector<8x32xf32>
    %1022 = arith.mulf %1020, %1021 : vector<8x32xf32>
    %1023 = arith.addf %1017, %1022 : vector<8x32xf32>
    %1024 = vector.extract_strided_slice %1012 {offsets = [0, 64], sizes = [8, 32], strides = [1, 1]} : vector<8x128xbf16> to vector<8x32xbf16>
    %1025 = vector.extract_strided_slice %7 {offsets = [0, 110], sizes = [8, 1], strides = [1, 1]} : vector<8x128xf32> to vector<8x1xf32>
    %1026 = arith.extf %1024 : vector<8x32xbf16> to vector<8x32xf32>
    %1027 = vector.broadcast %1025 : vector<8x1xf32> to vector<8x32xf32>
    %1028 = arith.mulf %1026, %1027 : vector<8x32xf32>
    %1029 = arith.addf %1023, %1028 : vector<8x32xf32>
    %1030 = vector.extract_strided_slice %1012 {offsets = [0, 96], sizes = [8, 32], strides = [1, 1]} : vector<8x128xbf16> to vector<8x32xbf16>
    %1031 = vector.extract_strided_slice %7 {offsets = [0, 111], sizes = [8, 1], strides = [1, 1]} : vector<8x128xf32> to vector<8x1xf32>
    %1032 = arith.extf %1030 : vector<8x32xbf16> to vector<8x32xf32>
    %1033 = vector.broadcast %1031 : vector<8x1xf32> to vector<8x32xf32>
    %1034 = arith.mulf %1032, %1033 : vector<8x32xf32>
    %1035 = arith.addf %1029, %1034 : vector<8x32xf32>
    %1036 = arith.addf %968, %1002 : vector<8x32xf32>
    %cst_129 = arith.constant 3.000000e+00 : f32
    %1037 = vector.broadcast %cst_129 : f32 to vector<8x32xf32>
    %1038 = arith.mulf %1037, %1036 : vector<8x32xf32>
    %1039 = arith.addf %935, %1038 : vector<8x32xf32>
    %1040 = arith.addf %1039, %1035 : vector<8x32xf32>
    %cst_130 = arith.constant 1.250000e-01 : f32
    %1041 = vector.broadcast %cst_130 : f32 to vector<8x32xf32>
    %1042 = arith.mulf %1040, %1041 : vector<8x32xf32>
    %1043 = arith.addf %894, %1042 : vector<8x32xf32>
    %1044 = vector.broadcast %905 : i32 to vector<8x1xi32>
    %1045 = arith.cmpi eq, %3, %1044 : vector<8x1xi32>
    %1046 = arith.subf %1043, %894 : vector<8x32xf32>
    %1047 = vector.broadcast %4 : vector<8x1xf32> to vector<8x32xf32>
    %1048 = arith.mulf %1047, %1046 : vector<8x32xf32>
    %1049 = arith.addf %894, %1048 : vector<8x32xf32>
    %1050 = vector.shape_cast %1045 : vector<8x1xi1> to vector<8x1xi1>
    %1051 = vector.broadcast %1050 : vector<8x1xi1> to vector<8x32xi1>
    %1052 = arith.select %1051, %1049, %903 : vector<8x32xi1>, vector<8x32xf32>
    %c8_i32_131 = arith.constant 8 : i32
    %1053 = arith.muli %arg1, %c8_i32_131 : i32
    %c7_i32 = arith.constant 7 : i32
    %1054 = arith.addi %1053, %c7_i32 : i32
    %1055 = arith.truncf %1043 : vector<8x32xf32> to vector<8x32xbf16>
    %c0_132 = arith.constant 0 : index
    %c0_133 = arith.constant 0 : index
    %1056 = vector.load %arg6[%c0_132, %c0_133] : memref<32x128xbf16, #tpu.memory_space<vmem>>, vector<32x128xbf16>
    %cst_134 = arith.constant dense<0.000000e+00> : vector<8x128xf32>
    %1057 = tpu.matmul %1055, %1056, %cst_134 {dimension_numbers = #tpu.dot_dimension_numbers<[1], [0], [0], [1], [0, 0, 1, 1], [], []>} : vector<8x32xbf16>, vector<32x128xbf16>, vector<8x128xf32> -> vector<8x128xf32>
    %1058 = vector.broadcast %5 : vector<1x128xf32> to vector<8x128xf32>
    %1059 = arith.addf %1057, %1058 : vector<8x128xf32>
    %1060 = arith.truncf %1059 : vector<8x128xf32> to vector<8x128xbf16>
    %1061 = math.tanh %1060 : vector<8x128xbf16>
    %1062 = vector.extract_strided_slice %1061 {offsets = [0, 0], sizes = [8, 32], strides = [1, 1]} : vector<8x128xbf16> to vector<8x32xbf16>
    %1063 = vector.extract_strided_slice %7 {offsets = [0, 112], sizes = [8, 1], strides = [1, 1]} : vector<8x128xf32> to vector<8x1xf32>
    %1064 = arith.extf %1062 : vector<8x32xbf16> to vector<8x32xf32>
    %1065 = vector.broadcast %1063 : vector<8x1xf32> to vector<8x32xf32>
    %1066 = arith.mulf %1064, %1065 : vector<8x32xf32>
    %1067 = vector.extract_strided_slice %1061 {offsets = [0, 32], sizes = [8, 32], strides = [1, 1]} : vector<8x128xbf16> to vector<8x32xbf16>
    %1068 = vector.extract_strided_slice %7 {offsets = [0, 113], sizes = [8, 1], strides = [1, 1]} : vector<8x128xf32> to vector<8x1xf32>
    %1069 = arith.extf %1067 : vector<8x32xbf16> to vector<8x32xf32>
    %1070 = vector.broadcast %1068 : vector<8x1xf32> to vector<8x32xf32>
    %1071 = arith.mulf %1069, %1070 : vector<8x32xf32>
    %1072 = arith.addf %1066, %1071 : vector<8x32xf32>
    %1073 = vector.extract_strided_slice %1061 {offsets = [0, 64], sizes = [8, 32], strides = [1, 1]} : vector<8x128xbf16> to vector<8x32xbf16>
    %1074 = vector.extract_strided_slice %7 {offsets = [0, 114], sizes = [8, 1], strides = [1, 1]} : vector<8x128xf32> to vector<8x1xf32>
    %1075 = arith.extf %1073 : vector<8x32xbf16> to vector<8x32xf32>
    %1076 = vector.broadcast %1074 : vector<8x1xf32> to vector<8x32xf32>
    %1077 = arith.mulf %1075, %1076 : vector<8x32xf32>
    %1078 = arith.addf %1072, %1077 : vector<8x32xf32>
    %1079 = vector.extract_strided_slice %1061 {offsets = [0, 96], sizes = [8, 32], strides = [1, 1]} : vector<8x128xbf16> to vector<8x32xbf16>
    %1080 = vector.extract_strided_slice %7 {offsets = [0, 115], sizes = [8, 1], strides = [1, 1]} : vector<8x128xf32> to vector<8x1xf32>
    %1081 = arith.extf %1079 : vector<8x32xbf16> to vector<8x32xf32>
    %1082 = vector.broadcast %1080 : vector<8x1xf32> to vector<8x32xf32>
    %1083 = arith.mulf %1081, %1082 : vector<8x32xf32>
    %1084 = arith.addf %1078, %1083 : vector<8x32xf32>
    %cst_135 = arith.constant 0.333333343 : f32
    %1085 = vector.broadcast %cst_135 : f32 to vector<8x32xf32>
    %1086 = arith.mulf %1084, %1085 : vector<8x32xf32>
    %1087 = arith.addf %1043, %1086 : vector<8x32xf32>
    %1088 = arith.truncf %1087 : vector<8x32xf32> to vector<8x32xbf16>
    %c0_136 = arith.constant 0 : index
    %c0_137 = arith.constant 0 : index
    %1089 = vector.load %arg6[%c0_136, %c0_137] : memref<32x128xbf16, #tpu.memory_space<vmem>>, vector<32x128xbf16>
    %cst_138 = arith.constant dense<0.000000e+00> : vector<8x128xf32>
    %1090 = tpu.matmul %1088, %1089, %cst_138 {dimension_numbers = #tpu.dot_dimension_numbers<[1], [0], [0], [1], [0, 0, 1, 1], [], []>} : vector<8x32xbf16>, vector<32x128xbf16>, vector<8x128xf32> -> vector<8x128xf32>
    %1091 = vector.broadcast %5 : vector<1x128xf32> to vector<8x128xf32>
    %1092 = arith.addf %1090, %1091 : vector<8x128xf32>
    %1093 = arith.truncf %1092 : vector<8x128xf32> to vector<8x128xbf16>
    %1094 = math.tanh %1093 : vector<8x128xbf16>
    %1095 = vector.extract_strided_slice %1094 {offsets = [0, 0], sizes = [8, 32], strides = [1, 1]} : vector<8x128xbf16> to vector<8x32xbf16>
    %1096 = vector.extract_strided_slice %7 {offsets = [0, 116], sizes = [8, 1], strides = [1, 1]} : vector<8x128xf32> to vector<8x1xf32>
    %1097 = arith.extf %1095 : vector<8x32xbf16> to vector<8x32xf32>
    %1098 = vector.broadcast %1096 : vector<8x1xf32> to vector<8x32xf32>
    %1099 = arith.mulf %1097, %1098 : vector<8x32xf32>
    %1100 = vector.extract_strided_slice %1094 {offsets = [0, 32], sizes = [8, 32], strides = [1, 1]} : vector<8x128xbf16> to vector<8x32xbf16>
    %1101 = vector.extract_strided_slice %7 {offsets = [0, 117], sizes = [8, 1], strides = [1, 1]} : vector<8x128xf32> to vector<8x1xf32>
    %1102 = arith.extf %1100 : vector<8x32xbf16> to vector<8x32xf32>
    %1103 = vector.broadcast %1101 : vector<8x1xf32> to vector<8x32xf32>
    %1104 = arith.mulf %1102, %1103 : vector<8x32xf32>
    %1105 = arith.addf %1099, %1104 : vector<8x32xf32>
    %1106 = vector.extract_strided_slice %1094 {offsets = [0, 64], sizes = [8, 32], strides = [1, 1]} : vector<8x128xbf16> to vector<8x32xbf16>
    %1107 = vector.extract_strided_slice %7 {offsets = [0, 118], sizes = [8, 1], strides = [1, 1]} : vector<8x128xf32> to vector<8x1xf32>
    %1108 = arith.extf %1106 : vector<8x32xbf16> to vector<8x32xf32>
    %1109 = vector.broadcast %1107 : vector<8x1xf32> to vector<8x32xf32>
    %1110 = arith.mulf %1108, %1109 : vector<8x32xf32>
    %1111 = arith.addf %1105, %1110 : vector<8x32xf32>
    %1112 = vector.extract_strided_slice %1094 {offsets = [0, 96], sizes = [8, 32], strides = [1, 1]} : vector<8x128xbf16> to vector<8x32xbf16>
    %1113 = vector.extract_strided_slice %7 {offsets = [0, 119], sizes = [8, 1], strides = [1, 1]} : vector<8x128xf32> to vector<8x1xf32>
    %1114 = arith.extf %1112 : vector<8x32xbf16> to vector<8x32xf32>
    %1115 = vector.broadcast %1113 : vector<8x1xf32> to vector<8x32xf32>
    %1116 = arith.mulf %1114, %1115 : vector<8x32xf32>
    %1117 = arith.addf %1111, %1116 : vector<8x32xf32>
    %cst_139 = arith.constant 0.333333343 : f32
    %1118 = vector.broadcast %cst_139 : f32 to vector<8x32xf32>
    %1119 = arith.mulf %1084, %1118 : vector<8x32xf32>
    %1120 = arith.subf %1117, %1119 : vector<8x32xf32>
    %1121 = arith.addf %1043, %1120 : vector<8x32xf32>
    %1122 = arith.truncf %1121 : vector<8x32xf32> to vector<8x32xbf16>
    %c0_140 = arith.constant 0 : index
    %c0_141 = arith.constant 0 : index
    %1123 = vector.load %arg6[%c0_140, %c0_141] : memref<32x128xbf16, #tpu.memory_space<vmem>>, vector<32x128xbf16>
    %cst_142 = arith.constant dense<0.000000e+00> : vector<8x128xf32>
    %1124 = tpu.matmul %1122, %1123, %cst_142 {dimension_numbers = #tpu.dot_dimension_numbers<[1], [0], [0], [1], [0, 0, 1, 1], [], []>} : vector<8x32xbf16>, vector<32x128xbf16>, vector<8x128xf32> -> vector<8x128xf32>
    %1125 = vector.broadcast %5 : vector<1x128xf32> to vector<8x128xf32>
    %1126 = arith.addf %1124, %1125 : vector<8x128xf32>
    %1127 = arith.truncf %1126 : vector<8x128xf32> to vector<8x128xbf16>
    %1128 = math.tanh %1127 : vector<8x128xbf16>
    %1129 = vector.extract_strided_slice %1128 {offsets = [0, 0], sizes = [8, 32], strides = [1, 1]} : vector<8x128xbf16> to vector<8x32xbf16>
    %1130 = vector.extract_strided_slice %7 {offsets = [0, 120], sizes = [8, 1], strides = [1, 1]} : vector<8x128xf32> to vector<8x1xf32>
    %1131 = arith.extf %1129 : vector<8x32xbf16> to vector<8x32xf32>
    %1132 = vector.broadcast %1130 : vector<8x1xf32> to vector<8x32xf32>
    %1133 = arith.mulf %1131, %1132 : vector<8x32xf32>
    %1134 = vector.extract_strided_slice %1128 {offsets = [0, 32], sizes = [8, 32], strides = [1, 1]} : vector<8x128xbf16> to vector<8x32xbf16>
    %1135 = vector.extract_strided_slice %7 {offsets = [0, 121], sizes = [8, 1], strides = [1, 1]} : vector<8x128xf32> to vector<8x1xf32>
    %1136 = arith.extf %1134 : vector<8x32xbf16> to vector<8x32xf32>
    %1137 = vector.broadcast %1135 : vector<8x1xf32> to vector<8x32xf32>
    %1138 = arith.mulf %1136, %1137 : vector<8x32xf32>
    %1139 = arith.addf %1133, %1138 : vector<8x32xf32>
    %1140 = vector.extract_strided_slice %1128 {offsets = [0, 64], sizes = [8, 32], strides = [1, 1]} : vector<8x128xbf16> to vector<8x32xbf16>
    %1141 = vector.extract_strided_slice %7 {offsets = [0, 122], sizes = [8, 1], strides = [1, 1]} : vector<8x128xf32> to vector<8x1xf32>
    %1142 = arith.extf %1140 : vector<8x32xbf16> to vector<8x32xf32>
    %1143 = vector.broadcast %1141 : vector<8x1xf32> to vector<8x32xf32>
    %1144 = arith.mulf %1142, %1143 : vector<8x32xf32>
    %1145 = arith.addf %1139, %1144 : vector<8x32xf32>
    %1146 = vector.extract_strided_slice %1128 {offsets = [0, 96], sizes = [8, 32], strides = [1, 1]} : vector<8x128xbf16> to vector<8x32xbf16>
    %1147 = vector.extract_strided_slice %7 {offsets = [0, 123], sizes = [8, 1], strides = [1, 1]} : vector<8x128xf32> to vector<8x1xf32>
    %1148 = arith.extf %1146 : vector<8x32xbf16> to vector<8x32xf32>
    %1149 = vector.broadcast %1147 : vector<8x1xf32> to vector<8x32xf32>
    %1150 = arith.mulf %1148, %1149 : vector<8x32xf32>
    %1151 = arith.addf %1145, %1150 : vector<8x32xf32>
    %1152 = arith.subf %1084, %1117 : vector<8x32xf32>
    %1153 = arith.addf %1152, %1151 : vector<8x32xf32>
    %1154 = arith.addf %1043, %1153 : vector<8x32xf32>
    %1155 = arith.truncf %1154 : vector<8x32xf32> to vector<8x32xbf16>
    %c0_143 = arith.constant 0 : index
    %c0_144 = arith.constant 0 : index
    %1156 = vector.load %arg6[%c0_143, %c0_144] : memref<32x128xbf16, #tpu.memory_space<vmem>>, vector<32x128xbf16>
    %cst_145 = arith.constant dense<0.000000e+00> : vector<8x128xf32>
    %1157 = tpu.matmul %1155, %1156, %cst_145 {dimension_numbers = #tpu.dot_dimension_numbers<[1], [0], [0], [1], [0, 0, 1, 1], [], []>} : vector<8x32xbf16>, vector<32x128xbf16>, vector<8x128xf32> -> vector<8x128xf32>
    %1158 = vector.broadcast %5 : vector<1x128xf32> to vector<8x128xf32>
    %1159 = arith.addf %1157, %1158 : vector<8x128xf32>
    %1160 = arith.truncf %1159 : vector<8x128xf32> to vector<8x128xbf16>
    %1161 = math.tanh %1160 : vector<8x128xbf16>
    %1162 = vector.extract_strided_slice %1161 {offsets = [0, 0], sizes = [8, 32], strides = [1, 1]} : vector<8x128xbf16> to vector<8x32xbf16>
    %1163 = vector.extract_strided_slice %7 {offsets = [0, 124], sizes = [8, 1], strides = [1, 1]} : vector<8x128xf32> to vector<8x1xf32>
    %1164 = arith.extf %1162 : vector<8x32xbf16> to vector<8x32xf32>
    %1165 = vector.broadcast %1163 : vector<8x1xf32> to vector<8x32xf32>
    %1166 = arith.mulf %1164, %1165 : vector<8x32xf32>
    %1167 = vector.extract_strided_slice %1161 {offsets = [0, 32], sizes = [8, 32], strides = [1, 1]} : vector<8x128xbf16> to vector<8x32xbf16>
    %1168 = vector.extract_strided_slice %7 {offsets = [0, 125], sizes = [8, 1], strides = [1, 1]} : vector<8x128xf32> to vector<8x1xf32>
    %1169 = arith.extf %1167 : vector<8x32xbf16> to vector<8x32xf32>
    %1170 = vector.broadcast %1168 : vector<8x1xf32> to vector<8x32xf32>
    %1171 = arith.mulf %1169, %1170 : vector<8x32xf32>
    %1172 = arith.addf %1166, %1171 : vector<8x32xf32>
    %1173 = vector.extract_strided_slice %1161 {offsets = [0, 64], sizes = [8, 32], strides = [1, 1]} : vector<8x128xbf16> to vector<8x32xbf16>
    %1174 = vector.extract_strided_slice %7 {offsets = [0, 126], sizes = [8, 1], strides = [1, 1]} : vector<8x128xf32> to vector<8x1xf32>
    %1175 = arith.extf %1173 : vector<8x32xbf16> to vector<8x32xf32>
    %1176 = vector.broadcast %1174 : vector<8x1xf32> to vector<8x32xf32>
    %1177 = arith.mulf %1175, %1176 : vector<8x32xf32>
    %1178 = arith.addf %1172, %1177 : vector<8x32xf32>
    %1179 = vector.extract_strided_slice %1161 {offsets = [0, 96], sizes = [8, 32], strides = [1, 1]} : vector<8x128xbf16> to vector<8x32xbf16>
    %1180 = vector.extract_strided_slice %7 {offsets = [0, 127], sizes = [8, 1], strides = [1, 1]} : vector<8x128xf32> to vector<8x1xf32>
    %1181 = arith.extf %1179 : vector<8x32xbf16> to vector<8x32xf32>
    %1182 = vector.broadcast %1180 : vector<8x1xf32> to vector<8x32xf32>
    %1183 = arith.mulf %1181, %1182 : vector<8x32xf32>
    %1184 = arith.addf %1178, %1183 : vector<8x32xf32>
    %1185 = arith.addf %1117, %1151 : vector<8x32xf32>
    %cst_146 = arith.constant 3.000000e+00 : f32
    %1186 = vector.broadcast %cst_146 : f32 to vector<8x32xf32>
    %1187 = arith.mulf %1186, %1185 : vector<8x32xf32>
    %1188 = arith.addf %1084, %1187 : vector<8x32xf32>
    %1189 = arith.addf %1188, %1184 : vector<8x32xf32>
    %cst_147 = arith.constant 1.250000e-01 : f32
    %1190 = vector.broadcast %cst_147 : f32 to vector<8x32xf32>
    %1191 = arith.mulf %1189, %1190 : vector<8x32xf32>
    %1192 = arith.addf %1043, %1191 : vector<8x32xf32>
    %1193 = vector.broadcast %1054 : i32 to vector<8x1xi32>
    %1194 = arith.cmpi eq, %3, %1193 : vector<8x1xi32>
    %1195 = arith.subf %1192, %1043 : vector<8x32xf32>
    %1196 = vector.broadcast %4 : vector<8x1xf32> to vector<8x32xf32>
    %1197 = arith.mulf %1196, %1195 : vector<8x32xf32>
    %1198 = arith.addf %1043, %1197 : vector<8x32xf32>
    %1199 = vector.shape_cast %1194 : vector<8x1xi1> to vector<8x1xi1>
    %1200 = vector.broadcast %1199 : vector<8x1xi1> to vector<8x32xi1>
    %1201 = arith.select %1200, %1198, %1052 : vector<8x32xi1>, vector<8x32xf32>
    %c0_148 = arith.constant 0 : index
    %c0_149 = arith.constant 0 : index
    %1202 = vector.load %arg11[%c0_148, %c0_149] : memref<8x32xf32, #tpu.memory_space<vmem>>, vector<8x32xf32>
    tpu.vector_store %arg11[%c0_148, %c0_149], %1192 {strides = array<i32>} : memref<8x32xf32, #tpu.memory_space<vmem>>, vector<8x32xf32>,
    %c0_150 = arith.constant 0 : index
    %c0_151 = arith.constant 0 : index
    %1203 = vector.load %arg12[%c0_150, %c0_151] : memref<8x32xf32, #tpu.memory_space<vmem>>, vector<8x32xf32>
    tpu.vector_store %arg12[%c0_150, %c0_151], %1201 {strides = array<i32>} : memref<8x32xf32, #tpu.memory_space<vmem>>, vector<8x32xf32>,
    %c0_i32_152 = arith.constant 0 : i32
    %1204 = arith.cmpi eq, %arg1, %c0_i32_152 : i32
    %1205 = arith.extui %1204 : i1 to i32
    %c0_i32_153 = arith.constant 0 : i32
    %1206 = arith.cmpi ne, %1205, %c0_i32_153 : i32
    scf.if %1206 {
      %1207 = arith.truncf %1201 : vector<8x32xf32> to vector<8x32xbf16>
      %c0_154 = arith.constant 0 : index
      %c0_155 = arith.constant 0 : index
      %1208 = vector.load %arg8[%c0_154, %c0_155] : memref<32x128xbf16, #tpu.memory_space<vmem>>, vector<32x128xbf16>
      %cst_156 = arith.constant dense<0.000000e+00> : vector<8x128xf32>
      %1209 = tpu.matmul %1207, %1208, %cst_156 {dimension_numbers = #tpu.dot_dimension_numbers<[1], [0], [0], [1], [0, 0, 1, 1], [], []>} : vector<8x32xbf16>, vector<32x128xbf16>, vector<8x128xf32> -> vector<8x128xf32>
      %c0_157 = arith.constant 0 : index
      %c0_158 = arith.constant 0 : index
      %1210 = vector.load %arg9[%c0_157, %c0_158] : memref<1x128xf32, #tpu.memory_space<vmem>>, vector<1x128xf32>
      %1211 = vector.broadcast %1210 : vector<1x128xf32> to vector<8x128xf32>
      %1212 = arith.addf %1209, %1211 : vector<8x128xf32>
      %c0_159 = arith.constant 0 : index
      %c0_160 = arith.constant 0 : index
      %1213 = vector.load %arg10[%c0_159, %c0_160] : memref<8x128xf32, #tpu.memory_space<vmem>>, vector<8x128xf32>
      tpu.vector_store %arg10[%c0_159, %c0_160], %1212 {strides = array<i32>} : memref<8x128xf32, #tpu.memory_space<vmem>>, vector<8x128xf32>,
    } else {
    }
    return
  }
  func.func @transform_0(%arg0: i32, %arg1: i32) -> (i32, i32) {
    %c0_i32 = arith.constant 0 : i32
    %c0_i32_0 = arith.constant 0 : i32
    return %arg0, %c0_i32 : i32, i32
  }
  func.func @transform_1(%arg0: i32, %arg1: i32) -> (i32, i32, i32) {
    %c0_i32 = arith.constant 0 : i32
    %c0_i32_0 = arith.constant 0 : i32
    return %arg1, %arg0, %c0_i32 : i32, i32, i32
  }
  func.func @transform_2(%arg0: i32, %arg1: i32) -> (i32, i32) {
    %c0_i32 = arith.constant 0 : i32
    %c0_i32_0 = arith.constant 0 : i32
    return %arg0, %c0_i32 : i32, i32
  }
  func.func @transform_3(%arg0: i32, %arg1: i32) -> (i32, i32) {
    %c0_i32 = arith.constant 0 : i32
    %c0_i32_0 = arith.constant 0 : i32
    return %arg0, %c0_i32 : i32, i32
  }
  func.func @transform_4(%arg0: i32, %arg1: i32) -> (i32, i32) {
    %c0_i32 = arith.constant 0 : i32
    %c0_i32_0 = arith.constant 0 : i32
    %c0_i32_1 = arith.constant 0 : i32
    return %c0_i32, %c0_i32_0 : i32, i32
  }
  func.func @transform_5(%arg0: i32, %arg1: i32) -> (i32, i32) {
    %c0_i32 = arith.constant 0 : i32
    %c0_i32_0 = arith.constant 0 : i32
    %c0_i32_1 = arith.constant 0 : i32
    return %c0_i32, %c0_i32_0 : i32, i32
  }
  func.func @transform_6(%arg0: i32, %arg1: i32) -> (i32, i32) {
    %c0_i32 = arith.constant 0 : i32
    %c0_i32_0 = arith.constant 0 : i32
    %c0_i32_1 = arith.constant 0 : i32
    return %c0_i32, %c0_i32_0 : i32, i32
  }
  func.func @transform_7(%arg0: i32, %arg1: i32) -> (i32, i32) {
    %c0_i32 = arith.constant 0 : i32
    %c0_i32_0 = arith.constant 0 : i32
    %c0_i32_1 = arith.constant 0 : i32
    return %c0_i32, %c0_i32_0 : i32, i32
  }
  func.func @transform_8(%arg0: i32, %arg1: i32) -> (i32, i32) {
    %c0_i32 = arith.constant 0 : i32
    %c0_i32_0 = arith.constant 0 : i32
    return %arg0, %c0_i32 : i32, i32
  }
}

</mosaic_0001>

<bundles_post_ra>
// kernel: tpu_custom_call.1
= control target key start
LH: loop header
LB: loop body
LE: loop exit
PB: predicated region body
PF: predicated region fallthrough
CT: control target
= control target key end

     0   :  { %13 = vsyncpa [#allocation5], 0  ;;  %s3480_s0 = inlined_call_operand.hbm [shape: f32[8,32], index: 0, kind: input, shape index: {}]   ;;  %s3481_s1 = inlined_call_operand.hbm [shape: f32[1,8,128], index: 1, kind: input, shape index: {}]   ;;  %s3482_s2 = inlined_call_operand.vmem [shape: s32[8,1], index: 2, kind: input, shape index: {}]   ;;  %s3483_s3 = inlined_call_operand.vmem [shape: f32[8,1], index: 3, kind: input, shape index: {}]   ;;  %s3484_s4 = inlined_call_operand.vmem [shape: bf16[32,128], index: 4, kind: input, shape index: {}]   ;;  %s3485_s5 = inlined_call_operand.vmem [shape: f32[1,128], index: 5, kind: input, shape index: {}]   ;;  %s3486_s6 = inlined_call_operand.hbm [shape: bf16[32,128], index: 6, kind: input, shape index: {}]   ;;  %s3487_s7 = inlined_call_operand.vmem [shape: f32[1,128], index: 7, kind: input, shape index: {}]   ;;  %s3488_s8 = inlined_call_operand.hbm [shape: f32[8,128], index: 8, kind: output, shape index: {}]  }
   0x1   :  { %14 = vsyncpa [#allocation8], 0  ;;  %s32_s29 = sshll.u32 %s3481_s1, 4  ;;  %s33_s29 = int_to_ptr.hbm [resolvable:$true] %s32_s29 }
   0x2   :  { %15 = vsyncpa [#allocation6], 0  ;;  %s2697_s30 = smov [#allocation7]   ;;  %s21_s12 = sshll.u32 %s3480_s0, 4  ;;  %s22_s12 = int_to_ptr.hbm [resolvable:$true] %s21_s12 }
   0x3   :  { %s34_s9 = sshll.u32 %s2697_s30, 4  ;;  %s2698_s13 = smov [#allocation4]   ;;  %s35_s9 = int_to_ptr.vmem [resolvable:$true] %s34_s9 }
   0x4   :  { %37 = dma.hbm_to_vmem [thread:$0]  %s33_s29, 128, %s35_s9, [#allocation8]  }
   0x5   :  { %s23_s14 = sshll.u32 %s2698_s13, 4  ;;  %s50_s17 = sshll.u32 %s3486_s6, 4  ;;  %s24_s14 = int_to_ptr.vmem [resolvable:$true] %s23_s14  ;;  %s51_s17 = int_to_ptr.hbm [resolvable:$true] %s50_s17 }
   0x6   :  { %26 = dma.hbm_to_vmem [thread:$0]  %s22_s12, 128, %s24_s14, [#allocation5]  }
   0x7   :  { %s2699_s1 = smov [#allocation9]   ;;  %s2700_s19 = smov 64  }
   0x8   :  { %s52_s18 = sshll.u32 %s2699_s1, 4  ;;  %s2701_s20 = smov 4   ;;  %s53_s18 = int_to_ptr.vmem [resolvable:$true] %s52_s18 }
   0x9   :  { %58 = dma.hbm_to_vmem [thread:$0]  %s51_s17, 256, %s53_s18, [#allocation8], %s2700_s19, %s2700_s19, %s2701_s20  }
   0xa   :  { %2691 = dma.done.wait [#allocation5], 128  }
   0xb   :  { %2692 = vsyncadd [#allocation5], 4294967168 }
   0xc   :  { %2693 = dma.done.wait [#allocation8], 384  }
   0xd   :  { %2694 = vsyncadd [#allocation8], 4294966912  ;;  %v2702_v0 = vmov 3   ;;  %v2703_v1 = vmov 1   ;;  %vm79_vm0 = vcmask 261120   ;;  %v2889_v2 = vld [vmem:[#allocation7] sm:$0xff] }
   0xe   :  { %2391 = vset.pattern.permute.xlu1 %v2702_v0  ;;  %2389 = vset.pattern.permute.xlu0 %v2703_v1  ;;  %v2894_v3 = vld [vmem:[%s3484_s4 + $0x8] sm:$0xff]  ;;  %v78_v4 = vld [vmem:[#allocation4] sm:$0xff]  ;;  %v2902_v5 = vld [vmem:[%s3484_s4] sm:$0xff]  ;;  %v2704_v7 = vmov 0   ;;  %v2705_v8 = vmov 2   ;;  %s2706_s25 = smov 32  }
   0xf   :  { %159 = vperm.xlu1 %2391, %v2889_v2   ;;  %139 = vperm.xlu0 %2389, %v2889_v2   ;;  %80 = vst.msk [vmem:[#allocation2] sm:$0xff] %vm79_vm0, %v78_v4  ;;  %v2933_v10 = vld [vmem:[%s3485_s5] ss:$0 sm:$0xff]  ;;  %s2707_s26 = smov 96   ;;  %v2708_v25 = vmov 7   ;;  %v2709_v26 = vmov 6  }
  0x10   :  { %120 = vmatpush.bf16.msra.mxu0 %v2894_v3  ;;  %180 = vmatpush.bf16.msra.mxu1 %v2894_v3  ;;  %v2710_v27 = vmov 5   ;;  %v2711_v29 = vmov 4   ;;  %v2712_v54 = vmov 9   ;;  %v2713_v55 = vmov 11   ;;  %s2832_s18 = smov [#allocation10]   ;;  %s2189_s6 = sshll.u32 %s3488_s8, 4  ;;  %s2190_s6 = int_to_ptr.hbm [resolvable:$true] %s2189_s6 }
  0x11   :  { %239 = vmatpush.bf16.msra.mxu2 %v2894_v3  ;;  %299 = vmatpush.bf16.msra.mxu3 %v2894_v3  ;;  %v2714_v56 = vmov 10   ;;  %v2715_v57 = vmov 8  }
  0x12   :  { %2393 = vset.pattern.permute.xlu2 %v2710_v27  ;;  %v2718_v27 = vmov 15  }
  0x14   :  { %121 = vmatpush.bf16.msra.mxu0 %v2902_v5  ;;  %181 = vmatpush.bf16.msra.mxu1 %v2902_v5 }
  0x15   :  { %240 = vmatpush.bf16.msra.mxu2 %v2902_v5  ;;  %300 = vmatpush.bf16.msra.mxu3 %v2902_v5 }
  0x16   :  { %v2914_v6 = vld [vmem:[#allocation2] sm:$0xff] }
  0x17   :  { %2392 = vset.pattern.permute.xlu1 %v2704_v7  ;;  %2390 = vset.pattern.permute.xlu0 %v2705_v8  ;;  %v90_v9 = vpack.c.bf16 %v2914_v6, %v2914_v6 }
  0x18   :  { %379 = vmatpush.bf16.msrb.mxu0 %v2894_v3  ;;  %438 = vmatpush.bf16.msrb.mxu1 %v2894_v3 }
  0x19   :  { %134 = vperm.xlu1 %2392, %v2889_v2   ;;  %149 = vperm.xlu0 %2390, %v2889_v2  }
  0x1a   :  { %497 = vmatpush.bf16.msrb.mxu2 %v2894_v3  ;;  %557 = vmatpush.bf16.msrb.mxu3 %v2894_v3 }
  0x1b   :  { %2208 = vmatmul.msk.bf16.vlgmr.msra.gmra.mxu0 %vm79_vm0, %v90_v9 }
  0x1c   :  { %439 = vmatpush.bf16.msrb.mxu1 %v2902_v5  ;;  %380 = vmatpush.bf16.msrb.mxu0 %v2902_v5 }
  0x1e   :  { %498 = vmatpush.bf16.msrb.mxu2 %v2902_v5  ;;  %558 = vmatpush.bf16.msrb.mxu3 %v2902_v5 }
  0x20   :  { %632 = vmatpush.bf16.msra.mxu0 %v2894_v3 }
  0x21   :  { %2395 = vset.pattern.permute.xlu1 %v2708_v25  ;;  %2394 = vset.pattern.permute.xlu0 %v2709_v26  ;;  %v2716_v25 = vmov 14   ;;  %v2717_v26 = vmov 13  }
  0x22   :  { %208 = vperm.xlu0 %2394, %v2889_v2  }
  0x24   :  { %633 = vmatpush.bf16.msra.mxu0 %v2902_v5 }
  0x2a   :  { %2399 = vset.pattern.permute.xlu0 %v2713_v55 }
  0x81   :  { %v140_v17 = vpop.permute.xlu0 %139  ;;  %v160_v20 = vpop.permute.xlu1 %159 }
  0x8b   :  { %v150_v23 = vpop.permute.xlu0 %149  ;;  %v135_v30 = vpop.permute.xlu1 %134 }
  0x94   :  { %v209_v47 = vpop.permute.xlu0 %208 }
  0x98   :  { %v123_v11 = vpop.f32.mrf.mxu0 }
  0x99   :  { %v124_v12 = vadd.f32 %v2933_v10, %v123_v11 }
  0x9b   :  { %v127_v13 = vpack.c.bf16 %v124_v12, %v124_v12 }
  0x9d   :  { %v128_v14 = vunpack.c.l.bf16 %v127_v13 }
  0x9f   :  { %2522 = vtanh.f32 %v128_v14 }
  0xa0   :  { %v125_v15 = vpop.f32.mrf.mxu0 }
  0xa5   :  { %v2523_v16 = vpop.eup %2522 }
  0xa6   :  { %v130_v18 = vpack.c.bf16 %v2523_v16, %v2523_v16 }
  0xa8   :  { %v131_v19 = vunpack.c.l.bf16 %v130_v18 }
  0xaa   :  { %v162_v21 = vmul.f32 %v160_v20, %v131_v19  ;;  %v142_v22 = vmul.f32 %v140_v17, %v131_v19  ;;  %v152_v24 = vmul.f32 %v150_v23, %v131_v19  ;;  %v137_v31 = vmul.f32 %v135_v30, %v131_v19 }
  0xac   :  { %164 = vrot.lane.b32.xlu1 %v162_v21, %s2706_s25  ;;  %144 = vrot.lane.b32.xlu2 %v142_v22, %s2707_s26 }
  0xb4   :  { %154 = vrot.lane.b32.xlu2 %v152_v24, %s2700_s19  ;;  %218 = vperm.xlu1 %2395, %v2889_v2  }
  0xbc   :  { %198 = vperm.xlu2 %2393, %v2889_v2   ;;  %2397 = vset.pattern.permute.xlu1 %v2712_v54 }
  0xc4   :  { %2396 = vset.pattern.permute.xlu2 %v2711_v29 }
  0xc5   :  { %193 = vperm.xlu2 %2396, %v2889_v2  }
  0xcd   :  { %2398 = vset.pattern.permute.xlu2 %v2714_v56  ;;  %v2720_v56 = vmov 18  }
 0x106   :  { %v145_v28 = vpop.permute.xlu2 %144 }
 0x107   :  { %v147_v33 = vadd.f32 %v145_v28, %v137_v31  ;;  %v2719_v28 = vmov 12  }
 0x10e   :  { %v155_v32 = vpop.permute.xlu2 %154 }
 0x10f   :  { %v157_v34 = vadd.f32 %v155_v32, %v147_v33 }
 0x116   :  { %v199_v50 = vpop.permute.xlu2 %198 }
 0x11e   :  { %v165_v35 = vpop.permute.xlu1 %164 }
 0x11f   :  { %v2943_v36 = vadd.f32 %v165_v35, %v157_v34  ;;  %v194_v58 = vpop.permute.xlu2 %193 }
 0x121   :  { %v168_v37 = vmul.f32 0.33333334, %v2943_v36 }
 0x123   :  { %v169_v38 = vadd.f32 %v168_v37, %v2914_v6 }
 0x125   :  { %v170_v39 = vpack.c.bf16 %v169_v38, %v169_v38 }
 0x126   :  { %v219_v48 = vpop.permute.xlu1 %218 }
 0x127   :  { %2209 = vmatmul.msk.bf16.vlgmr.msra.gmra.mxu1 %vm79_vm0, %v170_v39 }
 0x128   :  { %691 = vmatpush.bf16.msra.mxu1 %v2894_v3 }
 0x12c   :  { %692 = vmatpush.bf16.msra.mxu1 %v2902_v5 }
 0x1a4   :  { %v183_v40 = vpop.f32.mrf.mxu1 }
 0x1a5   :  { %v184_v41 = vadd.f32 %v2933_v10, %v183_v40 }
 0x1a7   :  { %v187_v42 = vpack.c.bf16 %v184_v41, %v184_v41 }
 0x1a9   :  { %v188_v43 = vunpack.c.l.bf16 %v187_v42 }
 0x1ab   :  { %2524 = vtanh.f32 %v188_v43 }
 0x1ac   :  { %v185_v44 = vpop.f32.mrf.mxu1 }
 0x1b1   :  { %v2525_v45 = vpop.eup %2524 }
 0x1b2   :  { %v190_v46 = vpack.c.bf16 %v2525_v45, %v2525_v45 }
 0x1b4   :  { %v191_v49 = vunpack.c.l.bf16 %v190_v46 }
 0x1b6   :  { %v201_v51 = vmul.f32 %v199_v50, %v191_v49  ;;  %v221_v52 = vmul.f32 %v219_v48, %v191_v49  ;;  %v211_v53 = vmul.f32 %v209_v47, %v191_v49  ;;  %v196_v59 = vmul.f32 %v194_v58, %v191_v49 }
 0x1b7   :  { %v2722_v58 = vmov 17  }
 0x1b8   :  { %223 = vrot.lane.b32.xlu0 %v221_v52, %s2706_s25  ;;  %213 = vrot.lane.b32.xlu2 %v211_v53, %s2700_s19 }
 0x1b9   :  { %203 = vrot.lane.b32.xlu1 %v201_v51, %s2707_s26 }
 0x1c0   :  { %277 = vperm.xlu0 %2399, %v2889_v2   ;;  %267 = vperm.xlu2 %2398, %v2889_v2  }
 0x1c1   :  { %257 = vperm.xlu1 %2397, %v2889_v2  }
 0x1c8   :  { %2401 = vset.pattern.permute.xlu0 %v2717_v26  ;;  %2403 = vset.pattern.permute.xlu2 %v2718_v27 }
 0x1c9   :  { %2400 = vset.pattern.permute.xlu1 %v2715_v57  ;;  %317 = vperm.xlu0 %2401, %v2889_v2   ;;  %v2721_v57 = vmov 19  }
 0x1ca   :  { %252 = vperm.xlu1 %2400, %v2889_v2  }
 0x1d1   :  { %2406 = vset.pattern.permute.xlu0 %v2720_v56 }
 0x1d2   :  { %2402 = vset.pattern.permute.xlu1 %v2716_v25 }
 0x212   :  { %v214_v62 = vpop.permute.xlu2 %213 }
 0x21a   :  { %v268_v18 = vpop.permute.xlu2 %267 }
 0x22a   :  { %v224_v0 = vpop.permute.xlu0 %223 }
 0x22b   :  { %v204_v60 = vpop.permute.xlu1 %203 }
 0x22c   :  { %v206_v61 = vadd.f32 %v204_v60, %v196_v59  ;;  %v2723_v59 = vmov 16  }
 0x22e   :  { %v216_v63 = vadd.f32 %v214_v62, %v206_v61 }
 0x230   :  { %v2958_v1 = vadd.f32 %v224_v0, %v216_v63 }
 0x232   :  { %v227_v4 = vsub.f32 %v2958_v1, %v168_v37  ;;  %v278_v23 = vpop.permute.xlu0 %277  ;;  %v286_v37 = vsub.f32 %v2943_v36, %v2958_v1 }
 0x233   :  { %v258_v20 = vpop.permute.xlu1 %257 }
 0x234   :  { %v228_v8 = vadd.f32 %v227_v4, %v2914_v6 }
 0x236   :  { %v229_v9 = vpack.c.bf16 %v228_v8, %v228_v8 }
 0x238   :  { %2210 = vmatmul.msk.bf16.vlgmr.msra.gmra.mxu2 %vm79_vm0, %v229_v9 }
 0x239   :  { %750 = vmatpush.bf16.msra.mxu2 %v2894_v3 }
 0x23b   :  { %v318_v49 = vpop.permute.xlu0 %317 }
 0x23c   :  { %v253_v29 = vpop.permute.xlu1 %252 }
 0x23d   :  { %751 = vmatpush.bf16.msra.mxu2 %v2902_v5 }
 0x2bb   :  { %v242_v11 = vpop.f32.mrf.mxu2 }
 0x2bc   :  { %v243_v12 = vadd.f32 %v2933_v10, %v242_v11 }
 0x2be   :  { %v246_v13 = vpack.c.bf16 %v243_v12, %v243_v12 }
 0x2c0   :  { %v247_v14 = vunpack.c.l.bf16 %v246_v13 }
 0x2c2   :  { %2526 = vtanh.f32 %v247_v14 }
 0x2c3   :  { %v244_v15 = vpop.f32.mrf.mxu2 }
 0x2c8   :  { %v2527_v16 = vpop.eup %2526 }
 0x2c9   :  { %v249_v17 = vpack.c.bf16 %v2527_v16, %v2527_v16 }
 0x2cb   :  { %v250_v19 = vunpack.c.l.bf16 %v249_v17 }
 0x2cd   :  { %v260_v21 = vmul.f32 %v258_v20, %v250_v19  ;;  %v270_v22 = vmul.f32 %v268_v18, %v250_v19  ;;  %v280_v24 = vmul.f32 %v278_v23, %v250_v19  ;;  %v255_v31 = vmul.f32 %v253_v29, %v250_v19 }
 0x2ce   :  { %v2724_v29 = vmov 21  }
 0x2cf   :  { %272 = vrot.lane.b32.xlu1 %v270_v22, %s2700_s19  ;;  %262 = vrot.lane.b32.xlu2 %v260_v21, %s2707_s26 }
 0x2d7   :  { %282 = vrot.lane.b32.xlu2 %v280_v24, %s2706_s25  ;;  %327 = vperm.xlu1 %2402, %v2889_v2  }
 0x2df   :  { %337 = vperm.xlu2 %2403, %v2889_v2   ;;  %2404 = vset.pattern.permute.xlu1 %v2719_v28 }
 0x2e0   :  { %312 = vperm.xlu1 %2404, %v2889_v2  }
 0x2e7   :  { %2405 = vset.pattern.permute.xlu2 %v2722_v58 }
 0x2e8   :  { %2407 = vset.pattern.permute.xlu1 %v2721_v57 }
 0x329   :  { %v263_v30 = vpop.permute.xlu2 %262 }
 0x32a   :  { %v265_v32 = vadd.f32 %v263_v30, %v255_v31  ;;  %v2725_v30 = vmov 23   ;;  %v2726_v31 = vmov 22  }
 0x331   :  { %v283_v35 = vpop.permute.xlu2 %282 }
 0x339   :  { %v338_v50 = vpop.permute.xlu2 %337 }
 0x341   :  { %v273_v33 = vpop.permute.xlu1 %272 }
 0x342   :  { %v275_v34 = vadd.f32 %v273_v33, %v265_v32  ;;  %v2727_v32 = vmov 20  }
 0x344   :  { %v285_v38 = vadd.f32 %v283_v35, %v275_v34 }
 0x346   :  { %v287_v39 = vadd.f32 %v286_v37, %v285_v38  ;;  %v346_v61 = vadd.f32 %v285_v38, %v2958_v1 }
 0x348   :  { %v288_v40 = vadd.f32 %v287_v39, %v2914_v6  ;;  %v347_v0 = vmul.f32 3.0, %v346_v61  ;;  %v2730_v61 = vmov 27  }
 0x349   :  { %v328_v52 = vpop.permute.xlu1 %327 }
 0x34a   :  { %v289_v41 = vpack.c.bf16 %v288_v40, %v288_v40  ;;  %v348_v12 = vadd.f32 %v347_v0, %v2943_v36 }
 0x34c   :  { %2211 = vmatmul.msk.bf16.vlgmr.msra.gmra.mxu3 %vm79_vm0, %v289_v41 }
 0x34d   :  { %810 = vmatpush.bf16.msra.mxu3 %v2894_v3 }
 0x351   :  { %811 = vmatpush.bf16.msra.mxu3 %v2902_v5 }
 0x352   :  { %v313_v60 = vpop.permute.xlu1 %312 }
 0x3cf   :  { %v302_v42 = vpop.f32.mrf.mxu3 }
 0x3d0   :  { %v303_v43 = vadd.f32 %v2933_v10, %v302_v42 }
 0x3d2   :  { %v306_v44 = vpack.c.bf16 %v303_v43, %v303_v43 }
 0x3d4   :  { %v307_v45 = vunpack.c.l.bf16 %v306_v44 }
 0x3d6   :  { %2528 = vtanh.f32 %v307_v45 }
 0x3d7   :  { %v304_v46 = vpop.f32.mrf.mxu3 }
 0x3dc   :  { %v2529_v47 = vpop.eup %2528 }
 0x3dd   :  { %v309_v48 = vpack.c.bf16 %v2529_v47, %v2529_v47 }
 0x3df   :  { %v310_v51 = vunpack.c.l.bf16 %v309_v48 }
 0x3e1   :  { %v320_v53 = vmul.f32 %v318_v49, %v310_v51  ;;  %v340_v54 = vmul.f32 %v338_v50, %v310_v51  ;;  %v330_v55 = vmul.f32 %v328_v52, %v310_v51  ;;  %v315_v63 = vmul.f32 %v313_v60, %v310_v51 }
 0x3e2   :  { %v2729_v60 = vmov 25  }
 0x3e3   :  { %342 = vrot.lane.b32.xlu1 %v340_v54, %s2706_s25  ;;  %332 = vrot.lane.b32.xlu0 %v330_v55, %s2700_s19 }
 0x3e4   :  { %322 = vrot.lane.b32.xlu2 %v320_v53, %s2707_s26 }
 0x3eb   :  { %417 = vperm.xlu1 %2407, %v2889_v2   ;;  %407 = vperm.xlu0 %2406, %v2889_v2  }
 0x3ec   :  { %397 = vperm.xlu2 %2405, %v2889_v2  }
 0x3f3   :  { %2409 = vset.pattern.permute.xlu1 %v2724_v29  ;;  %2411 = vset.pattern.permute.xlu0 %v2725_v30  ;;  %v2732_v29 = vmov 30   ;;  %v2733_v30 = vmov 31  }
 0x3f4   :  { %2408 = vset.pattern.permute.xlu2 %v2723_v59  ;;  %v2728_v59 = vmov 26  }
 0x3f5   :  { %392 = vperm.xlu2 %2408, %v2889_v2  }
 0x3fd   :  { %2410 = vset.pattern.permute.xlu2 %v2726_v31  ;;  %v2734_v31 = vmov 29  }
 0x43e   :  { %v323_v62 = vpop.permute.xlu2 %322 }
 0x43f   :  { %v325_v4 = vadd.f32 %v323_v62, %v315_v63  ;;  %v2731_v62 = vmov 24  }
 0x446   :  { %v398_v25 = vpop.permute.xlu2 %397 }
 0x44f   :  { %v393_v33 = vpop.permute.xlu2 %392 }
 0x455   :  { %v333_v8 = vpop.permute.xlu0 %332  ;;  %v343_v11 = vpop.permute.xlu1 %342 }
 0x456   :  { %v335_v9 = vadd.f32 %v333_v8, %v325_v4 }
 0x458   :  { %v345_v13 = vadd.f32 %v343_v11, %v335_v9 }
 0x45a   :  { %v349_v14 = vadd.f32 %v348_v12, %v345_v13 }
 0x45c   :  { %v350_v15 = vmul.f32 0.125, %v349_v14 }
 0x45d   :  { %v408_v23 = vpop.permute.xlu0 %407 }
 0x45e   :  { %v2990_v16 = vadd.f32 %v350_v15, %v2914_v6  ;;  %v418_v6 = vpop.permute.xlu1 %417 }
 0x460   :  { %v369_v17 = vpack.c.bf16 %v2990_v16, %v2990_v16 }
 0x462   :  { %2212 = vmatmul.msk.bf16.vlgmr.msrb.gmra.mxu0 %vm79_vm0, %v369_v17 }
 0x463   :  { %885 = vmatpush.bf16.msrb.mxu0 %v2894_v3 }
 0x467   :  { %886 = vmatpush.bf16.msrb.mxu0 %v2902_v5 }
 0x4df   :  { %v382_v1 = vpop.f32.mrf.mxu0 }
 0x4e0   :  { %v383_v18 = vadd.f32 %v2933_v10, %v382_v1 }
 0x4e2   :  { %v386_v19 = vpack.c.bf16 %v383_v18, %v383_v18 }
 0x4e4   :  { %v387_v36 = vunpack.c.l.bf16 %v386_v19 }
 0x4e6   :  { %2530 = vtanh.f32 %v387_v36 }
 0x4e7   :  { %v384_v20 = vpop.f32.mrf.mxu0 }
 0x4ec   :  { %v2531_v21 = vpop.eup %2530 }
 0x4ed   :  { %v389_v22 = vpack.c.bf16 %v2531_v21, %v2531_v21 }
 0x4ef   :  { %v390_v24 = vunpack.c.l.bf16 %v389_v22 }
 0x4f1   :  { %v400_v26 = vmul.f32 %v398_v25, %v390_v24  ;;  %v420_v27 = vmul.f32 %v418_v6, %v390_v24  ;;  %v410_v28 = vmul.f32 %v408_v23, %v390_v24  ;;  %v395_v34 = vmul.f32 %v393_v33, %v390_v24 }
 0x4f3   :  { %422 = vrot.lane.b32.xlu0 %v420_v27, %s2706_s25  ;;  %412 = vrot.lane.b32.xlu2 %v410_v28, %s2700_s19 }
 0x4f4   :  { %402 = vrot.lane.b32.xlu1 %v400_v26, %s2707_s26 }
 0x4fb   :  { %476 = vperm.xlu0 %2411, %v2889_v2   ;;  %466 = vperm.xlu2 %2410, %v2889_v2  }
 0x4fc   :  { %456 = vperm.xlu1 %2409, %v2889_v2  }
 0x503   :  { %2413 = vset.pattern.permute.xlu0 %v2729_v60  ;;  %2415 = vset.pattern.permute.xlu2 %v2730_v61  ;;  %v2736_v61 = vmov 33  }
 0x504   :  { %2412 = vset.pattern.permute.xlu1 %v2727_v32  ;;  %515 = vperm.xlu0 %2413, %v2889_v2   ;;  %v2735_v32 = vmov 28  }
 0x505   :  { %451 = vperm.xlu1 %2412, %v2889_v2  }
 0x50c   :  { %2418 = vset.pattern.permute.xlu0 %v2732_v29 }
 0x50d   :  { %2414 = vset.pattern.permute.xlu1 %v2728_v59 }
 0x54d   :  { %v413_v38 = vpop.permute.xlu2 %412 }
 0x555   :  { %v467_v52 = vpop.permute.xlu2 %466 }
 0x565   :  { %v423_v40 = vpop.permute.xlu0 %422 }
 0x566   :  { %v403_v35 = vpop.permute.xlu1 %402 }
 0x567   :  { %v405_v37 = vadd.f32 %v403_v35, %v395_v34 }
 0x569   :  { %v415_v39 = vadd.f32 %v413_v38, %v405_v37 }
 0x56b   :  { %v3005_v41 = vadd.f32 %v423_v40, %v415_v39 }
 0x56d   :  { %v426_v42 = vmul.f32 0.33333334, %v3005_v41  ;;  %v477_v57 = vpop.permute.xlu0 %476 }
 0x56e   :  { %v457_v54 = vpop.permute.xlu1 %456 }
 0x56f   :  { %v427_v43 = vadd.f32 %v426_v42, %v2990_v16 }
 0x571   :  { %v428_v44 = vpack.c.bf16 %v427_v43, %v427_v43 }
 0x573   :  { %2213 = vmatmul.msk.bf16.vlgmr.msrb.gmra.mxu1 %vm79_vm0, %v428_v44 }
 0x574   :  { %944 = vmatpush.bf16.msrb.mxu1 %v2894_v3 }
 0x576   :  { %v516_v6 = vpop.permute.xlu0 %515 }
 0x577   :  { %v452_v63 = vpop.permute.xlu1 %451 }
 0x578   :  { %945 = vmatpush.bf16.msrb.mxu1 %v2902_v5 }
 0x5f0   :  { %v441_v45 = vpop.f32.mrf.mxu1 }
 0x5f1   :  { %v442_v46 = vadd.f32 %v2933_v10, %v441_v45 }
 0x5f3   :  { %v445_v47 = vpack.c.bf16 %v442_v46, %v442_v46 }
 0x5f5   :  { %v446_v48 = vunpack.c.l.bf16 %v445_v47 }
 0x5f7   :  { %2532 = vtanh.f32 %v446_v48 }
 0x5f8   :  { %v443_v49 = vpop.f32.mrf.mxu1 }
 0x5fd   :  { %v2533_v50 = vpop.eup %2532 }
 0x5fe   :  { %v448_v51 = vpack.c.bf16 %v2533_v50, %v2533_v50 }
 0x600   :  { %v449_v53 = vunpack.c.l.bf16 %v448_v51 }
 0x602   :  { %v459_v55 = vmul.f32 %v457_v54, %v449_v53  ;;  %v469_v56 = vmul.f32 %v467_v52, %v449_v53  ;;  %v479_v58 = vmul.f32 %v477_v57, %v449_v53  ;;  %v454_v4 = vmul.f32 %v452_v63, %v449_v53 }
 0x603   :  { %v2738_v63 = vmov 34  }
 0x604   :  { %471 = vrot.lane.b32.xlu1 %v469_v56, %s2700_s19  ;;  %461 = vrot.lane.b32.xlu2 %v459_v55, %s2707_s26 }
 0x60c   :  { %481 = vrot.lane.b32.xlu2 %v479_v58, %s2706_s25  ;;  %525 = vperm.xlu1 %2414, %v2889_v2  }
 0x614   :  { %535 = vperm.xlu2 %2415, %v2889_v2   ;;  %2416 = vset.pattern.permute.xlu1 %v2731_v62  ;;  %v2737_v62 = vmov 35  }
 0x615   :  { %510 = vperm.xlu1 %2416, %v2889_v2  }
 0x61c   :  { %2417 = vset.pattern.permute.xlu2 %v2734_v31 }
 0x61d   :  { %2419 = vset.pattern.permute.xlu1 %v2733_v30 }
 0x65e   :  { %v462_v0 = vpop.permute.xlu2 %461 }
 0x65f   :  { %v464_v8 = vadd.f32 %v462_v0, %v454_v4  ;;  %v2739_v0 = vmov 32  }
 0x666   :  { %v482_v12 = vpop.permute.xlu2 %481 }
 0x66e   :  { %v536_v23 = vpop.permute.xlu2 %535 }
 0x676   :  { %v472_v9 = vpop.permute.xlu1 %471 }
 0x677   :  { %v474_v11 = vadd.f32 %v472_v9, %v464_v8 }
 0x679   :  { %v3020_v13 = vadd.f32 %v482_v12, %v474_v11 }
 0x67b   :  { %v485_v14 = vsub.f32 %v3020_v13, %v426_v42  ;;  %v544_v42 = vsub.f32 %v3005_v41, %v3020_v13 }
 0x67d   :  { %v486_v15 = vadd.f32 %v485_v14, %v2990_v16 }
 0x67e   :  { %v526_v25 = vpop.permute.xlu1 %525 }
 0x67f   :  { %v487_v17 = vpack.c.bf16 %v486_v15, %v486_v15 }
 0x681   :  { %2214 = vmatmul.msk.bf16.vlgmr.msrb.gmra.mxu2 %vm79_vm0, %v487_v17 }
 0x682   :  { %1003 = vmatpush.bf16.msrb.mxu2 %v2894_v3 }
 0x686   :  { %1004 = vmatpush.bf16.msrb.mxu2 %v2902_v5 }
 0x687   :  { %v511_v33 = vpop.permute.xlu1 %510 }
 0x704   :  { %v500_v1 = vpop.f32.mrf.mxu2 }
 0x705   :  { %v501_v18 = vadd.f32 %v2933_v10, %v500_v1 }
 0x707   :  { %v504_v19 = vpack.c.bf16 %v501_v18, %v501_v18 }
 0x709   :  { %v505_v36 = vunpack.c.l.bf16 %v504_v19 }
 0x70b   :  { %2534 = vtanh.f32 %v505_v36 }
 0x70c   :  { %v502_v20 = vpop.f32.mrf.mxu2 }
 0x711   :  { %v2535_v21 = vpop.eup %2534 }
 0x712   :  { %v507_v22 = vpack.c.bf16 %v2535_v21, %v2535_v21 }
 0x714   :  { %v508_v24 = vunpack.c.l.bf16 %v507_v22 }
 0x716   :  { %v518_v26 = vmul.f32 %v516_v6, %v508_v24  ;;  %v538_v27 = vmul.f32 %v536_v23, %v508_v24  ;;  %v528_v28 = vmul.f32 %v526_v25, %v508_v24  ;;  %v513_v35 = vmul.f32 %v511_v33, %v508_v24 }
 0x718   :  { %540 = vrot.lane.b32.xlu1 %v538_v27, %s2706_s25  ;;  %530 = vrot.lane.b32.xlu0 %v528_v28, %s2700_s19 }
 0x719   :  { %520 = vrot.lane.b32.xlu2 %v518_v26, %s2707_s26 }
 0x720   :  { %595 = vperm.xlu1 %2419, %v2889_v2   ;;  %585 = vperm.xlu0 %2418, %v2889_v2  }
 0x721   :  { %575 = vperm.xlu2 %2417, %v2889_v2  }
 0x728   :  { %2421 = vset.pattern.permute.xlu1 %v2736_v61  ;;  %2423 = vset.pattern.permute.xlu0 %v2737_v62 }
 0x729   :  { %2420 = vset.pattern.permute.xlu2 %v2735_v32 }
 0x72a   :  { %570 = vperm.xlu2 %2420, %v2889_v2  }
 0x732   :  { %2422 = vset.pattern.permute.xlu2 %v2738_v63 }
 0x773   :  { %v521_v34 = vpop.permute.xlu2 %520 }
 0x774   :  { %v523_v37 = vadd.f32 %v521_v34, %v513_v35  ;;  %v2740_v34 = vmov 38   ;;  %v2741_v35 = vmov 37  }
 0x77b   :  { %v576_v57 = vpop.permute.xlu2 %575 }
 0x784   :  { %v571_v4 = vpop.permute.xlu2 %570 }
 0x78a   :  { %v531_v38 = vpop.permute.xlu0 %530  ;;  %v541_v40 = vpop.permute.xlu1 %540 }
 0x78b   :  { %v533_v39 = vadd.f32 %v531_v38, %v523_v37  ;;  %v2742_v37 = vmov 39   ;;  %v2743_v38 = vmov 36  }
 0x78d   :  { %v543_v43 = vadd.f32 %v541_v40, %v533_v39 }
 0x78f   :  { %v545_v44 = vadd.f32 %v544_v42, %v543_v43  ;;  %v604_v8 = vadd.f32 %v543_v43, %v3020_v13 }
 0x791   :  { %v546_v45 = vadd.f32 %v545_v44, %v2990_v16  ;;  %v605_v12 = vmul.f32 3.0, %v604_v8  ;;  %v2745_v8 = vmov 43  }
 0x792   :  { %v596_v54 = vpop.permute.xlu1 %595  ;;  %v586_v55 = vpop.permute.xlu0 %585 }
 0x793   :  { %v547_v46 = vpack.c.bf16 %v546_v45, %v546_v45  ;;  %v606_v18 = vadd.f32 %v605_v12, %v3005_v41 }
 0x795   :  { %2215 = vmatmul.msk.bf16.vlgmr.msrb.gmra.mxu3 %vm79_vm0, %v547_v46 }
 0x796   :  { %1063 = vmatpush.bf16.msrb.mxu3 %v2894_v3 }
 0x79a   :  { %1064 = vmatpush.bf16.msrb.mxu3 %v2902_v5 }
 0x818   :  { %v560_v47 = vpop.f32.mrf.mxu3 }
 0x819   :  { %v561_v48 = vadd.f32 %v2933_v10, %v560_v47 }
 0x81b   :  { %v564_v49 = vpack.c.bf16 %v561_v48, %v561_v48 }
 0x81d   :  { %v565_v50 = vunpack.c.l.bf16 %v564_v49 }
 0x81f   :  { %2536 = vtanh.f32 %v565_v50 }
 0x820   :  { %v562_v51 = vpop.f32.mrf.mxu3 }
 0x825   :  { %v2537_v52 = vpop.eup %2536 }
 0x826   :  { %v567_v53 = vpack.c.bf16 %v2537_v52, %v2537_v52 }
 0x828   :  { %v568_v56 = vunpack.c.l.bf16 %v567_v53 }
 0x82a   :  { %v578_v58 = vmul.f32 %v576_v57, %v568_v56  ;;  %v598_v59 = vmul.f32 %v596_v54, %v568_v56  ;;  %v588_v60 = vmul.f32 %v586_v55, %v568_v56  ;;  %v573_v9 = vmul.f32 %v571_v4, %v568_v56 }
 0x82b   :  { %v2744_v4 = vmov 42  }
 0x82c   :  { %600 = vrot.lane.b32.xlu0 %v598_v59, %s2706_s25  ;;  %590 = vrot.lane.b32.xlu2 %v588_v60, %s2700_s19 }
 0x82d   :  { %580 = vrot.lane.b32.xlu1 %v578_v58, %s2707_s26 }
 0x834   :  { %670 = vperm.xlu0 %2423, %v2889_v2   ;;  %660 = vperm.xlu2 %2422, %v2889_v2  }
 0x835   :  { %650 = vperm.xlu1 %2421, %v2889_v2  }
 0x83c   :  { %2425 = vset.pattern.permute.xlu0 %v2741_v35  ;;  %2427 = vset.pattern.permute.xlu2 %v2742_v37  ;;  %v2750_v35 = vmov 46   ;;  %v2751_v37 = vmov 44  }
 0x83d   :  { %2424 = vset.pattern.permute.xlu1 %v2739_v0  ;;  %709 = vperm.xlu0 %2425, %v2889_v2  }
 0x83e   :  { %645 = vperm.xlu1 %2424, %v2889_v2  }
 0x845   :  { %2430 = vset.pattern.permute.xlu0 %v2744_v4 }
 0x846   :  { %2426 = vset.pattern.permute.xlu1 %v2740_v34  ;;  %v3093_v34 = vld [vmem:[#allocation7] sm:$0xff] }
 0x886   :  { %v591_v15 = vpop.permute.xlu2 %590 }
 0x88e   :  { %v661_v27 = vpop.permute.xlu2 %660 }
 0x89e   :  { %v601_v1 = vpop.permute.xlu0 %600 }
 0x89f   :  { %v581_v11 = vpop.permute.xlu1 %580 }
 0x8a0   :  { %v583_v14 = vadd.f32 %v581_v11, %v573_v9  ;;  %v2746_v9 = vmov 41   ;;  %v2747_v11 = vmov 40  }
 0x8a2   :  { %v593_v17 = vadd.f32 %v591_v15, %v583_v14 }
 0x8a4   :  { %v603_v19 = vadd.f32 %v601_v1, %v593_v17 }
 0x8a6   :  { %v607_v36 = vadd.f32 %v606_v18, %v603_v19  ;;  %v671_v32 = vpop.permute.xlu0 %670 }
 0x8a7   :  { %v651_v29 = vpop.permute.xlu1 %650 }
 0x8a8   :  { %v608_v20 = vmul.f32 0.125, %v607_v36 }
 0x8aa   :  { %v3052_v21 = vadd.f32 %v608_v20, %v2990_v16 }
 0x8ac   :  { %v622_v22 = vpack.c.bf16 %v3052_v21, %v3052_v21 }
 0x8ae   :  { %2216 = vmatmul.msk.bf16.vlgmr.msra.gmra.mxu0 %vm79_vm0, %v622_v22 }
 0x8af   :  { %1138 = vmatpush.bf16.msra.mxu0 %v2894_v3  ;;  %v710_v58 = vpop.permute.xlu0 %709 }
 0x8b0   :  { %v646_v39 = vpop.permute.xlu1 %645 }
 0x8b3   :  { %1139 = vmatpush.bf16.msra.mxu0 %v2902_v5 }
 0x92b   :  { %v635_v13 = vpop.f32.mrf.mxu0 }
 0x92c   :  { %v636_v6 = vadd.f32 %v2933_v10, %v635_v13 }
 0x92e   :  { %v639_v23 = vpack.c.bf16 %v636_v6, %v636_v6 }
 0x930   :  { %v640_v41 = vunpack.c.l.bf16 %v639_v23 }
 0x932   :  { %2538 = vtanh.f32 %v640_v41 }
 0x933   :  { %v637_v24 = vpop.f32.mrf.mxu0 }
 0x938   :  { %v2539_v25 = vpop.eup %2538 }
 0x939   :  { %v642_v26 = vpack.c.bf16 %v2539_v25, %v2539_v25 }
 0x93b   :  { %v643_v28 = vunpack.c.l.bf16 %v642_v26 }
 0x93d   :  { %v653_v30 = vmul.f32 %v651_v29, %v643_v28  ;;  %v663_v31 = vmul.f32 %v661_v27, %v643_v28  ;;  %v673_v33 = vmul.f32 %v671_v32, %v643_v28  ;;  %v648_v42 = vmul.f32 %v646_v39, %v643_v28 }
 0x93f   :  { %665 = vrot.lane.b32.xlu1 %v663_v31, %s2700_s19  ;;  %655 = vrot.lane.b32.xlu2 %v653_v30, %s2707_s26 }
 0x947   :  { %675 = vrot.lane.b32.xlu2 %v673_v33, %s2706_s25  ;;  %719 = vperm.xlu1 %2426, %v2889_v2  }
 0x94f   :  { %729 = vperm.xlu2 %2427, %v2889_v2   ;;  %2428 = vset.pattern.permute.xlu1 %v2743_v38 }
 0x950   :  { %704 = vperm.xlu1 %2428, %v2889_v2  }
 0x957   :  { %2429 = vset.pattern.permute.xlu2 %v2746_v9 }
 0x958   :  { %2431 = vset.pattern.permute.xlu1 %v2745_v8 }
 0x999   :  { %v656_v40 = vpop.permute.xlu2 %655 }
 0x99a   :  { %v658_v43 = vadd.f32 %v656_v40, %v648_v42 }
 0x9a1   :  { %v676_v46 = vpop.permute.xlu2 %675 }
 0x9a9   :  { %v730_v59 = vpop.permute.xlu2 %729 }
 0x9b1   :  { %v666_v44 = vpop.permute.xlu1 %665 }
 0x9b2   :  { %v668_v45 = vadd.f32 %v666_v44, %v658_v43 }
 0x9b4   :  { %v3067_v47 = vadd.f32 %v676_v46, %v668_v45 }
 0x9b6   :  { %v679_v48 = vmul.f32 0.33333334, %v3067_v47 }
 0x9b8   :  { %v680_v49 = vadd.f32 %v679_v48, %v3052_v21 }
 0x9b9   :  { %v720_v61 = vpop.permute.xlu1 %719 }
 0x9ba   :  { %v681_v50 = vpack.c.bf16 %v680_v49, %v680_v49 }
 0x9bc   :  { %2217 = vmatmul.msk.bf16.vlgmr.msra.gmra.mxu1 %vm79_vm0, %v681_v50 }
 0x9bd   :  { %1197 = vmatpush.bf16.msra.mxu1 %v2894_v3 }
 0x9c1   :  { %1198 = vmatpush.bf16.msra.mxu1 %v2902_v5 }
 0x9c2   :  { %v705_v12 = vpop.permute.xlu1 %704 }
 0xa39   :  { %v694_v51 = vpop.f32.mrf.mxu1 }
 0xa3a   :  { %v695_v52 = vadd.f32 %v2933_v10, %v694_v51 }
 0xa3c   :  { %v698_v53 = vpack.c.bf16 %v695_v52, %v695_v52  ;;  %v3106_v52 = vld [vmem:[%s3484_s4 + $0x8] sm:$0xff] }
 0xa3e   :  { %v699_v54 = vunpack.c.l.bf16 %v698_v53  ;;  %v3112_v53 = vld [vmem:[%s3484_s4] sm:$0xff] }
 0xa40   :  { %2540 = vtanh.f32 %v699_v54 }
 0xa41   :  { %v696_v55 = vpop.f32.mrf.mxu1 }
 0xa46   :  { %v2541_v56 = vpop.eup %2540 }
 0xa47   :  { %v701_v57 = vpack.c.bf16 %v2541_v56, %v2541_v56 }
 0xa49   :  { %v702_v60 = vunpack.c.l.bf16 %v701_v57 }
 0xa4b   :  { %v712_v62 = vmul.f32 %v710_v58, %v702_v60  ;;  %v732_v63 = vmul.f32 %v730_v59, %v702_v60  ;;  %v722_v0 = vmul.f32 %v720_v61, %v702_v60  ;;  %v707_v15 = vmul.f32 %v705_v12, %v702_v60 }
 0xa4c   :  { %v2754_v12 = vmov 51  }
 0xa4d   :  { %734 = vrot.lane.b32.xlu1 %v732_v63, %s2706_s25  ;;  %724 = vrot.lane.b32.xlu0 %v722_v0, %s2700_s19 }
 0xa4e   :  { %714 = vrot.lane.b32.xlu2 %v712_v62, %s2707_s26 }
 0xa55   :  { %788 = vperm.xlu1 %2431, %v2889_v2   ;;  %778 = vperm.xlu0 %2430, %v2889_v2  }
 0xa56   :  { %768 = vperm.xlu2 %2429, %v2889_v2  }
 0xa5e   :  { %2432 = vset.pattern.permute.xlu2 %v2747_v11  ;;  %v2753_v11 = vmov 49  }
 0xa5f   :  { %763 = vperm.xlu2 %2432, %v2889_v2  }
 0xa67   :  { %2434 = vset.pattern.permute.xlu2 %v2750_v35 }
 0xaa8   :  { %v715_v14 = vpop.permute.xlu2 %714 }
 0xaa9   :  { %v717_v17 = vadd.f32 %v715_v14, %v707_v15  ;;  %v2755_v14 = vmov 48  }
 0xab0   :  { %v769_v30 = vpop.permute.xlu2 %768 }
 0xab9   :  { %v764_v38 = vpop.permute.xlu2 %763 }
 0xabf   :  { %v725_v1 = vpop.permute.xlu0 %724  ;;  %v735_v19 = vpop.permute.xlu1 %734 }
 0xac0   :  { %v727_v18 = vadd.f32 %v725_v1, %v717_v17 }
 0xac2   :  { %v3082_v36 = vadd.f32 %v735_v19, %v727_v18 }
 0xac4   :  { %v738_v20 = vsub.f32 %v3082_v36, %v679_v48  ;;  %v797_v46 = vsub.f32 %v3067_v47, %v3082_v36 }
 0xac6   :  { %v739_v22 = vadd.f32 %v738_v20, %v3052_v21 }
 0xac7   :  { %v789_v27 = vpop.permute.xlu1 %788  ;;  %v779_v28 = vpop.permute.xlu0 %778 }
 0xac8   :  { %v740_v13 = vpack.c.bf16 %v739_v22, %v739_v22 }
 0xaca   :  { %2218 = vmatmul.msk.bf16.vlgmr.msra.gmra.mxu2 %vm79_vm0, %v740_v13 }
 0xacb   :  { %1256 = vmatpush.bf16.msra.mxu2 %v2894_v3  ;;  %v2748_v3 = vmov 45  }
 0xacc   :  { %2433 = vset.pattern.permute.xlu1 %v2748_v3 }
 0xacf   :  { %1257 = vmatpush.bf16.msra.mxu2 %v2902_v5  ;;  %v2749_v5 = vmov 47  }
 0xad0   :  { %2435 = vset.pattern.permute.xlu0 %v2749_v5 }
 0xb4d   :  { %v753_v2 = vpop.f32.mrf.mxu2 }
 0xb4e   :  { %v754_v6 = vadd.f32 %v2933_v10, %v753_v2 }
 0xb50   :  { %v757_v23 = vpack.c.bf16 %v754_v6, %v754_v6 }
 0xb52   :  { %v758_v41 = vunpack.c.l.bf16 %v757_v23 }
 0xb54   :  { %2542 = vtanh.f32 %v758_v41 }
 0xb55   :  { %v755_v24 = vpop.f32.mrf.mxu2 }
 0xb5a   :  { %v2543_v25 = vpop.eup %2542 }
 0xb5b   :  { %v760_v26 = vpack.c.bf16 %v2543_v25, %v2543_v25 }
 0xb5d   :  { %v761_v29 = vunpack.c.l.bf16 %v760_v26 }
 0xb5f   :  { %v771_v31 = vmul.f32 %v769_v30, %v761_v29  ;;  %v791_v32 = vmul.f32 %v789_v27, %v761_v29  ;;  %v781_v33 = vmul.f32 %v779_v28, %v761_v29  ;;  %v766_v39 = vmul.f32 %v764_v38, %v761_v29 }
 0xb61   :  { %793 = vrot.lane.b32.xlu0 %v791_v32, %s2706_s25  ;;  %783 = vrot.lane.b32.xlu2 %v781_v33, %s2700_s19 }
 0xb62   :  { %773 = vrot.lane.b32.xlu1 %v771_v31, %s2707_s26 }
 0xb69   :  { %848 = vperm.xlu0 %2435, %v3093_v34   ;;  %838 = vperm.xlu2 %2434, %v3093_v34  }
 0xb6a   :  { %828 = vperm.xlu1 %2433, %v3093_v34  }
 0xb71   :  { %2437 = vset.pattern.permute.xlu0 %v2753_v11  ;;  %2439 = vset.pattern.permute.xlu2 %v2754_v12 }
 0xb72   :  { %2436 = vset.pattern.permute.xlu1 %v2751_v37  ;;  %903 = vperm.xlu0 %2437, %v3093_v34  }
 0xb73   :  { %823 = vperm.xlu1 %2436, %v3093_v34  }
 0xbbb   :  { %v784_v43 = vpop.permute.xlu2 %783 }
 0xbc3   :  { %v839_v61 = vpop.permute.xlu2 %838 }
 0xbd3   :  { %v794_v45 = vpop.permute.xlu0 %793 }
 0xbd4   :  { %v774_v40 = vpop.permute.xlu1 %773 }
 0xbd5   :  { %v776_v42 = vadd.f32 %v774_v40, %v766_v39  ;;  %v2756_v40 = vmov 54  }
 0xbd6   :  { %2442 = vset.pattern.permute.xlu0 %v2756_v40 }
 0xbd7   :  { %v786_v44 = vadd.f32 %v784_v43, %v776_v42  ;;  %v2757_v42 = vmov 55   ;;  %v2758_v43 = vmov 53  }
 0xbd9   :  { %v796_v48 = vadd.f32 %v794_v45, %v786_v44  ;;  %v2759_v44 = vmov 52  }
 0xbdb   :  { %v798_v49 = vadd.f32 %v797_v46, %v796_v48  ;;  %v849_v8 = vpop.permute.xlu0 %848  ;;  %v857_v1 = vadd.f32 %v796_v48, %v3082_v36 }
 0xbdc   :  { %v829_v63 = vpop.permute.xlu1 %828 }
 0xbdd   :  { %v799_v50 = vadd.f32 %v798_v49, %v3052_v21  ;;  %v858_v19 = vmul.f32 3.0, %v857_v1  ;;  %v2761_v1 = vmov 59  }
 0xbdf   :  { %v800_v51 = vpack.c.bf16 %v799_v50, %v799_v50  ;;  %v859_v6 = vadd.f32 %v858_v19, %v3067_v47  ;;  %v3136_v47 = vld [vmem:[%s3485_s5] ss:$0 sm:$0xff]  ;;  %v2763_v19 = vmov 56  }
 0xbe1   :  { %2219 = vmatmul.msk.bf16.vlgmr.msra.gmra.mxu3 %vm79_vm0, %v800_v51 }
 0xbe2   :  { %1316 = vmatpush.bf16.msra.mxu3 %v3106_v52 }
 0xbe4   :  { %v904_v33 = vpop.permute.xlu0 %903 }
 0xbe5   :  { %v824_v15 = vpop.permute.xlu1 %823 }
 0xbe6   :  { %1317 = vmatpush.bf16.msra.mxu3 %v3112_v53 }
 0xc64   :  { %v813_v54 = vpop.f32.mrf.mxu3 }
 0xc65   :  { %v814_v55 = vadd.f32 %v2933_v10, %v813_v54  ;;  %v2752_v10 = vmov 50  }
 0xc66   :  { %2438 = vset.pattern.permute.xlu1 %v2752_v10 }
 0xc67   :  { %v817_v56 = vpack.c.bf16 %v814_v55, %v814_v55 }
 0xc69   :  { %v818_v57 = vunpack.c.l.bf16 %v817_v56 }
 0xc6b   :  { %2544 = vtanh.f32 %v818_v57 }
 0xc6c   :  { %v815_v58 = vpop.f32.mrf.mxu3 }
 0xc71   :  { %v2545_v59 = vpop.eup %2544 }
 0xc72   :  { %v820_v60 = vpack.c.bf16 %v2545_v59, %v2545_v59 }
 0xc74   :  { %v821_v62 = vunpack.c.l.bf16 %v820_v60 }
 0xc76   :  { %v831_v0 = vmul.f32 %v829_v63, %v821_v62  ;;  %v841_v4 = vmul.f32 %v839_v61, %v821_v62  ;;  %v851_v9 = vmul.f32 %v849_v8, %v821_v62  ;;  %v826_v18 = vmul.f32 %v824_v15, %v821_v62 }
 0xc78   :  { %843 = vrot.lane.b32.xlu1 %v841_v4, %s2700_s19  ;;  %833 = vrot.lane.b32.xlu2 %v831_v0, %s2707_s26 }
 0xc80   :  { %853 = vrot.lane.b32.xlu2 %v851_v9, %s2706_s25  ;;  %913 = vperm.xlu1 %2438, %v3093_v34  }
 0xc88   :  { %923 = vperm.xlu2 %2439, %v3093_v34   ;;  %2440 = vset.pattern.permute.xlu1 %v2755_v14 }
 0xc89   :  { %898 = vperm.xlu1 %2440, %v3093_v34  }
 0xc90   :  { %2441 = vset.pattern.permute.xlu2 %v2758_v43  ;;  %v2764_v43 = vmov 62  }
 0xc91   :  { %2443 = vset.pattern.permute.xlu1 %v2757_v42 }
 0xcd2   :  { %v834_v17 = vpop.permute.xlu2 %833 }
 0xcd3   :  { %v836_v20 = vadd.f32 %v834_v17, %v826_v18  ;;  %v2760_v17 = vmov 57   ;;  %v2762_v18 = vmov 58  }
 0xcda   :  { %v854_v2 = vpop.permute.xlu2 %853 }
 0xce2   :  { %v924_v3 = vpop.permute.xlu2 %923 }
 0xcea   :  { %v844_v22 = vpop.permute.xlu1 %843 }
 0xceb   :  { %v846_v13 = vadd.f32 %v844_v22, %v836_v20 }
 0xced   :  { %v856_v23 = vadd.f32 %v854_v2, %v846_v13 }
 0xcef   :  { %v860_v41 = vadd.f32 %v859_v6, %v856_v23 }
 0xcf1   :  { %v861_v24 = vmul.f32 0.125, %v860_v41 }
 0xcf2   :  { %v914_v35 = vpop.permute.xlu1 %913 }
 0xcf3   :  { %v3126_v25 = vadd.f32 %v861_v24, %v3052_v21 }
 0xcf5   :  { %v875_v26 = vpack.c.bf16 %v3126_v25, %v3126_v25 }
 0xcf7   :  { %2220 = vmatmul.msk.bf16.vlgmr.msrb.gmra.mxu0 %vm79_vm0, %v875_v26 }
 0xcf8   :  { %1391 = vmatpush.bf16.msrb.mxu0 %v3106_v52 }
 0xcfb   :  { %v899_v45 = vpop.permute.xlu1 %898 }
 0xcfc   :  { %1392 = vmatpush.bf16.msrb.mxu0 %v3112_v53 }
 0xd74   :  { %v888_v36 = vpop.f32.mrf.mxu0 }
 0xd75   :  { %v889_v27 = vadd.f32 %v3136_v47, %v888_v36 }
 0xd77   :  { %v892_v28 = vpack.c.bf16 %v889_v27, %v889_v27 }
 0xd79   :  { %v893_v29 = vunpack.c.l.bf16 %v892_v28 }
 0xd7b   :  { %2546 = vtanh.f32 %v893_v29 }
 0xd7c   :  { %v890_v30 = vpop.f32.mrf.mxu0 }
 0xd81   :  { %v2547_v31 = vpop.eup %2546 }
 0xd82   :  { %v895_v32 = vpack.c.bf16 %v2547_v31, %v2547_v31 }
 0xd84   :  { %v896_v5 = vunpack.c.l.bf16 %v895_v32 }
 0xd86   :  { %v906_v37 = vmul.f32 %v904_v33, %v896_v5  ;;  %v926_v38 = vmul.f32 %v924_v3, %v896_v5  ;;  %v916_v39 = vmul.f32 %v914_v35, %v896_v5  ;;  %v901_v48 = vmul.f32 %v899_v45, %v896_v5 }
 0xd87   :  { %v2766_v45 = vmov 63  }
 0xd88   :  { %928 = vrot.lane.b32.xlu1 %v926_v38, %s2706_s25  ;;  %918 = vrot.lane.b32.xlu0 %v916_v39, %s2700_s19 }
 0xd89   :  { %908 = vrot.lane.b32.xlu2 %v906_v37, %s2707_s26 }
 0xd90   :  { %982 = vperm.xlu1 %2443, %v3093_v34   ;;  %972 = vperm.xlu0 %2442, %v3093_v34  }
 0xd91   :  { %962 = vperm.xlu2 %2441, %v3093_v34  }
 0xd98   :  { %2445 = vset.pattern.permute.xlu1 %v2760_v17  ;;  %2447 = vset.pattern.permute.xlu0 %v2761_v1 }
 0xd99   :  { %2444 = vset.pattern.permute.xlu2 %v2759_v44  ;;  %v2765_v44 = vmov 61  }
 0xd9a   :  { %957 = vperm.xlu2 %2444, %v3093_v34  }
 0xda2   :  { %2446 = vset.pattern.permute.xlu2 %v2762_v18 }
 0xde3   :  { %v909_v46 = vpop.permute.xlu2 %908 }
 0xde4   :  { %v911_v49 = vadd.f32 %v909_v46, %v901_v48  ;;  %v2767_v46 = vmov 60  }
 0xdeb   :  { %v963_v11 = vpop.permute.xlu2 %962 }
 0xdf4   :  { %v958_v20 = vpop.permute.xlu2 %957 }
 0xdfa   :  { %v919_v50 = vpop.permute.xlu0 %918  ;;  %v929_v54 = vpop.permute.xlu1 %928 }
 0xdfb   :  { %v921_v51 = vadd.f32 %v919_v50, %v911_v49 }
 0xdfd   :  { %v3146_v55 = vadd.f32 %v929_v54, %v921_v51 }
 0xdff   :  { %v932_v56 = vmul.f32 0.33333334, %v3146_v55 }
 0xe01   :  { %v933_v57 = vadd.f32 %v932_v56, %v3126_v25 }
 0xe02   :  { %v983_v8 = vpop.permute.xlu1 %982  ;;  %v973_v9 = vpop.permute.xlu0 %972 }
 0xe03   :  { %v934_v58 = vpack.c.bf16 %v933_v57, %v933_v57 }
 0xe05   :  { %2221 = vmatmul.msk.bf16.vlgmr.msrb.gmra.mxu1 %vm79_vm0, %v934_v58 }
 0xe06   :  { %1450 = vmatpush.bf16.msrb.mxu1 %v3106_v52 }
 0xe0a   :  { %1451 = vmatpush.bf16.msrb.mxu1 %v3112_v53 }
 0xe82   :  { %v947_v59 = vpop.f32.mrf.mxu1 }
 0xe83   :  { %v948_v60 = vadd.f32 %v3136_v47, %v947_v59 }
 0xe85   :  { %v951_v61 = vpack.c.bf16 %v948_v60, %v948_v60 }
 0xe87   :  { %v952_v62 = vunpack.c.l.bf16 %v951_v61 }
 0xe89   :  { %2548 = vtanh.f32 %v952_v62 }
 0xe8a   :  { %v949_v63 = vpop.f32.mrf.mxu1 }
 0xe8f   :  { %v2549_v0 = vpop.eup %2548 }
 0xe90   :  { %v954_v4 = vpack.c.bf16 %v2549_v0, %v2549_v0 }
 0xe92   :  { %v955_v10 = vunpack.c.l.bf16 %v954_v4 }
 0xe94   :  { %v965_v12 = vmul.f32 %v963_v11, %v955_v10  ;;  %v985_v14 = vmul.f32 %v983_v8, %v955_v10  ;;  %v975_v15 = vmul.f32 %v973_v9, %v955_v10  ;;  %v960_v22 = vmul.f32 %v958_v20, %v955_v10 }
 0xe95   :  { %v2768_v20 = vmov 66  }
 0xe96   :  { %987 = vrot.lane.b32.xlu0 %v985_v14, %s2706_s25  ;;  %977 = vrot.lane.b32.xlu2 %v975_v15, %s2700_s19 }
 0xe97   :  { %967 = vrot.lane.b32.xlu1 %v965_v12, %s2707_s26 }
 0xe9e   :  { %1041 = vperm.xlu0 %2447, %v3093_v34   ;;  %1031 = vperm.xlu2 %2446, %v3093_v34  }
 0xe9f   :  { %1021 = vperm.xlu1 %2445, %v3093_v34  }
 0xea6   :  { %2449 = vset.pattern.permute.xlu0 %v2765_v44  ;;  %2451 = vset.pattern.permute.xlu2 %v2766_v45 }
 0xea7   :  { %2448 = vset.pattern.permute.xlu1 %v2763_v19  ;;  %1081 = vperm.xlu0 %2449, %v3093_v34  }
 0xea8   :  { %1016 = vperm.xlu1 %2448, %v3093_v34  }
 0xeaf   :  { %2454 = vset.pattern.permute.xlu0 %v2768_v20 }
 0xeb0   :  { %2450 = vset.pattern.permute.xlu1 %v2764_v43 }
 0xef0   :  { %v978_v6 = vpop.permute.xlu2 %977 }
 0xef8   :  { %v1032_v5 = vpop.permute.xlu2 %1031 }
 0xf08   :  { %v988_v41 = vpop.permute.xlu0 %987 }
 0xf09   :  { %v968_v13 = vpop.permute.xlu1 %967 }
 0xf0a   :  { %v970_v2 = vadd.f32 %v968_v13, %v960_v22  ;;  %v2769_v22 = vmov 67   ;;  %v2770_v13 = vmov 65  }
 0xf0c   :  { %v980_v23 = vadd.f32 %v978_v6, %v970_v2  ;;  %v2771_v2 = vmov 64  }
 0xf0e   :  { %v3161_v24 = vadd.f32 %v988_v41, %v980_v23 }
 0xf10   :  { %v991_v26 = vsub.f32 %v3161_v24, %v932_v56  ;;  %v1042_v40 = vpop.permute.xlu0 %1041  ;;  %v1050_v58 = vsub.f32 %v3146_v55, %v3161_v24 }
 0xf11   :  { %v1022_v37 = vpop.permute.xlu1 %1021 }
 0xf12   :  { %v992_v36 = vadd.f32 %v991_v26, %v3126_v25 }
 0xf14   :  { %v993_v27 = vpack.c.bf16 %v992_v36, %v992_v36 }
 0xf16   :  { %2222 = vmatmul.msk.bf16.vlgmr.msrb.gmra.mxu2 %vm79_vm0, %v993_v27 }
 0xf17   :  { %1509 = vmatpush.bf16.msrb.mxu2 %v3106_v52 }
 0xf19   :  { %v1082_v12 = vpop.permute.xlu0 %1081 }
 0xf1a   :  { %v1017_v48 = vpop.permute.xlu1 %1016 }
 0xf1b   :  { %1510 = vmatpush.bf16.msrb.mxu2 %v3112_v53 }
 0xf99   :  { %v1006_v28 = vpop.f32.mrf.mxu2 }
 0xf9a   :  { %v1007_v29 = vadd.f32 %v3136_v47, %v1006_v28 }
 0xf9c   :  { %v1010_v30 = vpack.c.bf16 %v1007_v29, %v1007_v29 }
 0xf9e   :  { %v1011_v31 = vunpack.c.l.bf16 %v1010_v30 }
 0xfa0   :  { %2550 = vtanh.f32 %v1011_v31 }
 0xfa1   :  { %v1008_v32 = vpop.f32.mrf.mxu2 }
 0xfa6   :  { %v2551_v33 = vpop.eup %2550 }
 0xfa7   :  { %v1013_v3 = vpack.c.bf16 %v2551_v33, %v2551_v33 }
 0xfa9   :  { %v1014_v35 = vunpack.c.l.bf16 %v1013_v3 }
 0xfab   :  { %v1024_v38 = vmul.f32 %v1022_v37, %v1014_v35  ;;  %v1034_v39 = vmul.f32 %v1032_v5, %v1014_v35  ;;  %v1044_v42 = vmul.f32 %v1042_v40, %v1014_v35  ;;  %v1019_v50 = vmul.f32 %v1017_v48, %v1014_v35 }
 0xfad   :  { %1036 = vrot.lane.b32.xlu1 %v1034_v39, %s2700_s19  ;;  %1026 = vrot.lane.b32.xlu2 %v1024_v38, %s2707_s26 }
 0xfb5   :  { %1046 = vrot.lane.b32.xlu2 %v1044_v42, %s2706_s25  ;;  %1091 = vperm.xlu1 %2450, %v3093_v34  }
 0xfbd   :  { %1101 = vperm.xlu2 %2451, %v3093_v34   ;;  %2452 = vset.pattern.permute.xlu1 %v2767_v46 }
 0xfbe   :  { %1076 = vperm.xlu1 %2452, %v3093_v34  }
 0xfc5   :  { %2453 = vset.pattern.permute.xlu2 %v2770_v13 }
 0xfc6   :  { %2455 = vset.pattern.permute.xlu1 %v2769_v22 }
0x1007   :  { %v1027_v49 = vpop.permute.xlu2 %1026 }
0x1008   :  { %v1029_v51 = vadd.f32 %v1027_v49, %v1019_v50 }
0x100f   :  { %v1047_v57 = vpop.permute.xlu2 %1046 }
0x1017   :  { %v1102_v14 = vpop.permute.xlu2 %1101 }
0x101f   :  { %v1037_v54 = vpop.permute.xlu1 %1036 }
0x1020   :  { %v1039_v56 = vadd.f32 %v1037_v54, %v1029_v51  ;;  %v2772_v51 = vmov 69   ;;  %v2773_v54 = vmov 71  }
0x1022   :  { %v1049_v59 = vadd.f32 %v1047_v57, %v1039_v56  ;;  %v2774_v56 = vmov 70   ;;  %v2775_v57 = vmov 68  }
0x1024   :  { %v1051_v60 = vadd.f32 %v1050_v58, %v1049_v59  ;;  %v1110_v23 = vadd.f32 %v1049_v59, %v3161_v24 }
0x1026   :  { %v1052_v61 = vadd.f32 %v1051_v60, %v3126_v25  ;;  %v1111_v36 = vmul.f32 3.0, %v1110_v23 }
0x1027   :  { %v1092_v17 = vpop.permute.xlu1 %1091 }
0x1028   :  { %v1053_v62 = vpack.c.bf16 %v1052_v61, %v1052_v61  ;;  %v1112_v31 = vadd.f32 %v1111_v36, %v3146_v55  ;;  %v2778_v36 = vmov 75  }
0x102a   :  { %2223 = vmatmul.msk.bf16.vlgmr.msrb.gmra.mxu3 %vm79_vm0, %v1053_v62 }
0x102b   :  { %1569 = vmatpush.bf16.msrb.mxu3 %v3106_v52 }
0x102f   :  { %1570 = vmatpush.bf16.msrb.mxu3 %v3112_v53 }
0x1030   :  { %v1077_v6 = vpop.permute.xlu1 %1076 }
0x10ad   :  { %v1066_v63 = vpop.f32.mrf.mxu3 }
0x10ae   :  { %v1067_v0 = vadd.f32 %v3136_v47, %v1066_v63 }
0x10b0   :  { %v1070_v4 = vpack.c.bf16 %v1067_v0, %v1067_v0 }
0x10b2   :  { %v1071_v8 = vunpack.c.l.bf16 %v1070_v4 }
0x10b4   :  { %2552 = vtanh.f32 %v1071_v8 }
0x10b5   :  { %v1068_v9 = vpop.f32.mrf.mxu3 }
0x10ba   :  { %v2553_v10 = vpop.eup %2552 }
0x10bb   :  { %v1073_v11 = vpack.c.bf16 %v2553_v10, %v2553_v10 }
0x10bd   :  { %v1074_v15 = vunpack.c.l.bf16 %v1073_v11 }
0x10bf   :  { %v1094_v1 = vmul.f32 %v1092_v17, %v1074_v15  ;;  %v1084_v18 = vmul.f32 %v1082_v12, %v1074_v15  ;;  %v1104_v19 = vmul.f32 %v1102_v14, %v1074_v15  ;;  %v1079_v26 = vmul.f32 %v1077_v6, %v1074_v15 }
0x10c1   :  { %1106 = vrot.lane.b32.xlu1 %v1104_v19, %s2706_s25  ;;  %1096 = vrot.lane.b32.xlu0 %v1094_v1, %s2700_s19 }
0x10c2   :  { %1086 = vrot.lane.b32.xlu2 %v1084_v18, %s2707_s26 }
0x10c9   :  { %1176 = vperm.xlu1 %2455, %v3093_v34   ;;  %1166 = vperm.xlu0 %2454, %v3093_v34  }
0x10ca   :  { %1156 = vperm.xlu2 %2453, %v3093_v34  }
0x10d1   :  { %2457 = vset.pattern.permute.xlu1 %v2772_v51  ;;  %2459 = vset.pattern.permute.xlu0 %v2773_v54 }
0x10d2   :  { %2456 = vset.pattern.permute.xlu2 %v2771_v2 }
0x10d3   :  { %1151 = vperm.xlu2 %2456, %v3093_v34  }
0x10db   :  { %2458 = vset.pattern.permute.xlu2 %v2774_v56 }
0x111c   :  { %v1087_v41 = vpop.permute.xlu2 %1086 }
0x111d   :  { %v1089_v27 = vadd.f32 %v1087_v41, %v1079_v26  ;;  %v2776_v41 = vmov 74   ;;  %v2777_v26 = vmov 73  }
0x1124   :  { %v1157_v46 = vpop.permute.xlu2 %1156 }
0x112d   :  { %v1152_v58 = vpop.permute.xlu2 %1151 }
0x1133   :  { %v1097_v28 = vpop.permute.xlu0 %1096  ;;  %v1107_v30 = vpop.permute.xlu1 %1106 }
0x1134   :  { %v1099_v29 = vadd.f32 %v1097_v28, %v1089_v27  ;;  %v2779_v27 = vmov 72  }
0x1136   :  { %v1109_v32 = vadd.f32 %v1107_v30, %v1099_v29 }
0x1138   :  { %v1113_v33 = vadd.f32 %v1112_v31, %v1109_v32 }
0x113a   :  { %v1114_v3 = vmul.f32 0.125, %v1113_v33 }
0x113b   :  { %v1177_v43 = vpop.permute.xlu1 %1176  ;;  %v1167_v44 = vpop.permute.xlu0 %1166 }
0x113c   :  { %v3193_v5 = vadd.f32 %v1114_v3, %v3126_v25 }
0x113e   :  { %v1128_v35 = vpack.c.bf16 %v3193_v5, %v3193_v5 }
0x1140   :  { %2224 = vmatmul.msk.bf16.vlgmr.msra.gmra.mxu0 %vm79_vm0, %v1128_v35 }
0x1141   :  { %1644 = vmatpush.bf16.msra.mxu0 %v3106_v52 }
0x1145   :  { %1645 = vmatpush.bf16.msra.mxu0 %v3112_v53 }
0x11bd   :  { %v1141_v24 = vpop.f32.mrf.mxu0 }
0x11be   :  { %v1142_v37 = vadd.f32 %v3136_v47, %v1141_v24 }
0x11c0   :  { %v1145_v38 = vpack.c.bf16 %v1142_v37, %v1142_v37 }
0x11c2   :  { %v1146_v55 = vunpack.c.l.bf16 %v1145_v38 }
0x11c4   :  { %2554 = vtanh.f32 %v1146_v55 }
0x11c5   :  { %v1143_v39 = vpop.f32.mrf.mxu0 }
0x11ca   :  { %v2555_v40 = vpop.eup %2554 }
0x11cb   :  { %v1148_v42 = vpack.c.bf16 %v2555_v40, %v2555_v40 }
0x11cd   :  { %v1149_v45 = vunpack.c.l.bf16 %v1148_v42 }
0x11cf   :  { %v1159_v48 = vmul.f32 %v1157_v46, %v1149_v45  ;;  %v1179_v49 = vmul.f32 %v1177_v43, %v1149_v45  ;;  %v1169_v50 = vmul.f32 %v1167_v44, %v1149_v45  ;;  %v1154_v59 = vmul.f32 %v1152_v58, %v1149_v45 }
0x11d0   :  { %v2781_v58 = vmov 79  }
0x11d1   :  { %1181 = vrot.lane.b32.xlu0 %v1179_v49, %s2706_s25  ;;  %1171 = vrot.lane.b32.xlu2 %v1169_v50, %s2700_s19 }
0x11d2   :  { %1161 = vrot.lane.b32.xlu1 %v1159_v48, %s2707_s26 }
0x11d9   :  { %1235 = vperm.xlu0 %2459, %v3093_v34   ;;  %1225 = vperm.xlu2 %2458, %v3093_v34  }
0x11da   :  { %1215 = vperm.xlu1 %2457, %v3093_v34  }
0x11e1   :  { %2461 = vset.pattern.permute.xlu0 %v2777_v26  ;;  %2463 = vset.pattern.permute.xlu2 %v2778_v36 }
0x11e2   :  { %2460 = vset.pattern.permute.xlu1 %v2775_v57  ;;  %1274 = vperm.xlu0 %2461, %v3093_v34   ;;  %v2780_v57 = vmov 78  }
0x11e3   :  { %1210 = vperm.xlu1 %2460, %v3093_v34  }
0x11ea   :  { %2466 = vset.pattern.permute.xlu0 %v2780_v57 }
0x11eb   :  { %2462 = vset.pattern.permute.xlu1 %v2776_v41 }
0x122b   :  { %v1172_v62 = vpop.permute.xlu2 %1171 }
0x1233   :  { %v1226_v19 = vpop.permute.xlu2 %1225 }
0x1243   :  { %v1182_v0 = vpop.permute.xlu0 %1181 }
0x1244   :  { %v1162_v60 = vpop.permute.xlu1 %1161 }
0x1245   :  { %v1164_v61 = vadd.f32 %v1162_v60, %v1154_v59  ;;  %v2782_v59 = vmov 77   ;;  %v2783_v60 = vmov 76  }
0x1247   :  { %v1174_v63 = vadd.f32 %v1172_v62, %v1164_v61 }
0x1249   :  { %v3208_v4 = vadd.f32 %v1182_v0, %v1174_v63 }
0x124b   :  { %v1185_v8 = vmul.f32 0.33333334, %v3208_v4  ;;  %v1236_v6 = vpop.permute.xlu0 %1235 }
0x124c   :  { %v1216_v22 = vpop.permute.xlu1 %1215 }
0x124d   :  { %v1186_v9 = vadd.f32 %v1185_v8, %v3193_v5 }
0x124f   :  { %v1187_v10 = vpack.c.bf16 %v1186_v9, %v1186_v9 }
0x1251   :  { %2225 = vmatmul.msk.bf16.vlgmr.msra.gmra.mxu1 %vm79_vm0, %v1187_v10 }
0x1252   :  { %1703 = vmatpush.bf16.msra.mxu1 %v3106_v52 }
0x1254   :  { %v1275_v46 = vpop.permute.xlu0 %1274 }
0x1255   :  { %v1211_v28 = vpop.permute.xlu1 %1210 }
0x1256   :  { %1704 = vmatpush.bf16.msra.mxu1 %v3112_v53 }
0x12ce   :  { %v1200_v11 = vpop.f32.mrf.mxu1 }
0x12cf   :  { %v1201_v12 = vadd.f32 %v3136_v47, %v1200_v11 }
0x12d1   :  { %v1204_v14 = vpack.c.bf16 %v1201_v12, %v1201_v12 }
0x12d3   :  { %v1205_v15 = vunpack.c.l.bf16 %v1204_v14 }
0x12d5   :  { %2556 = vtanh.f32 %v1205_v15 }
0x12d6   :  { %v1202_v17 = vpop.f32.mrf.mxu1 }
0x12db   :  { %v2557_v1 = vpop.eup %2556 }
0x12dc   :  { %v1207_v18 = vpack.c.bf16 %v2557_v1, %v2557_v1 }
0x12de   :  { %v1208_v20 = vunpack.c.l.bf16 %v1207_v18 }
0x12e0   :  { %v1218_v13 = vmul.f32 %v1216_v22, %v1208_v20  ;;  %v1228_v2 = vmul.f32 %v1226_v19, %v1208_v20  ;;  %v1238_v23 = vmul.f32 %v1236_v6, %v1208_v20  ;;  %v1213_v30 = vmul.f32 %v1211_v28, %v1208_v20 }
0x12e2   :  { %1230 = vrot.lane.b32.xlu1 %v1228_v2, %s2700_s19  ;;  %1220 = vrot.lane.b32.xlu2 %v1218_v13, %s2707_s26 }
0x12ea   :  { %1240 = vrot.lane.b32.xlu2 %v1238_v23, %s2706_s25  ;;  %1284 = vperm.xlu1 %2462, %v3093_v34  }
0x12f2   :  { %1294 = vperm.xlu2 %2463, %v3093_v34   ;;  %2464 = vset.pattern.permute.xlu1 %v2779_v27 }
0x12f3   :  { %1269 = vperm.xlu1 %2464, %v3093_v34  }
0x12fa   :  { %2465 = vset.pattern.permute.xlu2 %v2782_v59 }
0x12fb   :  { %2467 = vset.pattern.permute.xlu1 %v2781_v58 }
0x133c   :  { %v1221_v29 = vpop.permute.xlu2 %1220 }
0x133d   :  { %v1223_v31 = vadd.f32 %v1221_v29, %v1213_v30  ;;  %v2784_v29 = vmov 81   ;;  %v2785_v30 = vmov 83  }
0x1344   :  { %v1241_v3 = vpop.permute.xlu2 %1240 }
0x134c   :  { %v1295_v48 = vpop.permute.xlu2 %1294 }
0x1354   :  { %v1231_v32 = vpop.permute.xlu1 %1230 }
0x1355   :  { %v1233_v33 = vadd.f32 %v1231_v32, %v1223_v31  ;;  %v2786_v31 = vmov 82   ;;  %v2787_v32 = vmov 80  }
0x1357   :  { %v3223_v35 = vadd.f32 %v1241_v3, %v1233_v33 }
0x1359   :  { %v1244_v24 = vsub.f32 %v3223_v35, %v1185_v8  ;;  %v1303_v11 = vsub.f32 %v3208_v4, %v3223_v35 }
0x135b   :  { %v1245_v37 = vadd.f32 %v1244_v24, %v3193_v5 }
0x135c   :  { %v1285_v50 = vpop.permute.xlu1 %1284 }
0x135d   :  { %v1246_v38 = vpack.c.bf16 %v1245_v37, %v1245_v37 }
0x135f   :  { %2226 = vmatmul.msk.bf16.vlgmr.msra.gmra.mxu2 %vm79_vm0, %v1246_v38 }
0x1360   :  { %1762 = vmatpush.bf16.msra.mxu2 %v3106_v52 }
0x1364   :  { %1763 = vmatpush.bf16.msra.mxu2 %v3112_v53 }
0x1365   :  { %v1270_v61 = vpop.permute.xlu1 %1269 }
0x13e2   :  { %v1259_v55 = vpop.f32.mrf.mxu2 }
0x13e3   :  { %v1260_v39 = vadd.f32 %v3136_v47, %v1259_v55 }
0x13e5   :  { %v1263_v40 = vpack.c.bf16 %v1260_v39, %v1260_v39 }
0x13e7   :  { %v1264_v42 = vunpack.c.l.bf16 %v1263_v40 }
0x13e9   :  { %2558 = vtanh.f32 %v1264_v42 }
0x13ea   :  { %v1261_v43 = vpop.f32.mrf.mxu2 }
0x13ef   :  { %v2559_v44 = vpop.eup %2558 }
0x13f0   :  { %v1266_v45 = vpack.c.bf16 %v2559_v44, %v2559_v44 }
0x13f2   :  { %v1267_v49 = vunpack.c.l.bf16 %v1266_v45 }
0x13f4   :  { %v1287_v51 = vmul.f32 %v1285_v50, %v1267_v49  ;;  %v1277_v54 = vmul.f32 %v1275_v46, %v1267_v49  ;;  %v1297_v56 = vmul.f32 %v1295_v48, %v1267_v49  ;;  %v1272_v63 = vmul.f32 %v1270_v61, %v1267_v49 }
0x13f6   :  { %1299 = vrot.lane.b32.xlu1 %v1297_v56, %s2706_s25  ;;  %1289 = vrot.lane.b32.xlu0 %v1287_v51, %s2700_s19 }
0x13f7   :  { %1279 = vrot.lane.b32.xlu2 %v1277_v54, %s2707_s26 }
0x13fe   :  { %1354 = vperm.xlu1 %2467, %v3093_v34   ;;  %1344 = vperm.xlu0 %2466, %v3093_v34  }
0x13ff   :  { %1334 = vperm.xlu2 %2465, %v3093_v34  }
0x1406   :  { %2469 = vset.pattern.permute.xlu1 %v2784_v29  ;;  %2471 = vset.pattern.permute.xlu0 %v2785_v30 }
0x1407   :  { %2468 = vset.pattern.permute.xlu2 %v2783_v60 }
0x1408   :  { %1329 = vperm.xlu2 %2468, %v3093_v34  }
0x1410   :  { %2470 = vset.pattern.permute.xlu2 %v2786_v31 }
0x1451   :  { %v1280_v62 = vpop.permute.xlu2 %1279 }
0x1452   :  { %v1282_v0 = vadd.f32 %v1280_v62, %v1272_v63 }
0x1459   :  { %v1335_v26 = vpop.permute.xlu2 %1334 }
0x1462   :  { %v1330_v33 = vpop.permute.xlu2 %1329 }
0x1468   :  { %v1290_v8 = vpop.permute.xlu0 %1289  ;;  %v1300_v10 = vpop.permute.xlu1 %1299 }
0x1469   :  { %v1292_v9 = vadd.f32 %v1290_v8, %v1282_v0  ;;  %v2788_v8 = vmov 86  }
0x146b   :  { %v1302_v12 = vadd.f32 %v1300_v10, %v1292_v9  ;;  %v2789_v9 = vmov 85   ;;  %v2790_v10 = vmov 87  }
0x146d   :  { %v1304_v14 = vadd.f32 %v1303_v11, %v1302_v12  ;;  %v1363_v3 = vadd.f32 %v1302_v12, %v3223_v35  ;;  %v2791_v11 = vmov 84  }
0x146f   :  { %v1305_v15 = vadd.f32 %v1304_v14, %v3193_v5  ;;  %v1364_v38 = vmul.f32 3.0, %v1363_v3 }
0x1470   :  { %v1355_v6 = vpop.permute.xlu1 %1354  ;;  %v1345_v23 = vpop.permute.xlu0 %1344 }
0x1471   :  { %v1306_v17 = vpack.c.bf16 %v1305_v15, %v1305_v15  ;;  %v1365_v43 = vadd.f32 %v1364_v38, %v3208_v4  ;;  %v2793_v38 = vmov 91  }
0x1473   :  { %2227 = vmatmul.msk.bf16.vlgmr.msra.gmra.mxu3 %vm79_vm0, %v1306_v17 }
0x1474   :  { %1822 = vmatpush.bf16.msra.mxu3 %v3106_v52 }
0x1478   :  { %1823 = vmatpush.bf16.msra.mxu3 %v3112_v53 }
0x14f6   :  { %v1319_v1 = vpop.f32.mrf.mxu3 }
0x14f7   :  { %v1320_v18 = vadd.f32 %v3136_v47, %v1319_v1 }
0x14f9   :  { %v1323_v19 = vpack.c.bf16 %v1320_v18, %v1320_v18 }
0x14fb   :  { %v1324_v20 = vunpack.c.l.bf16 %v1323_v19 }
0x14fd   :  { %2560 = vtanh.f32 %v1324_v20 }
0x14fe   :  { %v1321_v22 = vpop.f32.mrf.mxu3 }
0x1503   :  { %v2561_v13 = vpop.eup %2560 }
0x1504   :  { %v1326_v2 = vpack.c.bf16 %v2561_v13, %v2561_v13 }
0x1506   :  { %v1327_v41 = vunpack.c.l.bf16 %v1326_v2 }
0x1508   :  { %v1337_v36 = vmul.f32 %v1335_v26, %v1327_v41  ;;  %v1357_v27 = vmul.f32 %v1355_v6, %v1327_v41  ;;  %v1347_v28 = vmul.f32 %v1345_v23, %v1327_v41  ;;  %v1332_v24 = vmul.f32 %v1330_v33, %v1327_v41 }
0x150a   :  { %1359 = vrot.lane.b32.xlu0 %v1357_v27, %s2706_s25  ;;  %1349 = vrot.lane.b32.xlu2 %v1347_v28, %s2700_s19 }
0x150b   :  { %1339 = vrot.lane.b32.xlu1 %v1337_v36, %s2707_s26 }
0x1512   :  { %1429 = vperm.xlu0 %2471, %v3093_v34   ;;  %1419 = vperm.xlu2 %2470, %v3093_v34  }
0x1513   :  { %1409 = vperm.xlu1 %2469, %v3093_v34  }
0x151a   :  { %2473 = vset.pattern.permute.xlu0 %v2789_v9  ;;  %2475 = vset.pattern.permute.xlu2 %v2790_v10 }
0x151b   :  { %2472 = vset.pattern.permute.xlu1 %v2787_v32  ;;  %1468 = vperm.xlu0 %2473, %v3093_v34  }
0x151c   :  { %1404 = vperm.xlu1 %2472, %v3093_v34  }
0x1524   :  { %2474 = vset.pattern.permute.xlu1 %v2788_v8 }
0x1564   :  { %v1350_v39 = vpop.permute.xlu2 %1349 }
0x156c   :  { %v1420_v58 = vpop.permute.xlu2 %1419 }
0x157c   :  { %v1360_v42 = vpop.permute.xlu0 %1359 }
0x157d   :  { %v1340_v37 = vpop.permute.xlu1 %1339 }
0x157e   :  { %v1342_v55 = vadd.f32 %v1340_v37, %v1332_v24  ;;  %v2792_v37 = vmov 90  }
0x157f   :  { %2478 = vset.pattern.permute.xlu0 %v2792_v37 }
0x1580   :  { %v1352_v40 = vadd.f32 %v1350_v39, %v1342_v55  ;;  %v2794_v55 = vmov 89   ;;  %v2795_v39 = vmov 88  }
0x1582   :  { %v1362_v44 = vadd.f32 %v1360_v42, %v1352_v40 }
0x1584   :  { %v1366_v45 = vadd.f32 %v1365_v43, %v1362_v44  ;;  %v1430_v63 = vpop.permute.xlu0 %1429 }
0x1585   :  { %v1410_v60 = vpop.permute.xlu1 %1409 }
0x1586   :  { %v1367_v46 = vmul.f32 0.125, %v1366_v45 }
0x1588   :  { %v3255_v48 = vadd.f32 %v1367_v46, %v3193_v5 }
0x158a   :  { %v1381_v49 = vpack.c.bf16 %v3255_v48, %v3255_v48 }
0x158c   :  { %2228 = vmatmul.msk.bf16.vlgmr.msrb.gmra.mxu0 %vm79_vm0, %v1381_v49 }
0x158d   :  { %1897 = vmatpush.bf16.msrb.mxu0 %v3106_v52  ;;  %v1469_v29 = vpop.permute.xlu0 %1468 }
0x158e   :  { %v1405_v12 = vpop.permute.xlu1 %1404 }
0x1591   :  { %1898 = vmatpush.bf16.msrb.mxu0 %v3112_v53 }
0x1609   :  { %v1394_v35 = vpop.f32.mrf.mxu0 }
0x160a   :  { %v1395_v50 = vadd.f32 %v3136_v47, %v1394_v35 }
0x160c   :  { %v1398_v51 = vpack.c.bf16 %v1395_v50, %v1395_v50 }
0x160e   :  { %v1399_v4 = vunpack.c.l.bf16 %v1398_v51 }
0x1610   :  { %2562 = vtanh.f32 %v1399_v4 }
0x1611   :  { %v1396_v54 = vpop.f32.mrf.mxu0 }
0x1616   :  { %v2563_v56 = vpop.eup %2562 }
0x1617   :  { %v1401_v57 = vpack.c.bf16 %v2563_v56, %v2563_v56 }
0x1619   :  { %v1402_v59 = vunpack.c.l.bf16 %v1401_v57 }
0x161b   :  { %v1412_v61 = vmul.f32 %v1410_v60, %v1402_v59  ;;  %v1422_v62 = vmul.f32 %v1420_v58, %v1402_v59  ;;  %v1432_v0 = vmul.f32 %v1430_v63, %v1402_v59  ;;  %v1407_v15 = vmul.f32 %v1405_v12, %v1402_v59 }
0x161c   :  { %v2798_v12 = vmov 94  }
0x161d   :  { %1424 = vrot.lane.b32.xlu1 %v1422_v62, %s2700_s19  ;;  %1414 = vrot.lane.b32.xlu2 %v1412_v61, %s2707_s26 }
0x1625   :  { %1434 = vrot.lane.b32.xlu2 %v1432_v0, %s2706_s25  ;;  %1478 = vperm.xlu1 %2474, %v3093_v34  }
0x162d   :  { %1488 = vperm.xlu2 %2475, %v3093_v34   ;;  %2476 = vset.pattern.permute.xlu1 %v2791_v11  ;;  %v3296_v11 = vld [vmem:[#allocation7] sm:$0xff] }
0x162e   :  { %1463 = vperm.xlu1 %2476, %v3093_v34  }
0x1635   :  { %2477 = vset.pattern.permute.xlu2 %v2794_v55 }
0x1636   :  { %2479 = vset.pattern.permute.xlu1 %v2793_v38 }
0x1677   :  { %v1415_v14 = vpop.permute.xlu2 %1414 }
0x1678   :  { %v1417_v17 = vadd.f32 %v1415_v14, %v1407_v15  ;;  %v2799_v14 = vmov 92  }
0x167f   :  { %v1435_v19 = vpop.permute.xlu2 %1434 }
0x1687   :  { %v1489_v30 = vpop.permute.xlu2 %1488 }
0x168f   :  { %v1425_v1 = vpop.permute.xlu1 %1424 }
0x1690   :  { %v1427_v18 = vadd.f32 %v1425_v1, %v1417_v17 }
0x1692   :  { %v3270_v20 = vadd.f32 %v1435_v19, %v1427_v18 }
0x1694   :  { %v1438_v22 = vmul.f32 0.33333334, %v3270_v20 }
0x1696   :  { %v1439_v13 = vadd.f32 %v1438_v22, %v3255_v48 }
0x1697   :  { %v1479_v32 = vpop.permute.xlu1 %1478 }
0x1698   :  { %v1440_v2 = vpack.c.bf16 %v1439_v13, %v1439_v13 }
0x169a   :  { %2229 = vmatmul.msk.bf16.vlgmr.msrb.gmra.mxu1 %vm79_vm0, %v1440_v2 }
0x169b   :  { %1956 = vmatpush.bf16.msrb.mxu1 %v3106_v52 }
0x169f   :  { %1957 = vmatpush.bf16.msrb.mxu1 %v3112_v53 }
0x16a0   :  { %v1464_v40 = vpop.permute.xlu1 %1463 }
0x1717   :  { %v1453_v6 = vpop.f32.mrf.mxu1 }
0x1718   :  { %v1454_v23 = vadd.f32 %v3136_v47, %v1453_v6 }
0x171a   :  { %v1457_v41 = vpack.c.bf16 %v1454_v23, %v1454_v23 }
0x171c   :  { %v1458_v26 = vunpack.c.l.bf16 %v1457_v41 }
0x171e   :  { %2564 = vtanh.f32 %v1458_v26 }
0x171f   :  { %v1455_v36 = vpop.f32.mrf.mxu1 }
0x1720   :  { %v2591_v36 = vld [vmem:[%s3484_s4 + $0x8] sm:$0xff] }
0x1724   :  { %v2565_v27 = vpop.eup %2564 }
0x1725   :  { %v1460_v28 = vpack.c.bf16 %v2565_v27, %v2565_v27  ;;  %v2592_v27 = vld [vmem:[%s3484_s4] sm:$0xff] }
0x1727   :  { %v1461_v31 = vunpack.c.l.bf16 %v1460_v28 }
0x1729   :  { %v1481_v33 = vmul.f32 %v1479_v32, %v1461_v31  ;;  %v1471_v3 = vmul.f32 %v1469_v29, %v1461_v31  ;;  %v1491_v24 = vmul.f32 %v1489_v30, %v1461_v31  ;;  %v1466_v43 = vmul.f32 %v1464_v40, %v1461_v31 }
0x172b   :  { %1493 = vrot.lane.b32.xlu1 %v1491_v24, %s2706_s25  ;;  %1483 = vrot.lane.b32.xlu0 %v1481_v33, %s2700_s19 }
0x172c   :  { %1473 = vrot.lane.b32.xlu2 %v1471_v3, %s2707_s26 }
0x1733   :  { %1547 = vperm.xlu1 %2479, %v3093_v34   ;;  %1537 = vperm.xlu0 %2478, %v3093_v34  }
0x1734   :  { %1527 = vperm.xlu2 %2477, %v3093_v34  }
0x173c   :  { %2480 = vset.pattern.permute.xlu2 %v2795_v39 }
0x173d   :  { %1522 = vperm.xlu2 %2480, %v3093_v34  }
0x1745   :  { %2482 = vset.pattern.permute.xlu2 %v2798_v12 }
0x1786   :  { %v1474_v42 = vpop.permute.xlu2 %1473 }
0x1787   :  { %v1476_v44 = vadd.f32 %v1474_v42, %v1466_v43  ;;  %v2801_v43 = vmov 97  }
0x178e   :  { %v1528_v0 = vpop.permute.xlu2 %1527 }
0x1797   :  { %v1523_v15 = vpop.permute.xlu2 %1522 }
0x179d   :  { %v1484_v45 = vpop.permute.xlu0 %1483  ;;  %v1494_v49 = vpop.permute.xlu1 %1493 }
0x179e   :  { %v1486_v46 = vadd.f32 %v1484_v45, %v1476_v44  ;;  %v2802_v44 = vmov 99   ;;  %v2803_v45 = vmov 96  }
0x17a0   :  { %v3285_v35 = vadd.f32 %v1494_v49, %v1486_v46 }
0x17a2   :  { %v1497_v50 = vsub.f32 %v3285_v35, %v1438_v22  ;;  %v1556_v2 = vsub.f32 %v3270_v20, %v3285_v35 }
0x17a4   :  { %v1498_v51 = vadd.f32 %v1497_v50, %v3255_v48 }
0x17a5   :  { %v1548_v61 = vpop.permute.xlu1 %1547  ;;  %v1538_v62 = vpop.permute.xlu0 %1537 }
0x17a6   :  { %v1499_v4 = vpack.c.bf16 %v1498_v51, %v1498_v51 }
0x17a8   :  { %2230 = vmatmul.msk.bf16.vlgmr.msrb.gmra.mxu2 %vm79_vm0, %v1499_v4 }
0x17a9   :  { %2015 = vmatpush.bf16.msrb.mxu2 %v3106_v52  ;;  %v2796_v52 = vmov 93  }
0x17aa   :  { %2481 = vset.pattern.permute.xlu1 %v2796_v52 }
0x17ad   :  { %2016 = vmatpush.bf16.msrb.mxu2 %v3112_v53  ;;  %v2797_v53 = vmov 95  }
0x17ae   :  { %2483 = vset.pattern.permute.xlu0 %v2797_v53 }
0x182b   :  { %v1512_v34 = vpop.f32.mrf.mxu2 }
0x182c   :  { %v1513_v54 = vadd.f32 %v3136_v47, %v1512_v34 }
0x182e   :  { %v1516_v56 = vpack.c.bf16 %v1513_v54, %v1513_v54 }
0x1830   :  { %v1517_v57 = vunpack.c.l.bf16 %v1516_v56 }
0x1832   :  { %2566 = vtanh.f32 %v1517_v57 }
0x1833   :  { %v1514_v58 = vpop.f32.mrf.mxu2 }
0x1838   :  { %v2567_v59 = vpop.eup %2566 }
0x1839   :  { %v1519_v60 = vpack.c.bf16 %v2567_v59, %v2567_v59 }
0x183b   :  { %v1520_v63 = vunpack.c.l.bf16 %v1519_v60 }
0x183d   :  { %v1530_v8 = vmul.f32 %v1528_v0, %v1520_v63  ;;  %v1550_v9 = vmul.f32 %v1548_v61, %v1520_v63  ;;  %v1540_v10 = vmul.f32 %v1538_v62, %v1520_v63  ;;  %v1525_v17 = vmul.f32 %v1523_v15, %v1520_v63  ;;  %v3331_v0 = vld [vmem:[%s3485_s5] ss:$0 sm:$0xff] }
0x183f   :  { %1552 = vrot.lane.b32.xlu0 %v1550_v9, %s2706_s25  ;;  %1542 = vrot.lane.b32.xlu2 %v1540_v10, %s2700_s19 }
0x1840   :  { %1532 = vrot.lane.b32.xlu1 %v1530_v8, %s2707_s26 }
0x1847   :  { %1607 = vperm.xlu0 %2483, %v3296_v11   ;;  %1597 = vperm.xlu2 %2482, %v3296_v11  }
0x1848   :  { %1587 = vperm.xlu1 %2481, %v3296_v11  }
0x184f   :  { %2485 = vset.pattern.permute.xlu0 %v2801_v43  ;;  %2487 = vset.pattern.permute.xlu2 %v2802_v44 }
0x1850   :  { %2484 = vset.pattern.permute.xlu1 %v2799_v14  ;;  %1662 = vperm.xlu0 %2485, %v3296_v11  }
0x1851   :  { %1582 = vperm.xlu1 %2484, %v3296_v11  }
0x1899   :  { %v1543_v19 = vpop.permute.xlu2 %1542 }
0x18a1   :  { %v1598_v24 = vpop.permute.xlu2 %1597 }
0x18b1   :  { %v1553_v13 = vpop.permute.xlu0 %1552 }
0x18b2   :  { %v1533_v1 = vpop.permute.xlu1 %1532 }
0x18b3   :  { %v1535_v18 = vadd.f32 %v1533_v1, %v1525_v17 }
0x18b5   :  { %v1545_v22 = vadd.f32 %v1543_v19, %v1535_v18 }
0x18b7   :  { %v1555_v6 = vadd.f32 %v1553_v13, %v1545_v22  ;;  %v2804_v22 = vmov 102   ;;  %v2805_v13 = vmov 103  }
0x18b8   :  { %2490 = vset.pattern.permute.xlu0 %v2804_v22 }
0x18b9   :  { %v1557_v23 = vadd.f32 %v1556_v2, %v1555_v6  ;;  %v1608_v40 = vpop.permute.xlu0 %1607  ;;  %v1616_v50 = vadd.f32 %v1555_v6, %v3285_v35  ;;  %v2806_v2 = vmov 101   ;;  %v2807_v6 = vmov 100  }
0x18ba   :  { %v1588_v38 = vpop.permute.xlu1 %1587 }
0x18bb   :  { %v1558_v41 = vadd.f32 %v1557_v23, %v3255_v48  ;;  %v1617_v4 = vmul.f32 3.0, %v1616_v50  ;;  %v2808_v50 = vmov 105  }
0x18bd   :  { %v1559_v26 = vpack.c.bf16 %v1558_v41, %v1558_v41  ;;  %v1618_v58 = vadd.f32 %v1617_v4, %v3270_v20  ;;  %v2810_v4 = vmov 106  }
0x18bf   :  { %2231 = vmatmul.msk.bf16.vlgmr.msrb.gmra.mxu3 %vm79_vm0, %v1559_v26 }
0x18c0   :  { %2075 = vmatpush.bf16.msrb.mxu3 %v2591_v36 }
0x18c2   :  { %v1663_v12 = vpop.permute.xlu0 %1662 }
0x18c3   :  { %v1583_v46 = vpop.permute.xlu1 %1582 }
0x18c4   :  { %2076 = vmatpush.bf16.msrb.mxu3 %v2592_v27 }
0x1942   :  { %v1572_v28 = vpop.f32.mrf.mxu3 }
0x1943   :  { %v1573_v29 = vadd.f32 %v3136_v47, %v1572_v28  ;;  %v2800_v47 = vmov 98  }
0x1944   :  { %2486 = vset.pattern.permute.xlu1 %v2800_v47 }
0x1945   :  { %v1576_v30 = vpack.c.bf16 %v1573_v29, %v1573_v29 }
0x1947   :  { %v1577_v31 = vunpack.c.l.bf16 %v1576_v30 }
0x1949   :  { %2568 = vtanh.f32 %v1577_v31 }
0x194a   :  { %v1574_v32 = vpop.f32.mrf.mxu3 }
0x194f   :  { %v2569_v33 = vpop.eup %2568 }
0x1950   :  { %v1579_v3 = vpack.c.bf16 %v2569_v33, %v2569_v33 }
0x1952   :  { %v1580_v37 = vunpack.c.l.bf16 %v1579_v3 }
0x1954   :  { %v1590_v55 = vmul.f32 %v1588_v38, %v1580_v37  ;;  %v1600_v39 = vmul.f32 %v1598_v24, %v1580_v37  ;;  %v1610_v42 = vmul.f32 %v1608_v40, %v1580_v37  ;;  %v1585_v51 = vmul.f32 %v1583_v46, %v1580_v37 }
0x1956   :  { %1602 = vrot.lane.b32.xlu1 %v1600_v39, %s2700_s19  ;;  %1592 = vrot.lane.b32.xlu2 %v1590_v55, %s2707_s26 }
0x195e   :  { %1612 = vrot.lane.b32.xlu2 %v1610_v42, %s2706_s25  ;;  %1672 = vperm.xlu1 %2486, %v3296_v11  }
0x1966   :  { %1682 = vperm.xlu2 %2487, %v3296_v11   ;;  %2488 = vset.pattern.permute.xlu1 %v2803_v45 }
0x1967   :  { %1657 = vperm.xlu1 %2488, %v3296_v11  }
0x196e   :  { %2489 = vset.pattern.permute.xlu2 %v2806_v2 }
0x196f   :  { %2491 = vset.pattern.permute.xlu1 %v2805_v13 }
0x19b0   :  { %v1593_v49 = vpop.permute.xlu2 %1592 }
0x19b1   :  { %v1595_v34 = vadd.f32 %v1593_v49, %v1585_v51  ;;  %v2809_v51 = vmov 107  }
0x19b8   :  { %v1613_v57 = vpop.permute.xlu2 %1612 }
0x19c0   :  { %v1683_v14 = vpop.permute.xlu2 %1682 }
0x19c8   :  { %v1603_v54 = vpop.permute.xlu1 %1602 }
0x19c9   :  { %v1605_v56 = vadd.f32 %v1603_v54, %v1595_v34  ;;  %v2811_v34 = vmov 104  }
0x19cb   :  { %v1615_v59 = vadd.f32 %v1613_v57, %v1605_v56 }
0x19cd   :  { %v1619_v60 = vadd.f32 %v1618_v58, %v1615_v59 }
0x19cf   :  { %v1620_v61 = vmul.f32 0.125, %v1619_v60 }
0x19d0   :  { %v1673_v17 = vpop.permute.xlu1 %1672 }
0x19d1   :  { %v3323_v62 = vadd.f32 %v1620_v61, %v3255_v48 }
0x19d3   :  { %v1634_v63 = vpack.c.bf16 %v3323_v62, %v3323_v62 }
0x19d5   :  { %2232 = vmatmul.msk.bf16.vlgmr.msra.gmra.mxu0 %vm79_vm0, %v1634_v63 }
0x19d9   :  { %v1658_v23 = vpop.permute.xlu1 %1657 }
0x1a52   :  { %v1647_v35 = vpop.f32.mrf.mxu0 }
0x1a53   :  { %v1648_v8 = vadd.f32 %v3331_v0, %v1647_v35 }
0x1a55   :  { %v1651_v20 = vpack.c.bf16 %v1648_v8, %v1648_v8 }
0x1a57   :  { %v1652_v9 = vunpack.c.l.bf16 %v1651_v20 }
0x1a59   :  { %2570 = vtanh.f32 %v1652_v9 }
0x1a5a   :  { %v1649_v10 = vpop.f32.mrf.mxu0 }
0x1a5f   :  { %v2571_v52 = vpop.eup %2570 }
0x1a60   :  { %v1654_v53 = vpack.c.bf16 %v2571_v52, %v2571_v52 }
0x1a62   :  { %v1655_v15 = vunpack.c.l.bf16 %v1654_v53 }
0x1a64   :  { %v1675_v1 = vmul.f32 %v1673_v17, %v1655_v15  ;;  %v1665_v18 = vmul.f32 %v1663_v12, %v1655_v15  ;;  %v1685_v19 = vmul.f32 %v1683_v14, %v1655_v15  ;;  %v1660_v26 = vmul.f32 %v1658_v23, %v1655_v15 }
0x1a65   :  { %v2813_v23 = vmov 109  }
0x1a66   :  { %1687 = vrot.lane.b32.xlu1 %v1685_v19, %s2706_s25  ;;  %1677 = vrot.lane.b32.xlu0 %v1675_v1, %s2700_s19 }
0x1a67   :  { %1667 = vrot.lane.b32.xlu2 %v1665_v18, %s2707_s26 }
0x1a6e   :  { %1741 = vperm.xlu1 %2491, %v3296_v11   ;;  %1731 = vperm.xlu0 %2490, %v3296_v11  }
0x1a6f   :  { %1721 = vperm.xlu2 %2489, %v3296_v11  }
0x1a76   :  { %2493 = vset.pattern.permute.xlu1 %v2808_v50  ;;  %2495 = vset.pattern.permute.xlu0 %v2809_v51 }
0x1a77   :  { %2492 = vset.pattern.permute.xlu2 %v2807_v6  ;;  %v2812_v6 = vmov 110  }
0x1a78   :  { %1716 = vperm.xlu2 %2492, %v3296_v11  }
0x1a80   :  { %2494 = vset.pattern.permute.xlu2 %v2810_v4 }
0x1ac1   :  { %v1668_v41 = vpop.permute.xlu2 %1667 }
0x1ac2   :  { %v1670_v36 = vadd.f32 %v1668_v41, %v1660_v26  ;;  %v2814_v41 = vmov 111   ;;  %v2815_v26 = vmov 108  }
0x1ac9   :  { %v1722_v44 = vpop.permute.xlu2 %1721 }
0x1ad2   :  { %v1717_v54 = vpop.permute.xlu2 %1716 }
0x1ad8   :  { %v1678_v27 = vpop.permute.xlu0 %1677  ;;  %v1688_v29 = vpop.permute.xlu1 %1687 }
0x1ad9   :  { %v1680_v28 = vadd.f32 %v1678_v27, %v1670_v36 }
0x1adb   :  { %v3341_v30 = vadd.f32 %v1688_v29, %v1680_v28 }
0x1add   :  { %v1691_v31 = vmul.f32 0.33333334, %v3341_v30 }
0x1adf   :  { %v1692_v32 = vadd.f32 %v1691_v31, %v3323_v62 }
0x1ae0   :  { %v1742_v42 = vpop.permute.xlu1 %1741  ;;  %v1732_v47 = vpop.permute.xlu0 %1731 }
0x1ae1   :  { %v1693_v33 = vpack.c.bf16 %v1692_v32, %v1692_v32 }
0x1ae3   :  { %2233 = vmatmul.msk.bf16.vlgmr.msra.gmra.mxu1 %vm79_vm0, %v1693_v33 }
0x1b60   :  { %v1706_v3 = vpop.f32.mrf.mxu1 }
0x1b61   :  { %v1707_v24 = vadd.f32 %v3331_v0, %v1706_v3 }
0x1b63   :  { %v1710_v37 = vpack.c.bf16 %v1707_v24, %v1707_v24 }
0x1b65   :  { %v1711_v38 = vunpack.c.l.bf16 %v1710_v37 }
0x1b67   :  { %2572 = vtanh.f32 %v1711_v38 }
0x1b68   :  { %v1708_v55 = vpop.f32.mrf.mxu1 }
0x1b6d   :  { %v2573_v39 = vpop.eup %2572 }
0x1b6e   :  { %v1713_v40 = vpack.c.bf16 %v2573_v39, %v2573_v39 }
0x1b70   :  { %v1714_v43 = vunpack.c.l.bf16 %v1713_v40 }
0x1b72   :  { %v1724_v45 = vmul.f32 %v1722_v44, %v1714_v43  ;;  %v1744_v46 = vmul.f32 %v1742_v42, %v1714_v43  ;;  %v1734_v49 = vmul.f32 %v1732_v47, %v1714_v43  ;;  %v1719_v56 = vmul.f32 %v1717_v54, %v1714_v43 }
0x1b74   :  { %1746 = vrot.lane.b32.xlu0 %v1744_v46, %s2706_s25  ;;  %1736 = vrot.lane.b32.xlu2 %v1734_v49, %s2700_s19 }
0x1b75   :  { %1726 = vrot.lane.b32.xlu1 %v1724_v45, %s2707_s26 }
0x1b7c   :  { %1800 = vperm.xlu0 %2495, %v3296_v11   ;;  %1790 = vperm.xlu2 %2494, %v3296_v11  }
0x1b7d   :  { %1780 = vperm.xlu1 %2493, %v3296_v11  }
0x1b84   :  { %2497 = vset.pattern.permute.xlu0 %v2813_v23  ;;  %2499 = vset.pattern.permute.xlu2 %v2814_v41 }
0x1b85   :  { %2496 = vset.pattern.permute.xlu1 %v2811_v34  ;;  %1840 = vperm.xlu0 %2497, %v3296_v11  }
0x1b86   :  { %1775 = vperm.xlu1 %2496, %v3296_v11  }
0x1b8e   :  { %2498 = vset.pattern.permute.xlu1 %v2812_v6 }
0x1bce   :  { %v1737_v59 = vpop.permute.xlu2 %1736 }
0x1bd6   :  { %v1791_v17 = vpop.permute.xlu2 %1790 }
0x1be6   :  { %v1747_v61 = vpop.permute.xlu0 %1746 }
0x1be7   :  { %v1727_v57 = vpop.permute.xlu1 %1726 }
0x1be8   :  { %v1729_v58 = vadd.f32 %v1727_v57, %v1719_v56  ;;  %v2816_v56 = vmov 114   ;;  %v2817_v57 = vmov 115  }
0x1be9   :  { %2502 = vset.pattern.permute.xlu0 %v2816_v56 }
0x1bea   :  { %v1739_v60 = vadd.f32 %v1737_v59, %v1729_v58  ;;  %v2818_v58 = vmov 113   ;;  %v2819_v59 = vmov 112  }
0x1bec   :  { %v3354_v63 = vadd.f32 %v1747_v61, %v1739_v60 }
0x1bee   :  { %v1750_v35 = vsub.f32 %v3354_v63, %v1691_v31  ;;  %v1801_v13 = vpop.permute.xlu0 %1800  ;;  %v1809_v3 = vsub.f32 %v3341_v30, %v3354_v63 }
0x1bef   :  { %v1781_v18 = vpop.permute.xlu1 %1780 }
0x1bf0   :  { %v1751_v8 = vadd.f32 %v1750_v35, %v3323_v62 }
0x1bf2   :  { %v1752_v20 = vpack.c.bf16 %v1751_v8, %v1751_v8 }
0x1bf4   :  { %2234 = vmatmul.msk.bf16.vlgmr.msra.gmra.mxu2 %vm79_vm0, %v1752_v20 }
0x1bf7   :  { %v1841_v46 = vpop.permute.xlu0 %1840 }
0x1bf8   :  { %v1776_v36 = vpop.permute.xlu1 %1775 }
0x1c77   :  { %v1765_v9 = vpop.f32.mrf.mxu2 }
0x1c78   :  { %v1766_v10 = vadd.f32 %v3331_v0, %v1765_v9 }
0x1c7a   :  { %v1769_v52 = vpack.c.bf16 %v1766_v10, %v1766_v10 }
0x1c7c   :  { %v1770_v53 = vunpack.c.l.bf16 %v1769_v52 }
0x1c7e   :  { %2574 = vtanh.f32 %v1770_v53 }
0x1c7f   :  { %v1767_v12 = vpop.f32.mrf.mxu2 }
0x1c84   :  { %v2575_v14 = vpop.eup %2574 }
0x1c85   :  { %v1772_v15 = vpack.c.bf16 %v2575_v14, %v2575_v14 }
0x1c87   :  { %v1773_v1 = vunpack.c.l.bf16 %v1772_v15 }
0x1c89   :  { %v1783_v19 = vmul.f32 %v1781_v18, %v1773_v1  ;;  %v1793_v22 = vmul.f32 %v1791_v17, %v1773_v1  ;;  %v1803_v2 = vmul.f32 %v1801_v13, %v1773_v1  ;;  %v1778_v28 = vmul.f32 %v1776_v36, %v1773_v1 }
0x1c8b   :  { %1795 = vrot.lane.b32.xlu1 %v1793_v22, %s2700_s19  ;;  %1785 = vrot.lane.b32.xlu2 %v1783_v19, %s2707_s26 }
0x1c93   :  { %1805 = vrot.lane.b32.xlu2 %v1803_v2, %s2706_s25  ;;  %1850 = vperm.xlu1 %2498, %v3296_v11  }
0x1c9b   :  { %1860 = vperm.xlu2 %2499, %v3296_v11   ;;  %2500 = vset.pattern.permute.xlu1 %v2815_v26 }
0x1c9c   :  { %1835 = vperm.xlu1 %2500, %v3296_v11  }
0x1ca3   :  { %2501 = vset.pattern.permute.xlu2 %v2818_v58 }
0x1ca4   :  { %2503 = vset.pattern.permute.xlu1 %v2817_v57 }
0x1ce5   :  { %v1786_v27 = vpop.permute.xlu2 %1785 }
0x1ce6   :  { %v1788_v29 = vadd.f32 %v1786_v27, %v1778_v28 }
0x1ced   :  { %v1806_v33 = vpop.permute.xlu2 %1805 }
0x1cf5   :  { %v1861_v49 = vpop.permute.xlu2 %1860 }
0x1cfd   :  { %v1796_v31 = vpop.permute.xlu1 %1795 }
0x1cfe   :  { %v1798_v32 = vadd.f32 %v1796_v31, %v1788_v29  ;;  %v2820_v31 = vmov 117  }
0x1d00   :  { %v1808_v24 = vadd.f32 %v1806_v33, %v1798_v32  ;;  %v2821_v32 = vmov 119   ;;  %v2822_v33 = vmov 118  }
0x1d02   :  { %v1810_v37 = vadd.f32 %v1809_v3, %v1808_v24  ;;  %v1869_v61 = vadd.f32 %v1808_v24, %v3354_v63  ;;  %v2823_v3 = vmov 116  }
0x1d04   :  { %v1811_v38 = vadd.f32 %v1810_v37, %v3323_v62  ;;  %v1870_v20 = vmul.f32 3.0, %v1869_v61 }
0x1d05   :  { %v1851_v51 = vpop.permute.xlu1 %1850 }
0x1d06   :  { %v1812_v55 = vpack.c.bf16 %v1811_v38, %v1811_v38  ;;  %v1871_v12 = vadd.f32 %v1870_v20, %v3341_v30  ;;  %v2825_v20 = vmov 121  }
0x1d08   :  { %2235 = vmatmul.msk.bf16.vlgmr.msra.gmra.mxu3 %vm79_vm0, %v1812_v55 }
0x1d0e   :  { %v1836_v60 = vpop.permute.xlu1 %1835 }
0x1d8b   :  { %v1825_v39 = vpop.f32.mrf.mxu3 }
0x1d8c   :  { %v1826_v40 = vadd.f32 %v3331_v0, %v1825_v39 }
0x1d8e   :  { %v1829_v42 = vpack.c.bf16 %v1826_v40, %v1826_v40 }
0x1d90   :  { %v1830_v47 = vunpack.c.l.bf16 %v1829_v42 }
0x1d92   :  { %2576 = vtanh.f32 %v1830_v47 }
0x1d93   :  { %v1827_v43 = vpop.f32.mrf.mxu3 }
0x1d98   :  { %v2577_v44 = vpop.eup %2576 }
0x1d99   :  { %v1832_v45 = vpack.c.bf16 %v2577_v44, %v2577_v44 }
0x1d9b   :  { %v1833_v50 = vunpack.c.l.bf16 %v1832_v45 }
0x1d9d   :  { %v1853_v4 = vmul.f32 %v1851_v51, %v1833_v50  ;;  %v1843_v34 = vmul.f32 %v1841_v46, %v1833_v50  ;;  %v1863_v54 = vmul.f32 %v1861_v49, %v1833_v50  ;;  %v1838_v8 = vmul.f32 %v1836_v60, %v1833_v50 }
0x1d9f   :  { %1865 = vrot.lane.b32.xlu1 %v1863_v54, %s2706_s25  ;;  %1855 = vrot.lane.b32.xlu0 %v1853_v4, %s2700_s19 }
0x1da0   :  { %1845 = vrot.lane.b32.xlu2 %v1843_v34, %s2707_s26 }
0x1da7   :  { %1935 = vperm.xlu1 %2503, %v3296_v11   ;;  %1925 = vperm.xlu0 %2502, %v3296_v11  }
0x1da8   :  { %1915 = vperm.xlu2 %2501, %v3296_v11  }
0x1daf   :  { %2505 = vset.pattern.permute.xlu1 %v2820_v31  ;;  %2507 = vset.pattern.permute.xlu0 %v2821_v32 }
0x1db0   :  { %2504 = vset.pattern.permute.xlu2 %v2819_v59 }
0x1db1   :  { %1910 = vperm.xlu2 %2504, %v3296_v11  }
0x1db9   :  { %2506 = vset.pattern.permute.xlu2 %v2822_v33 }
0x1dfa   :  { %v1846_v35 = vpop.permute.xlu2 %1845 }
0x1dfb   :  { %v1848_v9 = vadd.f32 %v1846_v35, %v1838_v8  ;;  %v2824_v8 = vmov 122  }
0x1e02   :  { %v1916_v36 = vpop.permute.xlu2 %1915 }
0x1e0b   :  { %v1911_v24 = vpop.permute.xlu2 %1910 }
0x1e11   :  { %v1856_v10 = vpop.permute.xlu0 %1855  ;;  %v1866_v53 = vpop.permute.xlu1 %1865 }
0x1e12   :  { %v1858_v52 = vadd.f32 %v1856_v10, %v1848_v9  ;;  %v2826_v9 = vmov 123   ;;  %v2827_v10 = vmov 120  }
0x1e14   :  { %v1868_v14 = vadd.f32 %v1866_v53, %v1858_v52 }
0x1e16   :  { %v1872_v15 = vadd.f32 %v1871_v12, %v1868_v14 }
0x1e18   :  { %v1873_v17 = vmul.f32 0.125, %v1872_v15 }
0x1e19   :  { %v1936_v23 = vpop.permute.xlu1 %1935  ;;  %v1926_v41 = vpop.permute.xlu0 %1925 }
0x1e1a   :  { %v3382_v1 = vadd.f32 %v1873_v17, %v3323_v62 }
0x1e1c   :  { %v1887_v18 = vpack.c.bf16 %v3382_v1, %v3382_v1 }
0x1e1e   :  { %2236 = vmatmul.msk.bf16.vlgmr.msrb.gmra.mxu0 %vm79_vm0, %v1887_v18 }
0x1e9b   :  { %v1900_v63 = vpop.f32.mrf.mxu0 }
0x1e9c   :  { %v1901_v19 = vadd.f32 %v3331_v0, %v1900_v63 }
0x1e9e   :  { %v1904_v22 = vpack.c.bf16 %v1901_v19, %v1901_v19 }
0x1ea0   :  { %v1905_v13 = vunpack.c.l.bf16 %v1904_v22 }
0x1ea2   :  { %2578 = vtanh.f32 %v1905_v13 }
0x1ea3   :  { %v1902_v2 = vpop.f32.mrf.mxu0 }
0x1ea4   :  { %v2828_v2 = vmov 127  }
0x1ea8   :  { %v2579_v6 = vpop.eup %2578 }
0x1ea9   :  { %v1907_v30 = vpack.c.bf16 %v2579_v6, %v2579_v6 }
0x1eab   :  { %v1908_v26 = vunpack.c.l.bf16 %v1907_v30 }
0x1ead   :  { %v1918_v27 = vmul.f32 %v1916_v36, %v1908_v26  ;;  %v1938_v28 = vmul.f32 %v1936_v23, %v1908_v26  ;;  %v1928_v29 = vmul.f32 %v1926_v41, %v1908_v26  ;;  %v1913_v37 = vmul.f32 %v1911_v24, %v1908_v26 }
0x1eae   :  { %v2829_v26 = vmov 125  }
0x1eaf   :  { %1940 = vrot.lane.b32.xlu0 %v1938_v28, %s2706_s25  ;;  %1930 = vrot.lane.b32.xlu2 %v1928_v29, %s2700_s19 }
0x1eb0   :  { %1920 = vrot.lane.b32.xlu1 %v1918_v27, %s2707_s26 }
0x1eb7   :  { %1994 = vperm.xlu0 %2507, %v3296_v11   ;;  %1984 = vperm.xlu2 %2506, %v3296_v11  }
0x1eb8   :  { %1974 = vperm.xlu1 %2505, %v3296_v11  }
0x1ebf   :  { %2509 = vset.pattern.permute.xlu0 %v2825_v20  ;;  %2511 = vset.pattern.permute.xlu2 %v2826_v9 }
0x1ec0   :  { %2508 = vset.pattern.permute.xlu1 %v2823_v3  ;;  %2033 = vperm.xlu0 %2509, %v3296_v11  }
0x1ec1   :  { %1969 = vperm.xlu1 %2508, %v3296_v11  }
0x1ec9   :  { %2510 = vset.pattern.permute.xlu1 %v2824_v8 }
0x1f09   :  { %v1931_v39 = vpop.permute.xlu2 %1930 }
0x1f11   :  { %v1985_v56 = vpop.permute.xlu2 %1984 }
0x1f21   :  { %v1941_v42 = vpop.permute.xlu0 %1940 }
0x1f22   :  { %v1921_v38 = vpop.permute.xlu1 %1920 }
0x1f23   :  { %v1923_v55 = vadd.f32 %v1921_v38, %v1913_v37  ;;  %v84_v38 = vld [vmem:[%s3483_s3] sm:$0xff] }
0x1f25   :  { %v1933_v40 = vadd.f32 %v1931_v39, %v1923_v55  ;;  %v2830_v55 = vmov 124   ;;  %v83_v39 = vld [vmem:[%s3482_s2] sm:$0xff] }
0x1f26   :  { %vm353_vm1 = vcmp.eq.s32.totalorder %v83_v39, 0  ;;  %vm611_vm2 = vcmp.eq.s32.totalorder %v83_v39, 1  ;;  %vm1117_vm3 = vcmp.eq.s32.totalorder %v83_v39, 3  ;;  %vm864_vm4 = vcmp.eq.s32.totalorder %v83_v39, 2 }
0x1f27   :  { %v3395_v47 = vadd.f32 %v1941_v42, %v1933_v40  ;;  %v362_v40 = vsel %vm353_vm1, 1, %v2704_v7  ;;  %v81_v42 = vld [vmem:[#allocation4] sm:$0xff]  ;;  %vm1876_vm5 = vcmp.eq.s32.totalorder %v83_v39, 6  ;;  %vm1623_vm6 = vcmp.eq.s32.totalorder %v83_v39, 5 }
0x1f28   :  { %82 = vst.msk [vmem:[#allocation3] sm:$0xff] %vm79_vm0, %v81_v42  ;;  %vm1370_vm7 = vcmp.eq.s32.totalorder %v83_v39, 4  ;;  %vm2129_vm8 = vcmp.eq.s32.totalorder %v83_v39, 7 }
0x1f29   :  { %v1944_v43 = vmul.f32 0.33333334, %v3395_v47  ;;  %v1995_v61 = vpop.permute.xlu0 %1994 }
0x1f2a   :  { %v1975_v58 = vpop.permute.xlu1 %1974 }
0x1f2b   :  { %v1945_v44 = vadd.f32 %v1944_v43, %v3382_v1 }
0x1f2d   :  { %v1946_v45 = vpack.c.bf16 %v1945_v44, %v1945_v44 }
0x1f2f   :  { %2237 = vmatmul.msk.bf16.vlgmr.msrb.gmra.mxu1 %vm79_vm0, %v1946_v45 }
0x1f32   :  { %v2034_v29 = vpop.permute.xlu0 %2033 }
0x1f33   :  { %v1970_v52 = vpop.permute.xlu1 %1969 }
0x1fac   :  { %v1959_v46 = vpop.f32.mrf.mxu1 }
0x1fad   :  { %v1960_v49 = vadd.f32 %v3331_v0, %v1959_v46 }
0x1faf   :  { %v1963_v50 = vpack.c.bf16 %v1960_v49, %v1960_v49 }
0x1fb1   :  { %v1964_v51 = vunpack.c.l.bf16 %v1963_v50 }
0x1fb3   :  { %2580 = vtanh.f32 %v1964_v51 }
0x1fb4   :  { %v1961_v4 = vpop.f32.mrf.mxu1 }
0x1fb9   :  { %v2581_v34 = vpop.eup %2580 }
0x1fba   :  { %v1966_v54 = vpack.c.bf16 %v2581_v34, %v2581_v34 }
0x1fbc   :  { %v1967_v57 = vunpack.c.l.bf16 %v1966_v54 }
0x1fbe   :  { %v1977_v59 = vmul.f32 %v1975_v58, %v1967_v57  ;;  %v1987_v60 = vmul.f32 %v1985_v56, %v1967_v57  ;;  %v1997_v35 = vmul.f32 %v1995_v61, %v1967_v57  ;;  %v1972_v12 = vmul.f32 %v1970_v52, %v1967_v57 }
0x1fc0   :  { %1989 = vrot.lane.b32.xlu1 %v1987_v60, %s2700_s19  ;;  %1979 = vrot.lane.b32.xlu2 %v1977_v59, %s2707_s26 }
0x1fc8   :  { %1999 = vrot.lane.b32.xlu2 %v1997_v35, %s2706_s25  ;;  %2043 = vperm.xlu1 %2510, %v3296_v11  }
0x1fd0   :  { %2053 = vperm.xlu2 %2511, %v3296_v11   ;;  %2512 = vset.pattern.permute.xlu1 %v2827_v10 }
0x1fd1   :  { %2028 = vperm.xlu1 %2512, %v3296_v11  }
0x1fd8   :  { %2513 = vset.pattern.permute.xlu2 %v2829_v26 }
0x1fd9   :  { %2515 = vset.pattern.permute.xlu1 %v2828_v2  ;;  %v2133_v2 = vsel %vm2129_vm8, 1, %v2704_v7 }
0x201a   :  { %v1980_v53 = vpop.permute.xlu2 %1979 }
0x201b   :  { %v1982_v14 = vadd.f32 %v1980_v53, %v1972_v12 }
0x2022   :  { %v2000_v18 = vpop.permute.xlu2 %1999 }
0x202a   :  { %v2054_v31 = vpop.permute.xlu2 %2053 }
0x2032   :  { %v1990_v15 = vpop.permute.xlu1 %1989 }
0x2033   :  { %v1992_v17 = vadd.f32 %v1990_v15, %v1982_v14 }
0x2035   :  { %v3408_v63 = vadd.f32 %v2000_v18, %v1992_v17  ;;  %v1121_v17 = vsel %vm1117_vm3, 1, %v2704_v7  ;;  %v868_v18 = vsel %vm864_vm4, 1, %v2704_v7 }
0x2037   :  { %v2003_v19 = vsub.f32 %v3408_v63, %v1944_v43  ;;  %v2831_v43 = vmov 126   ;;  %v2062_v34 = vsub.f32 %v3395_v47, %v3408_v63 }
0x2038   :  { %2514 = vset.pattern.permute.xlu0 %v2831_v43 }
0x2039   :  { %v2004_v22 = vadd.f32 %v2003_v19, %v3382_v1  ;;  %v1880_v19 = vsel %vm1876_vm5, 1, %v2704_v7 }
0x203a   :  { %v2044_v33 = vpop.permute.xlu1 %2043 }
0x203b   :  { %v2005_v13 = vpack.c.bf16 %v2004_v22, %v2004_v22  ;;  %v1627_v22 = vsel %vm1623_vm6, 1, %v2704_v7 }
0x203d   :  { %2238 = vmatmul.msk.bf16.vlgmr.msrb.gmra.mxu2 %vm79_vm0, %v2005_v13  ;;  %v1374_v13 = vsel %vm1370_vm7, 1, %v2704_v7 }
0x2043   :  { %v2029_v44 = vpop.permute.xlu1 %2028 }
0x20c0   :  { %v2018_v6 = vpop.f32.mrf.mxu2 }
0x20c1   :  { %v2019_v30 = vadd.f32 %v3331_v0, %v2018_v6  ;;  %v2252_v6 = vld [vmem:[#allocation9 + $0x8] sm:$0xff] }
0x20c2   :  { %2174 = vmatpush.bf16.msra.mxu0 %v2252_v6 }
0x20c3   :  { %v2022_v23 = vpack.c.bf16 %v2019_v30, %v2019_v30 }
0x20c5   :  { %v2023_v41 = vunpack.c.l.bf16 %v2022_v23  ;;  %v2251_v23 = vld [vmem:[#allocation9] sm:$0xff] }
0x20c6   :  { %2175 = vmatpush.bf16.msra.mxu0 %v2251_v23 }
0x20c7   :  { %2582 = vtanh.f32 %v2023_v41 }
0x20c8   :  { %v2020_v36 = vpop.f32.mrf.mxu2 }
0x20cd   :  { %v2583_v27 = vpop.eup %2582 }
0x20ce   :  { %v2025_v28 = vpack.c.bf16 %v2583_v27, %v2583_v27 }
0x20d0   :  { %v2026_v32 = vunpack.c.l.bf16 %v2025_v28 }
0x20d2   :  { %v2046_v3 = vmul.f32 %v2044_v33, %v2026_v32  ;;  %v2036_v24 = vmul.f32 %v2034_v29, %v2026_v32  ;;  %v2056_v37 = vmul.f32 %v2054_v31, %v2026_v32  ;;  %v2031_v46 = vmul.f32 %v2029_v44, %v2026_v32  ;;  %v2594_v33 = vld [vmem:[#allocation2] sm:$0xff] }
0x20d3   :  { %v865_v44 = vsub.f32 %v3126_v25, %v3052_v21 }
0x20d4   :  { %2058 = vrot.lane.b32.xlu1 %v2056_v37, %s2706_s25  ;;  %2048 = vrot.lane.b32.xlu0 %v2046_v3, %s2700_s19  ;;  %v354_v3 = vsub.f32 %v2990_v16, %v2594_v33 }
0x20d5   :  { %2038 = vrot.lane.b32.xlu2 %v2036_v24, %s2707_s26 }
0x20dc   :  { %2113 = vperm.xlu1 %2515, %v3296_v11   ;;  %2103 = vperm.xlu0 %2514, %v3296_v11  }
0x20dd   :  { %2093 = vperm.xlu2 %2513, %v3296_v11  }
0x20e4   :  { %2517 = vset.pattern.permute.xlu1 %v2704_v7  ;;  %2519 = vset.pattern.permute.xlu0 %v2704_v7 }
0x20e5   :  { %357 = vperm.xlu1 %2517, %v84_v38   ;;  %2516 = vset.pattern.permute.xlu2 %v2830_v55  ;;  %v612_v38 = vsub.f32 %v3052_v21, %v2990_v16 }
0x20e6   :  { %2088 = vperm.xlu2 %2516, %v3296_v11  }
0x20ee   :  { %2518 = vset.pattern.permute.xlu2 %v2704_v7 }
0x20ef   :  { %364 = vperm.xlu2 %2518, %v362_v40  }
0x212f   :  { %v2039_v45 = vpop.permute.xlu2 %2038 }
0x2130   :  { %v2041_v49 = vadd.f32 %v2039_v45, %v2031_v46  ;;  %v88_v45 = vld [vmem:[#allocation3] sm:$0xff] }
0x2137   :  { %v2094_v52 = vpop.permute.xlu2 %2093 }
0x2140   :  { %v2089_v30 = vpop.permute.xlu2 %2088 }
0x2146   :  { %v2049_v50 = vpop.permute.xlu0 %2048  ;;  %v2059_v4 = vpop.permute.xlu1 %2058 }
0x2147   :  { %v2051_v51 = vadd.f32 %v2049_v50, %v2041_v49 }
0x2149   :  { %v2061_v54 = vadd.f32 %v2059_v4, %v2051_v51  ;;  %v365_v26 = vpop.permute.xlu2 %364 }
0x214a   :  { %vm366_vm9 = vcmp.eq.s32.totalorder %v365_v26, 1 }
0x214b   :  { %v2063_v56 = vadd.f32 %v2062_v34, %v2061_v54  ;;  %v2122_v36 = vadd.f32 %v2061_v54, %v3408_v63 }
0x214d   :  { %v2064_v57 = vadd.f32 %v2063_v56, %v3382_v1  ;;  %v2123_v32 = vmul.f32 3.0, %v2122_v36  ;;  %v1371_v56 = vsub.f32 %v3255_v48, %v3193_v5 }
0x214e   :  { %v2104_v9 = vpop.permute.xlu0 %2103  ;;  %v2114_v53 = vpop.permute.xlu1 %2113 }
0x214f   :  { %v2065_v58 = vpack.c.bf16 %v2064_v57, %v2064_v57  ;;  %v2124_v55 = vadd.f32 %v2123_v32, %v3395_v47  ;;  %v1118_v47 = vsub.f32 %v3193_v5, %v3126_v25 }
0x2151   :  { %2239 = vmatmul.msk.bf16.vlgmr.msrb.gmra.mxu3 %vm79_vm0, %v2065_v58 }
0x2157   :  { %v358_v41 = vpop.permute.xlu1 %357 }
0x2158   :  { %v613_v40 = vmul.f32 %v612_v38, %v358_v41  ;;  %v866_v51 = vmul.f32 %v865_v44, %v358_v41  ;;  %v1119_v58 = vmul.f32 %v1118_v47, %v358_v41 }
0x215a   :  { %v614_v4 = vadd.f32 %v613_v40, %v2990_v16  ;;  %v1624_v16 = vsub.f32 %v3323_v62, %v3255_v48 }
0x21d4   :  { %v2078_v11 = vpop.f32.mrf.mxu3 }
0x21d5   :  { %v2079_v59 = vadd.f32 %v3331_v0, %v2078_v11  ;;  %v615_v0 = vsel %vm611_vm2, 1, %v2704_v7  ;;  %v360_v7 = vmul.f32 %v358_v41, %v354_v3  ;;  %v867_v11 = vadd.f32 %v866_v51, %v3052_v21 }
0x21d7   :  { %v2082_v60 = vpack.c.bf16 %v2079_v59, %v2079_v59  ;;  %v361_v42 = vadd.f32 %v2594_v33, %v360_v7  ;;  %v1372_v59 = vmul.f32 %v1371_v56, %v358_v41 }
0x21d9   :  { %v2083_v61 = vunpack.c.l.bf16 %v2082_v60  ;;  %v367_v34 = vsel %vm366_vm9, %v361_v42, %v88_v45 }
0x21db   :  { %2584 = vtanh.f32 %v2083_v61 }
0x21dc   :  { %v2080_v35 = vpop.f32.mrf.mxu3 }
0x21dd   :  { %v1120_v35 = vadd.f32 %v1119_v58, %v3126_v25 }
0x21e1   :  { %v2585_v8 = vpop.eup %2584 }
0x21e2   :  { %v2085_v20 = vpack.c.bf16 %v2585_v8, %v2585_v8  ;;  %v1625_v8 = vmul.f32 %v1624_v16, %v358_v41 }
0x21e4   :  { %v2086_v10 = vunpack.c.l.bf16 %v2085_v20 }
0x21e6   :  { %v2106_v12 = vmul.f32 %v2104_v9, %v2086_v10  ;;  %v2116_v14 = vmul.f32 %v2114_v53, %v2086_v10  ;;  %v2096_v15 = vmul.f32 %v2094_v52, %v2086_v10  ;;  %v2091_v28 = vmul.f32 %v2089_v30, %v2086_v10 }
0x21e7   :  { %v1373_v9 = vadd.f32 %v1372_v59, %v3193_v5  ;;  %v1877_v10 = vsub.f32 %v3382_v1, %v3323_v62 }
0x21e8   :  { %2118 = vrot.lane.b32.xlu0 %v2116_v14, %s2706_s25  ;;  %2108 = vrot.lane.b32.xlu2 %v2106_v12, %s2700_s19  ;;  %v1626_v14 = vadd.f32 %v1625_v8, %v3255_v48  ;;  %v2521_v48 = vld [vmem:[%s3487_s7] ss:$0 sm:$0xff]  ;;  %s2187_s19 = sshll.u32 %s2832_s18, 4  ;;  %s2188_s19 = int_to_ptr.vmem [resolvable:$true] %s2187_s19 }
0x21e9   :  { %2098 = vrot.lane.b32.xlu1 %v2096_v15, %s2707_s26  ;;  %v1878_v12 = vmul.f32 %v1877_v10, %v358_v41 }
0x21f0   :  { %617 = vperm.xlu0 %2519, %v615_v0   ;;  %1123 = vperm.xlu2 %2518, %v1121_v17   ;;  %v1879_v17 = vadd.f32 %v1878_v12, %v3323_v62 }
0x21f1   :  { %870 = vperm.xlu1 %2517, %v868_v18  }
0x21f8   :  { %1882 = vperm.xlu0 %2519, %v1880_v19   ;;  %1629 = vperm.xlu2 %2518, %v1627_v22  }
0x21f9   :  { %1376 = vperm.xlu1 %2517, %v1374_v13  }
0x2201   :  { %2135 = vperm.xlu1 %2517, %v2133_v2  }
0x2242   :  { %v2109_v29 = vpop.permute.xlu2 %2108 }
0x224a   :  { %v1124_v46 = vpop.permute.xlu2 %1123 }
0x224b   :  { %vm1125_vm12 = vcmp.eq.s32.totalorder %v1124_v46, 1 }
0x2252   :  { %v1630_v52 = vpop.permute.xlu2 %1629 }
0x2253   :  { %vm1631_vm14 = vcmp.eq.s32.totalorder %v1630_v52, 1 }
0x225a   :  { %v2119_v27 = vpop.permute.xlu0 %2118 }
0x225b   :  { %v2099_v31 = vpop.permute.xlu1 %2098 }
0x225c   :  { %v2101_v24 = vadd.f32 %v2099_v31, %v2091_v28 }
0x225e   :  { %v2111_v37 = vadd.f32 %v2109_v29, %v2101_v24 }
0x2260   :  { %v2121_v39 = vadd.f32 %v2119_v27, %v2111_v37 }
0x2262   :  { %v2125_v63 = vadd.f32 %v2124_v55, %v2121_v39  ;;  %v618_v43 = vpop.permute.xlu0 %617 }
0x2263   :  { %v871_v49 = vpop.permute.xlu1 %870  ;;  %vm619_vm10 = vcmp.eq.s32.totalorder %v618_v43, 1 }
0x2264   :  { %v2126_v50 = vmul.f32 0.125, %v2125_v63  ;;  %v620_v57 = vsel %vm619_vm10, %v614_v4, %v367_v34  ;;  %vm872_vm11 = vcmp.eq.s32.totalorder %v871_v49, 1 }
0x2265   :  { %v873_v60 = vsel %vm872_vm11, %v867_v11, %v620_v57 }
0x2266   :  { %v2127_v54 = vadd.f32 %v2126_v50, %v3382_v1  ;;  %v1126_v21 = vsel %vm1125_vm12, %v1120_v35, %v873_v60 }
0x2268   :  { %2139 = vst.msk [vmem:[#allocation2] sm:$0xff] %vm79_vm0, %v2127_v54  ;;  %v2130_v20 = vsub.f32 %v2127_v54, %v3382_v1 }
0x226a   :  { %v2131_v15 = vmul.f32 %v2130_v20, %v358_v41  ;;  %v1883_v0 = vpop.permute.xlu0 %1882 }
0x226b   :  { %v1377_v61 = vpop.permute.xlu1 %1376  ;;  %vm1884_vm15 = vcmp.eq.s32.totalorder %v1883_v0, 1 }
0x226c   :  { %vm1378_vm13 = vcmp.eq.s32.totalorder %v1377_v61, 1  ;;  %v2132_v5 = vadd.f32 %v2131_v15, %v3382_v1 }
0x226d   :  { %v1379_v53 = vsel %vm1378_vm13, %v1373_v9, %v1126_v21 }
0x226e   :  { %v1632_v25 = vsel %vm1631_vm14, %v1626_v14, %v1379_v53 }
0x226f   :  { %v1885_v19 = vsel %vm1884_vm15, %v1879_v17, %v1632_v25 }
0x2273   :  { %v2136_v18 = vpop.permute.xlu1 %2135 }
0x2274   :  { %vm2137_vm1 = vcmp.eq.s32.totalorder %v2136_v18, 1 }
0x2275   :  { %v2138_v22 = vsel %vm2137_vm1, %v2132_v5, %v1885_v19 }
0x2276   :  { %2140 = vst.msk [vmem:[#allocation3] sm:$0xff] %vm79_vm0, %v2138_v22  ;;  %v2144_v13 = vpack.c.bf16 %v2138_v22, %v2138_v22 }
0x2278   :  { %2248 = vmatmul.msk.bf16.vlgmr.msra.gmra.mxu0 %vm79_vm0, %v2144_v13 }
0x22f5   :  { %v2177_v62 = vpop.f32.mrf.mxu0 }
0x22f6   :  { %v2178_v1 = vadd.f32 %v2521_v48, %v2177_v62 }
0x22f8   :  { %2181 = vst [vmem:[#allocation10] sm:$0xff] %v2178_v1 }
0x22f9   :  { %2192 = dma.vmem_to_hbm [thread:$0]  %s2188_s19, 128, %s2190_s6, [#allocation6]  }
0x22fd   :  { %v2179_v2 = vpop.f32.mrf.mxu0 }
0x22fe   :  { %2695 = dma.done.wait [#allocation6], 128  }
0x22ff   :  { %2696 = vsyncadd [#allocation6], 4294967168 }
0x2300   :  { %2197 = vsyncpa [#allocation5], 1 }
0x2301   :  { %2198 = vsyncpa [#allocation8], 1 }
0x2302   :  { %2199 = vsyncpa [#allocation6], 1 }

</bundles_post_ra>
